<compile_context>
chip_gen: v5e
topology: v5e:2x2
jax: 0.10.0
libtpu: 0.0.40
codegen_flags: <defaults>
</compile_context>

<pallas_src>
import functools

import jax
import jax.numpy as jnp
from jax.experimental import pallas as pl
from jax.experimental.pallas import tpu as pltpu


_LANES = 128


def _generation_tiling():
    """(token_tile_cap, vmem_limit_bytes) derived from the chip's VMEM size.

    v5e/v6e have 128 MiB VMEM per TensorCore -> large token tiles amortize the
    per-grid-step overhead; v7x has 64 MiB -> cap the tile and the scoped-VMEM
    limit.  Conservative fallback if the query is unavailable.
    """
    vmem_cap = 64 * 1024 * 1024
    try:
        vmem_cap = int(pltpu.get_tpu_info().vmem_capacity_bytes)
    except Exception:
        pass
    if vmem_cap >= 96 * 1024 * 1024:          # v5e / v6e (128 MiB)
        return 8192, 80 * 1024 * 1024
    return 4096, 40 * 1024 * 1024             # v7x-class (64 MiB per TC)


# ---------------------------------------------------------------------------
# Pallas kernel: fused multi-branch token MLP (2 layers, ReLU) + pooling
# reduction, feature-major (lane-dense token axis), bf16 MXU / f32 accumulate.
# Shared by the point-cloud branches (max-pool) and image branches (mean-pool).
# ---------------------------------------------------------------------------
def _fused_mlp_pool_kernel(x_ref, w1_ref, b1_ref, w2_ref, b2_ref,
                           out_ref, acc_ref, *, pool, n_tokens, t_tile,
                           vpu_layer1):
    k = pl.program_id(1)

    @pl.when(k == 0)
    def _():
        if pool == "max":
            acc_ref[...] = jnp.full_like(acc_ref, -jnp.inf)
        else:
            acc_ref[...] = jnp.zeros_like(acc_ref)

    x = x_ref[0]                                         # (Cin, tT) bf16

    # ---- layer 1 ----
    if vpu_layer1:
        # Tiny contraction (Cin <= 8): keep it off the MXU.  Cin broadcast
        # multiply-adds on the VPU (f32 elementwise; bf16 only for the DMA).
        xf = x.astype(jnp.float32)
        w1 = w1_ref[...]                                 # (C1, Cin) f32
        cin = xf.shape[0]
        h1 = w1[:, 0:1] * xf[0:1, :]
        for c in range(1, cin):
            h1 = h1 + w1[:, c:c + 1] * xf[c:c + 1, :]
    else:
        h1 = jnp.dot(w1_ref[...], x, preferred_element_type=jnp.float32)
    h1 = jnp.maximum(h1 + b1_ref[...], 0.0)              # (C1, tT) f32

    # ---- layer 2 (MXU, bf16 operands, f32 accumulation) ----
    h2 = jnp.dot(w2_ref[...], h1.astype(jnp.bfloat16),
                 preferred_element_type=jnp.float32)
    h2 = jnp.maximum(h2 + b2_ref[...], 0.0)              # (C2, tT) f32

    # ---- mask the zero-padded tail of the token axis (static predicate) ----
    if (n_tokens % t_tile) != 0:
        col = jax.lax.broadcasted_iota(jnp.int32, (1, t_tile), 1) + k * t_tile
        pad_val = -jnp.inf if pool == "max" else 0.0
        h2 = jnp.where(col < n_tokens, h2, pad_val)

    # ---- lane-chunked partial pooling (VPU only; no per-step XLU reduce) ----
    acc = acc_ref[...]                                    # (C2, 128)
    for j in range(t_tile // _LANES):
        chunk = h2[:, j * _LANES:(j + 1) * _LANES]
        acc = jnp.maximum(acc, chunk) if pool == "max" else acc + chunk
    acc_ref[...] = acc

    @pl.when(k == pl.num_programs(1) - 1)
    def _():
        if pool == "max":
            pooled = jnp.max(acc_ref[...], axis=-1, keepdims=True)   # (C2, 1)
        else:
            pooled = (jnp.sum(acc_ref[...], axis=-1, keepdims=True)
                      * (1.0 / float(n_tokens)))
        out_ref[0] = pooled


def fused_mlp_pool(xt, w1, b1, w2, b2, *, pool):
    """Fused 2-layer token MLP + pool.

    xt: (B, Cin, T) feature-major tokens (lane-dense token axis).
    w1: (Cin, C1), b1: (1, C1), w2: (C1, C2), b2: (1, C2).
    Returns the pooled fused feature (B, C2) in f32.
    """
    B, Cin, T = xt.shape
    C1 = w1.shape[1]
    C2 = w2.shape[1]
    vpu_layer1 = Cin <= 8

    t_cap, vmem_limit = _generation_tiling()
    tT = pl.cdiv(T, _LANES) * _LANES if T <= t_cap else t_cap
    T_pad = pl.cdiv(T, tT) * tT
    kT = T_pad // tT

    x = xt.astype(jnp.bfloat16)
    if T_pad != T:
        x = jnp.pad(x, ((0, 0), (0, 0), (0, T_pad - T)))

    # transposed (feature-major) weight layout; bf16 MXU operands, f32 for the
    # VPU layer-1 path and for the biases.
    w1t = jnp.swapaxes(w1, 0, 1).astype(
        jnp.float32 if vpu_layer1 else jnp.bfloat16)         # (C1, Cin)
    b1t = jnp.swapaxes(b1, 0, 1).astype(jnp.float32)         # (C1, 1)
    w2t = jnp.swapaxes(w2, 0, 1).astype(jnp.bfloat16)        # (C2, C1)
    b2t = jnp.swapaxes(b2, 0, 1).astype(jnp.float32)         # (C2, 1)

    flops = 2 * B * T * (Cin * C1 + C1 * C2)
    bytes_accessed = (2 * B * T_pad * Cin + 2 * (Cin * C1 + C1 * C2)
                      + 4 * (C1 + C2 + B * C2))

    out = pl.pallas_call(
        functools.partial(_fused_mlp_pool_kernel, pool=pool, n_tokens=T,
                          t_tile=tT, vpu_layer1=vpu_layer1),
        out_shape=jax.ShapeDtypeStruct((B, C2, 1), jnp.float32),
        grid_spec=pltpu.PrefetchScalarGridSpec(
            num_scalar_prefetch=0,
            grid=(B, kT),
            in_specs=[
                pl.BlockSpec((1, Cin, tT), lambda b, k: (b, 0, k)),
                pl.BlockSpec((C1, Cin), lambda b, k: (0, 0)),
                pl.BlockSpec((C1, 1), lambda b, k: (0, 0)),
                pl.BlockSpec((C2, C1), lambda b, k: (0, 0)),
                pl.BlockSpec((C2, 1), lambda b, k: (0, 0)),
            ],
            out_specs=pl.BlockSpec((1, C2, 1), lambda b, k: (b, 0, 0)),
            scratch_shapes=[pltpu.VMEM((C2, _LANES), jnp.float32)],
        ),
        compiler_params=pltpu.CompilerParams(
            dimension_semantics=("parallel", "arbitrary"),
            vmem_limit_bytes=vmem_limit,
        ),
        cost_estimate=pl.CostEstimate(
            flops=flops, transcendentals=0, bytes_accessed=bytes_accessed),
    )(x, w1t, b1t, w2t, b2t)
    return out[:, :, 0]                                       # (B, C2)


# ---------------------------------------------------------------------------
# Branch fusion: concat layer-1 weights, block-diagonal layer-2 weights.
# Exactly equivalent to running the branches separately (off-diagonal zeros
# contribute nothing through the ReLU MLP and the per-column pooling).
# ---------------------------------------------------------------------------
def _block_diag(mats):
    rows = sum(m.shape[0] for m in mats)
    cols = sum(m.shape[1] for m in mats)
    out = jnp.zeros((rows, cols), mats[0].dtype)
    r = c = 0
    for m in mats:
        out = out.at[r:r + m.shape[0], c:c + m.shape[1]].set(m)
        r += m.shape[0]
        c += m.shape[1]
    return out


def _fuse_branches(*branches):
    """branches: tuples (w1, b1, w2, b2) -> fused (w1cat, b1cat, w2blk, b2cat)."""
    w1 = jnp.concatenate([br[0] for br in branches], axis=1)
    b1 = jnp.concatenate([br[1] for br in branches], axis=1)
    w2 = _block_diag([br[2] for br in branches])
    b2 = jnp.concatenate([br[3] for br in branches], axis=1)
    return w1, b1, w2, b2


# ---------------------------------------------------------------------------
# Glue helpers (tiny matmuls / matrix assembly stay in plain JAX).
# ---------------------------------------------------------------------------
def _dense(x, w, b):
    return x @ w + b


def _im2col3x3_fm(img):
    """NCHW (B, C, H, W) -> feature-major 3x3 patches (B, C*9, H*W).

    TODO(synk): at real image resolutions move this im2col inside the Pallas
    kernel (9 shifted-slice matmuls / pltpu.roll against (C, C1) weight
    slices) to avoid the 9x-inflated patch tensor in HBM.
    """
    B, C, H, W = img.shape
    p = jnp.pad(img, ((0, 0), (0, 0), (1, 1), (1, 1)))
    cols = []
    for dy in range(3):
        for dx in range(3):
            cols.append(p[:, :, dy:dy + H, dx:dx + W])
    col = jnp.stack(cols, axis=2)                       # (B, C, 9, H, W)
    return col.reshape(B, C * 9, H * W)                 # (B, 27, HW)


def _rodrigues(w):
    """Axis-angle (B, 3) -> rotation matrices (B, 3, 3)."""
    theta = jnp.sqrt(jnp.sum(w * w, axis=-1, keepdims=True) + 1e-12)  # (B,1)
    k = w / theta
    kx, ky, kz = k[:, 0], k[:, 1], k[:, 2]
    z = jnp.zeros_like(kx)
    Kmat = jnp.stack([
        jnp.stack([z, -kz, ky], -1),
        jnp.stack([kz, z, -kx], -1),
        jnp.stack([-ky, kx, z], -1),
    ], axis=1)                                                         # (B,3,3)
    I = jnp.eye(3, dtype=w.dtype)[None]
    st = jnp.sin(theta)[:, :, None]
    ct = jnp.cos(theta)[:, :, None]
    return I + st * Kmat + (1.0 - ct) * (Kmat @ Kmat)


def build_intrinsic(p):
    """Raw (B, 4) -> camera matrix K (B, 3, 3)."""
    fx = 100.0 + p[:, 0]
    fy = 100.0 + p[:, 1]
    cx = p[:, 2]
    cy = p[:, 3]
    z = jnp.zeros_like(fx)
    o = jnp.ones_like(fx)
    return jnp.stack([
        jnp.stack([fx, z, cx], -1),
        jnp.stack([z, fy, cy], -1),
        jnp.stack([z, z, o], -1),
    ], axis=1)


def build_transform(p):
    """Raw (B, 6) [axis-angle, translation] -> homogeneous T (B, 4, 4)."""
    B = p.shape[0]
    R = _rodrigues(0.1 * p[:, :3])
    t = p[:, 3:6][:, :, None]
    top = jnp.concatenate([R, t], axis=-1)                         # (B,3,4)
    bottom = jnp.tile(jnp.array([[[0.0, 0.0, 0.0, 1.0]]], dtype=p.dtype),
                      (B, 1, 1))
    return jnp.concatenate([top, bottom], axis=1)


def compute_cam_T_velo_matrix(K, T, calib, A):
    """cam_T_velo = A @ [K|0] @ T @ calib  ->  (B, 3, 4)."""
    B = K.shape[0]
    K34 = jnp.concatenate([K, jnp.zeros((B, 3, 1), K.dtype)], axis=-1)
    P = jnp.einsum('bij,bjk,bkl->bil', K34, T, calib)
    return jnp.einsum('bij,bjk->bik', A, P)


# ---------------------------------------------------------------------------
# Deterministic parameter init (shapes implied by the forward structure).
# ---------------------------------------------------------------------------
def _init_linear(key, cin, cout):
    kw, kb = jax.random.split(key)
    w = (1.0 / jnp.sqrt(cin)) * jax.random.normal(kw, (cin, cout), jnp.float32)
    b = 0.01 * jax.random.normal(kb, (1, cout), jnp.float32)
    return w, b


def init_params(key, d_pc=3, d_patch=27, c1=64, c2=128, d_net=128):
    ks = jax.random.split(key, 20)
    p = {}
    # Enet: PointNet-style shared MLP + max-pool + feature FC
    p['E_mlp'] = _init_linear(ks[0], d_pc, c1) + _init_linear(ks[1], c1, c2)
    p['E_fc'] = _init_linear(ks[2], c2, d_net)
    # Hnet: image CNN (3x3 conv via im2col + 1x1 conv) + mean-pool + heads
    p['H_mlp'] = _init_linear(ks[3], d_patch, c1) + _init_linear(ks[4], c1, c2)
    p['H_fc'] = _init_linear(ks[5], c2, d_net)
    p['H_intr'] = _init_linear(ks[6], c2, 4)
    p['H_pose'] = _init_linear(ks[7], c2, 6)
    # Fnet: refines calibration from pc + joint feature
    p['F_mlp'] = _init_linear(ks[8], d_pc, c1) + _init_linear(ks[9], c1, c2)
    p['F_fc'] = _init_linear(ks[10], c2, d_net)
    p['F_head'] = _init_linear(ks[11], c2 + d_net, 10)
    # Gnet: refines calibration from pc + img + joint feature
    p['G_mlp_pc'] = _init_linear(ks[12], d_pc, c1) + _init_linear(ks[13], c1, c2)
    p['G_mlp_im'] = _init_linear(ks[14], d_patch, c1) + _init_linear(ks[15], c1, c2)
    p['G_fc'] = _init_linear(ks[16], 2 * c2, d_net)
    p['G_head'] = _init_linear(ks[17], 2 * c2 + d_net, 10)
    return p


# ---------------------------------------------------------------------------
# EFGHBackbone forward.
# ---------------------------------------------------------------------------
def efgh_backbone_forward(params, pc, img, calib, A):
    ret = {}
    c2 = params['E_mlp'][2].shape[1]                               # 128

    # ----- Fused point-cloud kernel: E / F / G_pc pooled features in ONE pass
    #       over pc (max-pool, PointNet style).  Feature-major (B, 3, N) input
    #       keeps the kernel's token DMA lane-dense. -----
    w1p, b1p, w2p, b2p = _fuse_branches(
        params['E_mlp'], params['F_mlp'], params['G_mlp_pc'])
    pc_fm = jnp.swapaxes(pc, 1, 2)                                 # (B, 3, N)
    pc_feats = fused_mlp_pool(pc_fm, w1p, b1p, w2p, b2p, pool="max")
    e_feat = pc_feats[:, 0 * c2:1 * c2]
    f_feat = pc_feats[:, 1 * c2:2 * c2]
    g_pc = pc_feats[:, 2 * c2:3 * c2]

    # ----- Fused image kernel: H / G_im pooled features in ONE pass over the
    #       feature-major im2col patches (3x3 + 1x1 conv as matmuls, mean). ---
    patches = _im2col3x3_fm(img)                                   # (B, 27, HW)
    w1i, b1i, w2i, b2i = _fuse_branches(params['H_mlp'], params['G_mlp_im'])
    im_feats = fused_mlp_pool(patches, w1i, b1i, w2i, b2i, pool="mean")
    h_feat = im_feats[:, 0 * c2:1 * c2]
    g_im = im_feats[:, 1 * c2:2 * c2]

    # ----- Enet(pc) outputs -----
    e_net = jnp.tanh(_dense(e_feat, *params['E_fc']))              # (B, 128)
    ret['e_feature'] = e_feat

    # ----- Hnet(img) outputs -----
    h_net = jnp.tanh(_dense(h_feat, *params['H_fc']))              # (B, 128)
    intr_raw = _dense(h_feat, *params['H_intr'])                   # (B, 4)
    pose_raw = _dense(h_feat, *params['H_pose'])                   # (B, 6)
    ret['h_feature'] = h_feat

    # merge E and H dicts; sum the 'network' features
    ret['network'] = e_net + h_net
    ret['intrinsic_sensor2'] = build_intrinsic(intr_raw)
    ret['sensor2_T_sensor1'] = build_transform(pose_raw)
    ret['eh_cam_T_velo'] = compute_cam_T_velo_matrix(
        ret['intrinsic_sensor2'], ret['sensor2_T_sensor1'], calib, A)

    # ----- Fnet(pc, ret): refine calibration -----
    f_in = jnp.concatenate([f_feat, ret['network']], axis=-1)      # (B, 256)
    f_delta = _dense(f_in, *params['F_head'])                      # (B, 10)
    intr_raw = intr_raw + f_delta[:, :4]
    pose_raw = pose_raw + f_delta[:, 4:]
    ret['network'] = ret['network'] + jnp.tanh(_dense(f_feat, *params['F_fc']))
    ret['intrinsic_sensor2'] = build_intrinsic(intr_raw)
    ret['sensor2_T_sensor1'] = build_transform(pose_raw)
    ret['efh_cam_T_velo'] = compute_cam_T_velo_matrix(
        ret['intrinsic_sensor2'], ret['sensor2_T_sensor1'], calib, A)

    # ----- Gnet(pc, img, ret): final refinement -----
    g_cat = jnp.concatenate([g_pc, g_im], axis=-1)                 # (B, 256)
    g_in = jnp.concatenate([g_cat, ret['network']], axis=-1)       # (B, 384)
    g_delta = _dense(g_in, *params['G_head'])                      # (B, 10)
    intr_raw = intr_raw + g_delta[:, :4]
    pose_raw = pose_raw + g_delta[:, 4:]
    ret['network'] = ret['network'] + jnp.tanh(_dense(g_cat, *params['G_fc']))
    ret['intrinsic_sensor2'] = build_intrinsic(intr_raw)
    ret['sensor2_T_sensor1'] = build_transform(pose_raw)
    ret['efgh_cam_T_velo'] = compute_cam_T_velo_matrix(
        ret['intrinsic_sensor2'], ret['sensor2_T_sensor1'], calib, A)
    ret['cam_T_velo'] = ret['efgh_cam_T_velo']
    return ret


if __name__ == "__main__":
    key = jax.random.PRNGKey(0)
    kp, k1, k2, k3 = jax.random.split(key, 4)

    B, N = 2, 256            # batch, number of lidar points
    C, H, W = 3, 16, 16      # image channels / spatial (NCHW, PyTorch-style)

    params = init_params(kp)
    pc = jax.random.normal(k1, (B, N, 3), jnp.float32)
    img = jax.random.normal(k2, (B, C, H, W), jnp.float32)
    calib = (jnp.tile(jnp.eye(4, dtype=jnp.float32)[None], (B, 1, 1))
             + 0.01 * jax.random.normal(k3, (B, 4, 4), jnp.float32))
    A = jnp.tile(jnp.eye(3, dtype=jnp.float32)[None], (B, 1, 1))

    ret = jax.jit(efgh_backbone_forward)(params, pc, img, calib, A)
    jax.block_until_ready(ret['cam_T_velo'])

    assert ret['network'].shape == (B, 128)
    assert ret['e_feature'].shape == (B, 128)
    assert ret['h_feature'].shape == (B, 128)
    assert ret['intrinsic_sensor2'].shape == (B, 3, 3)
    assert ret['sensor2_T_sensor1'].shape == (B, 4, 4)
    for k in ('eh_cam_T_velo', 'efh_cam_T_velo', 'efgh_cam_T_velo', 'cam_T_velo'):
        assert ret[k].shape == (B, 3, 4)
    assert bool(jnp.all(jnp.isfinite(ret['cam_T_velo'])))
    print("KERNEL_OK")
</pallas_src>

<mosaic_0001>
module attributes {stable_mosaic.version = 11 : i64} {
  func.func @_fused_mlp_pool_kernel(%arg0: i32, %arg1: i32, %arg2: memref<1x27x256xbf16, #tpu.memory_space<vmem>>, %arg3: memref<128x27xbf16, #tpu.memory_space<vmem>>, %arg4: memref<128x1xf32, #tpu.memory_space<vmem>>, %arg5: memref<256x128xbf16, #tpu.memory_space<vmem>>, %arg6: memref<256x1xf32, #tpu.memory_space<vmem>>, %arg7: memref<1x256x1xf32, #tpu.memory_space<vmem>>, %arg8: memref<256x128xf32, #tpu.memory_space<vmem>>) attributes {dimension_semantics = [#tpu.dimension_semantics<parallel>, #tpu.dimension_semantics<arbitrary>], iteration_bounds = array<i64: 2, 1>, scalar_prefetch = 0 : i64, scratch_operands = 1 : i64, tpu.core_type = #tpu.core_type<tc>, window_params = [{transform_indices = @transform_0, window_bounds = array<i64: 1, 27, 256>}, {pipeline_mode = #tpu.pipeline_mode<synchronous>, transform_indices = @transform_1, window_bounds = array<i64: 128, 27>}, {pipeline_mode = #tpu.pipeline_mode<synchronous>, transform_indices = @transform_2, window_bounds = array<i64: 128, 1>}, {pipeline_mode = #tpu.pipeline_mode<synchronous>, transform_indices = @transform_3, window_bounds = array<i64: 256, 128>}, {pipeline_mode = #tpu.pipeline_mode<synchronous>, transform_indices = @transform_4, window_bounds = array<i64: 256, 1>}, {transform_indices = @transform_5, window_bounds = array<i64: 1, 256, 1>}]} {
    %c0_i32 = arith.constant 0 : i32
    %0 = arith.cmpi eq, %arg1, %c0_i32 : i32
    %1 = arith.extui %0 : i1 to i32
    %c0_i32_0 = arith.constant 0 : i32
    %2 = arith.cmpi ne, %1, %c0_i32_0 : i32
    scf.if %2 {
      %cst_20 = arith.constant 0.000000e+00 : f32
      %29 = vector.broadcast %cst_20 : f32 to vector<256x128xf32>
      %c0_21 = arith.constant 0 : index
      %c0_22 = arith.constant 0 : index
      %30 = vector.load %arg8[%c0_21, %c0_22] : memref<256x128xf32, #tpu.memory_space<vmem>>, vector<256x128xf32>
      tpu.vector_store %arg8[%c0_21, %c0_22], %29 {strides = array<i32>} : memref<256x128xf32, #tpu.memory_space<vmem>>, vector<256x128xf32>,
    } else {
    }
    %c0 = arith.constant 0 : index
    %c0_1 = arith.constant 0 : index
    %c0_2 = arith.constant 0 : index
    %3 = vector.load %arg2[%c0, %c0_1, %c0_2] : memref<1x27x256xbf16, #tpu.memory_space<vmem>>, vector<1x27x256xbf16>
    %4 = vector.shape_cast %3 : vector<1x27x256xbf16> to vector<27x256xbf16>
    %c0_3 = arith.constant 0 : index
    %c0_4 = arith.constant 0 : index
    %5 = vector.load %arg3[%c0_3, %c0_4] : memref<128x27xbf16, #tpu.memory_space<vmem>>, vector<128x27xbf16>
    %cst = arith.constant dense<0.000000e+00> : vector<128x256xf32>
    %6 = tpu.matmul %5, %4, %cst {dimension_numbers = #tpu.dot_dimension_numbers<[1], [0], [0], [1], [0, 0, 1, 1], [], []>} : vector<128x27xbf16>, vector<27x256xbf16>, vector<128x256xf32> -> vector<128x256xf32>
    %c0_5 = arith.constant 0 : index
    %c0_6 = arith.constant 0 : index
    %7 = vector.load %arg4[%c0_5, %c0_6] : memref<128x1xf32, #tpu.memory_space<vmem>>, vector<128x1xf32>
    %8 = vector.broadcast %7 : vector<128x1xf32> to vector<128x256xf32>
    %9 = arith.addf %6, %8 : vector<128x256xf32>
    %cst_7 = arith.constant 0.000000e+00 : f32
    %10 = vector.broadcast %cst_7 : f32 to vector<128x256xf32>
    %11 = arith.maximumf %9, %10 : vector<128x256xf32>
    %c0_8 = arith.constant 0 : index
    %c0_9 = arith.constant 0 : index
    %12 = vector.load %arg5[%c0_8, %c0_9] : memref<256x128xbf16, #tpu.memory_space<vmem>>, vector<256x128xbf16>
    %13 = arith.truncf %11 : vector<128x256xf32> to vector<128x256xbf16>
    %cst_10 = arith.constant dense<0.000000e+00> : vector<256x256xf32>
    %14 = tpu.matmul %12, %13, %cst_10 {dimension_numbers = #tpu.dot_dimension_numbers<[1], [0], [0], [1], [0, 0, 1, 1], [], []>} : vector<256x128xbf16>, vector<128x256xbf16>, vector<256x256xf32> -> vector<256x256xf32>
    %c0_11 = arith.constant 0 : index
    %c0_12 = arith.constant 0 : index
    %15 = vector.load %arg6[%c0_11, %c0_12] : memref<256x1xf32, #tpu.memory_space<vmem>>, vector<256x1xf32>
    %16 = vector.broadcast %15 : vector<256x1xf32> to vector<256x256xf32>
    %17 = arith.addf %14, %16 : vector<256x256xf32>
    %cst_13 = arith.constant 0.000000e+00 : f32
    %18 = vector.broadcast %cst_13 : f32 to vector<256x256xf32>
    %19 = arith.maximumf %17, %18 : vector<256x256xf32>
    %c0_14 = arith.constant 0 : index
    %c0_15 = arith.constant 0 : index
    %20 = vector.load %arg8[%c0_14, %c0_15] : memref<256x128xf32, #tpu.memory_space<vmem>>, vector<256x128xf32>
    %21 = vector.extract_strided_slice %19 {offsets = [0, 0], sizes = [256, 128], strides = [1, 1]} : vector<256x256xf32> to vector<256x128xf32>
    %22 = arith.addf %20, %21 : vector<256x128xf32>
    %23 = vector.extract_strided_slice %19 {offsets = [0, 128], sizes = [256, 128], strides = [1, 1]} : vector<256x256xf32> to vector<256x128xf32>
    %24 = arith.addf %22, %23 : vector<256x128xf32>
    %c0_16 = arith.constant 0 : index
    %c0_17 = arith.constant 0 : index
    %25 = vector.load %arg8[%c0_16, %c0_17] : memref<256x128xf32, #tpu.memory_space<vmem>>, vector<256x128xf32>
    tpu.vector_store %arg8[%c0_16, %c0_17], %24 {strides = array<i32>} : memref<256x128xf32, #tpu.memory_space<vmem>>, vector<256x128xf32>,
    %c0_i32_18 = arith.constant 0 : i32
    %26 = arith.cmpi eq, %arg1, %c0_i32_18 : i32
    %27 = arith.extui %26 : i1 to i32
    %c0_i32_19 = arith.constant 0 : i32
    %28 = arith.cmpi ne, %27, %c0_i32_19 : i32
    scf.if %28 {
      %c0_20 = arith.constant 0 : index
      %c0_21 = arith.constant 0 : index
      %29 = vector.load %arg8[%c0_20, %c0_21] : memref<256x128xf32, #tpu.memory_space<vmem>>, vector<256x128xf32>
      %cst_22 = arith.constant dense<0.000000e+00> : vector<256xf32>
      %30 = vector.multi_reduction <add>, %29, %cst_22 [1] : vector<256x128xf32> to vector<256xf32>
      %31 = vector.shape_cast %30 : vector<256xf32> to vector<256x1xf32>
      %cst_23 = arith.constant 3.906250e-03 : f32
      %32 = vector.broadcast %cst_23 : f32 to vector<256x1xf32>
      %33 = arith.mulf %31, %32 : vector<256x1xf32>
      %c0_24 = arith.constant 0 : index
      %c0_25 = arith.constant 0 : index
      %c0_26 = arith.constant 0 : index
      %34 = vector.load %arg7[%c0_24, %c0_25, %c0_26] : memref<1x256x1xf32, #tpu.memory_space<vmem>>, vector<1x256x1xf32>
      %35 = vector.shape_cast %34 : vector<1x256x1xf32> to vector<256x1xf32>
      %36 = vector.shape_cast %33 : vector<256x1xf32> to vector<1x256x1xf32>
      tpu.vector_store %arg7[%c0_24, %c0_25, %c0_26], %36 {strides = array<i32>} : memref<1x256x1xf32, #tpu.memory_space<vmem>>, vector<1x256x1xf32>,
    } else {
    }
    return
  }
  func.func @transform_0(%arg0: i32, %arg1: i32) -> (i32, i32, i32) {
    %c0_i32 = arith.constant 0 : i32
    %c0_i32_0 = arith.constant 0 : i32
    return %arg0, %c0_i32, %arg1 : i32, i32, i32
  }
  func.func @transform_1(%arg0: i32, %arg1: i32) -> (i32, i32) {
    %c0_i32 = arith.constant 0 : i32
    %c0_i32_0 = arith.constant 0 : i32
    %c0_i32_1 = arith.constant 0 : i32
    return %c0_i32, %c0_i32_0 : i32, i32
  }
  func.func @transform_2(%arg0: i32, %arg1: i32) -> (i32, i32) {
    %c0_i32 = arith.constant 0 : i32
    %c0_i32_0 = arith.constant 0 : i32
    %c0_i32_1 = arith.constant 0 : i32
    return %c0_i32, %c0_i32_0 : i32, i32
  }
  func.func @transform_3(%arg0: i32, %arg1: i32) -> (i32, i32) {
    %c0_i32 = arith.constant 0 : i32
    %c0_i32_0 = arith.constant 0 : i32
    %c0_i32_1 = arith.constant 0 : i32
    return %c0_i32, %c0_i32_0 : i32, i32
  }
  func.func @transform_4(%arg0: i32, %arg1: i32) -> (i32, i32) {
    %c0_i32 = arith.constant 0 : i32
    %c0_i32_0 = arith.constant 0 : i32
    %c0_i32_1 = arith.constant 0 : i32
    return %c0_i32, %c0_i32_0 : i32, i32
  }
  func.func @transform_5(%arg0: i32, %arg1: i32) -> (i32, i32, i32) {
    %c0_i32 = arith.constant 0 : i32
    %c0_i32_0 = arith.constant 0 : i32
    %c0_i32_1 = arith.constant 0 : i32
    return %arg0, %c0_i32, %c0_i32_0 : i32, i32, i32
  }
}

module attributes {stable_mosaic.version = 11 : i64} {
  func.func @_fused_mlp_pool_kernel(%arg0: i32, %arg1: i32, %arg2: memref<1x3x256xbf16, #tpu.memory_space<vmem>>, %arg3: memref<192x3xf32, #tpu.memory_space<vmem>>, %arg4: memref<192x1xf32, #tpu.memory_space<vmem>>, %arg5: memref<384x192xbf16, #tpu.memory_space<vmem>>, %arg6: memref<384x1xf32, #tpu.memory_space<vmem>>, %arg7: memref<1x384x1xf32, #tpu.memory_space<vmem>>, %arg8: memref<384x128xf32, #tpu.memory_space<vmem>>) attributes {dimension_semantics = [#tpu.dimension_semantics<parallel>, #tpu.dimension_semantics<arbitrary>], iteration_bounds = array<i64: 2, 1>, scalar_prefetch = 0 : i64, scratch_operands = 1 : i64, tpu.core_type = #tpu.core_type<tc>, window_params = [{transform_indices = @transform_0, window_bounds = array<i64: 1, 3, 256>}, {pipeline_mode = #tpu.pipeline_mode<synchronous>, transform_indices = @transform_1, window_bounds = array<i64: 192, 3>}, {pipeline_mode = #tpu.pipeline_mode<synchronous>, transform_indices = @transform_2, window_bounds = array<i64: 192, 1>}, {pipeline_mode = #tpu.pipeline_mode<synchronous>, transform_indices = @transform_3, window_bounds = array<i64: 384, 192>}, {pipeline_mode = #tpu.pipeline_mode<synchronous>, transform_indices = @transform_4, window_bounds = array<i64: 384, 1>}, {transform_indices = @transform_5, window_bounds = array<i64: 1, 384, 1>}]} {
    %c0_i32 = arith.constant 0 : i32
    %0 = arith.cmpi eq, %arg1, %c0_i32 : i32
    %1 = arith.extui %0 : i1 to i32
    %c0_i32_0 = arith.constant 0 : i32
    %2 = arith.cmpi ne, %1, %c0_i32_0 : i32
    scf.if %2 {
      %cst_19 = arith.constant 0xFF800000 : f32
      %46 = vector.broadcast %cst_19 : f32 to vector<384x128xf32>
      %c0_20 = arith.constant 0 : index
      %c0_21 = arith.constant 0 : index
      %47 = vector.load %arg8[%c0_20, %c0_21] : memref<384x128xf32, #tpu.memory_space<vmem>>, vector<384x128xf32>
      tpu.vector_store %arg8[%c0_20, %c0_21], %46 {strides = array<i32>} : memref<384x128xf32, #tpu.memory_space<vmem>>, vector<384x128xf32>,
    } else {
    }
    %c0 = arith.constant 0 : index
    %c0_1 = arith.constant 0 : index
    %c0_2 = arith.constant 0 : index
    %3 = vector.load %arg2[%c0, %c0_1, %c0_2] : memref<1x3x256xbf16, #tpu.memory_space<vmem>>, vector<1x3x256xbf16>
    %4 = vector.shape_cast %3 : vector<1x3x256xbf16> to vector<3x256xbf16>
    %5 = arith.extf %4 : vector<3x256xbf16> to vector<3x256xf32>
    %c0_3 = arith.constant 0 : index
    %c0_4 = arith.constant 0 : index
    %6 = vector.load %arg3[%c0_3, %c0_4] : memref<192x3xf32, #tpu.memory_space<vmem>>, vector<192x3xf32>
    %7 = vector.extract_strided_slice %6 {offsets = [0, 0], sizes = [192, 1], strides = [1, 1]} : vector<192x3xf32> to vector<192x1xf32>
    %8 = vector.extract_strided_slice %5 {offsets = [0, 0], sizes = [1, 256], strides = [1, 1]} : vector<3x256xf32> to vector<1x256xf32>
    %9 = vector.broadcast %7 : vector<192x1xf32> to vector<192x256xf32>
    %10 = vector.broadcast %8 : vector<1x256xf32> to vector<192x256xf32>
    %11 = arith.mulf %9, %10 : vector<192x256xf32>
    %12 = vector.extract_strided_slice %6 {offsets = [0, 1], sizes = [192, 1], strides = [1, 1]} : vector<192x3xf32> to vector<192x1xf32>
    %13 = vector.extract_strided_slice %5 {offsets = [1, 0], sizes = [1, 256], strides = [1, 1]} : vector<3x256xf32> to vector<1x256xf32>
    %14 = vector.broadcast %12 : vector<192x1xf32> to vector<192x256xf32>
    %15 = vector.broadcast %13 : vector<1x256xf32> to vector<192x256xf32>
    %16 = arith.mulf %14, %15 : vector<192x256xf32>
    %17 = arith.addf %11, %16 : vector<192x256xf32>
    %18 = vector.extract_strided_slice %6 {offsets = [0, 2], sizes = [192, 1], strides = [1, 1]} : vector<192x3xf32> to vector<192x1xf32>
    %19 = vector.extract_strided_slice %5 {offsets = [2, 0], sizes = [1, 256], strides = [1, 1]} : vector<3x256xf32> to vector<1x256xf32>
    %20 = vector.broadcast %18 : vector<192x1xf32> to vector<192x256xf32>
    %21 = vector.broadcast %19 : vector<1x256xf32> to vector<192x256xf32>
    %22 = arith.mulf %20, %21 : vector<192x256xf32>
    %23 = arith.addf %17, %22 : vector<192x256xf32>
    %c0_5 = arith.constant 0 : index
    %c0_6 = arith.constant 0 : index
    %24 = vector.load %arg4[%c0_5, %c0_6] : memref<192x1xf32, #tpu.memory_space<vmem>>, vector<192x1xf32>
    %25 = vector.broadcast %24 : vector<192x1xf32> to vector<192x256xf32>
    %26 = arith.addf %23, %25 : vector<192x256xf32>
    %cst = arith.constant 0.000000e+00 : f32
    %27 = vector.broadcast %cst : f32 to vector<192x256xf32>
    %28 = arith.maximumf %26, %27 : vector<192x256xf32>
    %c0_7 = arith.constant 0 : index
    %c0_8 = arith.constant 0 : index
    %29 = vector.load %arg5[%c0_7, %c0_8] : memref<384x192xbf16, #tpu.memory_space<vmem>>, vector<384x192xbf16>
    %30 = arith.truncf %28 : vector<192x256xf32> to vector<192x256xbf16>
    %cst_9 = arith.constant dense<0.000000e+00> : vector<384x256xf32>
    %31 = tpu.matmul %29, %30, %cst_9 {dimension_numbers = #tpu.dot_dimension_numbers<[1], [0], [0], [1], [0, 0, 1, 1], [], []>} : vector<384x192xbf16>, vector<192x256xbf16>, vector<384x256xf32> -> vector<384x256xf32>
    %c0_10 = arith.constant 0 : index
    %c0_11 = arith.constant 0 : index
    %32 = vector.load %arg6[%c0_10, %c0_11] : memref<384x1xf32, #tpu.memory_space<vmem>>, vector<384x1xf32>
    %33 = vector.broadcast %32 : vector<384x1xf32> to vector<384x256xf32>
    %34 = arith.addf %31, %33 : vector<384x256xf32>
    %cst_12 = arith.constant 0.000000e+00 : f32
    %35 = vector.broadcast %cst_12 : f32 to vector<384x256xf32>
    %36 = arith.maximumf %34, %35 : vector<384x256xf32>
    %c0_13 = arith.constant 0 : index
    %c0_14 = arith.constant 0 : index
    %37 = vector.load %arg8[%c0_13, %c0_14] : memref<384x128xf32, #tpu.memory_space<vmem>>, vector<384x128xf32>
    %38 = vector.extract_strided_slice %36 {offsets = [0, 0], sizes = [384, 128], strides = [1, 1]} : vector<384x256xf32> to vector<384x128xf32>
    %39 = arith.maximumf %37, %38 : vector<384x128xf32>
    %40 = vector.extract_strided_slice %36 {offsets = [0, 128], sizes = [384, 128], strides = [1, 1]} : vector<384x256xf32> to vector<384x128xf32>
    %41 = arith.maximumf %39, %40 : vector<384x128xf32>
    %c0_15 = arith.constant 0 : index
    %c0_16 = arith.constant 0 : index
    %42 = vector.load %arg8[%c0_15, %c0_16] : memref<384x128xf32, #tpu.memory_space<vmem>>, vector<384x128xf32>
    tpu.vector_store %arg8[%c0_15, %c0_16], %41 {strides = array<i32>} : memref<384x128xf32, #tpu.memory_space<vmem>>, vector<384x128xf32>,
    %c0_i32_17 = arith.constant 0 : i32
    %43 = arith.cmpi eq, %arg1, %c0_i32_17 : i32
    %44 = arith.extui %43 : i1 to i32
    %c0_i32_18 = arith.constant 0 : i32
    %45 = arith.cmpi ne, %44, %c0_i32_18 : i32
    scf.if %45 {
      %c0_19 = arith.constant 0 : index
      %c0_20 = arith.constant 0 : index
      %46 = vector.load %arg8[%c0_19, %c0_20] : memref<384x128xf32, #tpu.memory_space<vmem>>, vector<384x128xf32>
      %cst_21 = arith.constant dense<0xFF800000> : vector<384xf32>
      %47 = vector.multi_reduction <maximumf>, %46, %cst_21 [1] : vector<384x128xf32> to vector<384xf32>
      %48 = vector.shape_cast %47 : vector<384xf32> to vector<384x1xf32>
      %c0_22 = arith.constant 0 : index
      %c0_23 = arith.constant 0 : index
      %c0_24 = arith.constant 0 : index
      %49 = vector.load %arg7[%c0_22, %c0_23, %c0_24] : memref<1x384x1xf32, #tpu.memory_space<vmem>>, vector<1x384x1xf32>
      %50 = vector.shape_cast %49 : vector<1x384x1xf32> to vector<384x1xf32>
      %51 = vector.shape_cast %48 : vector<384x1xf32> to vector<1x384x1xf32>
      tpu.vector_store %arg7[%c0_22, %c0_23, %c0_24], %51 {strides = array<i32>} : memref<1x384x1xf32, #tpu.memory_space<vmem>>, vector<1x384x1xf32>,
    } else {
    }
    return
  }
  func.func @transform_0(%arg0: i32, %arg1: i32) -> (i32, i32, i32) {
    %c0_i32 = arith.constant 0 : i32
    %c0_i32_0 = arith.constant 0 : i32
    return %arg0, %c0_i32, %arg1 : i32, i32, i32
  }
  func.func @transform_1(%arg0: i32, %arg1: i32) -> (i32, i32) {
    %c0_i32 = arith.constant 0 : i32
    %c0_i32_0 = arith.constant 0 : i32
    %c0_i32_1 = arith.constant 0 : i32
    return %c0_i32, %c0_i32_0 : i32, i32
  }
  func.func @transform_2(%arg0: i32, %arg1: i32) -> (i32, i32) {
    %c0_i32 = arith.constant 0 : i32
    %c0_i32_0 = arith.constant 0 : i32
    %c0_i32_1 = arith.constant 0 : i32
    return %c0_i32, %c0_i32_0 : i32, i32
  }
  func.func @transform_3(%arg0: i32, %arg1: i32) -> (i32, i32) {
    %c0_i32 = arith.constant 0 : i32
    %c0_i32_0 = arith.constant 0 : i32
    %c0_i32_1 = arith.constant 0 : i32
    return %c0_i32, %c0_i32_0 : i32, i32
  }
  func.func @transform_4(%arg0: i32, %arg1: i32) -> (i32, i32) {
    %c0_i32 = arith.constant 0 : i32
    %c0_i32_0 = arith.constant 0 : i32
    %c0_i32_1 = arith.constant 0 : i32
    return %c0_i32, %c0_i32_0 : i32, i32
  }
  func.func @transform_5(%arg0: i32, %arg1: i32) -> (i32, i32, i32) {
    %c0_i32 = arith.constant 0 : i32
    %c0_i32_0 = arith.constant 0 : i32
    %c0_i32_1 = arith.constant 0 : i32
    return %arg0, %c0_i32, %c0_i32_0 : i32, i32, i32
  }
}

</mosaic_0001>

<bundles_post_ra>
// kernel: efgh_backbone_forward.3
= control target key start
LH: loop header
LB: loop body
LE: loop exit
PB: predicated region body
PF: predicated region fallthrough
CT: control target
= control target key end

     0   :  { %s1838_s18 = smov 0   ;;  %s1840_s19 = smov 0   ;;  %s2277_s0 = inlined_call_operand.vmem [shape: bf16[2,27,256], index: 0, kind: input, shape index: {}]   ;;  %s2278_s1 = inlined_call_operand.vmem [shape: bf16[128,27], index: 1, kind: input, shape index: {}]   ;;  %s2279_s2 = inlined_call_operand.vmem [shape: f32[128,1], index: 2, kind: input, shape index: {}]   ;;  %s2280_s3 = inlined_call_operand.vmem [shape: bf16[256,128], index: 3, kind: input, shape index: {}]   ;;  %s2281_s4 = inlined_call_operand.vmem [shape: f32[256,1], index: 4, kind: input, shape index: {}]   ;;  %s2282_s5 = inlined_call_operand.vmem [shape: f32[2,256,1], index: 5, kind: output, shape index: {}]  }
   0x1   :  { %s1842_s20 = smov 0  }
   0x2 LB: > { %s27_s21 = sadd.s32 1, %s1800_s19  ;;  %p1572_p0 = scmp.ge.s32.totalorder %s1804_s20, 1  ;;  %s1804_s20 = sphi %s1842_s20, %s15_s20   ;;  %s1800_s19 = sphi %s1840_s19, %s2284_s19   ;;  %s1796_s18 = sphi %s1838_s18, %s2283_s18  }
   0x3   : > { %p29_p1 = scmp.ge.s32.totalorder %s27_s21, 2  ;;  %p206_p2 = scmp.lt.s32.totalorder %s1804_s20, 3 }
   0x5   : > { %s2286_s21 = smov (%p29_p1, %s27_s21), 0  ;;  %p207_p3 = pnand %p1572_p0, %p206_p2 }
   0x6   : > { %p239_p4 = scmp.lt.s32.totalorder (!%p207_p3), %s1796_s18, 1 }
   0x7   : > { %210 = sbr.rel (%p207_p3) target bundleno = 752 (0x2f0), region = 40 }
   0xc   : > { %v324_v0 = vld [vmem:[%s2279_s2 + $0x70] sm:$0xff]  ;;  %vm489_vm0 = vcmask 1044480   ;;  %v1806_v1 = vmov 0   ;;  %v322_v2 = vld [vmem:[%s2279_s2 + $0x60] sm:$0xff]  ;;  %s2288_s18 = smov (!%p239_p4, %s1796_s18), 1  ;;  %vm490_vm1 = vcmask 1045504  }
   0xd   : > { %1779 = vset.pattern.permute.xlu0 %v1806_v1  ;;  %1781 = vset.pattern.permute.xlu2 %v1806_v1  ;;  %v1807_v3 = vmov 65535   ;;  %v320_v5 = vld [vmem:[%s2279_s2 + $0x50] sm:$0xff]  ;;  %s1707_s28 = sshll.u32 %s2288_s18, 5  ;;  %v325_v10 = vld [vmem:[%s2279_s2 + $0x78] sm:$0xff]  ;;  %v323_v16 = vld [vmem:[%s2279_s2 + $0x68] sm:$0xff]  ;;  %vm464_vm2 = vcmask 220160  }
   0xe   : > { %398 = vperm.xlu0 %1779, %v324_v0   ;;  %v491_v4 = vsel %vm489_vm0, 4294967295, %v1807_v3  ;;  %1780 = vset.pattern.permute.xlu1 %v1806_v1  ;;  %s246_s6 = scalar_lea.vmem %s2277_s0, %s1707_s28  ;;  %v321_v20 = vld [vmem:[%s2279_s2 + $0x58] sm:$0xff]  ;;  %v1713_v24 = vld [vmem:[%s2278_s1] sm:$0xff]  ;;  %v319_v26 = vld [vmem:[%s2279_s2 + $0x48] sm:$0xff]  ;;  %s1708_s23 = sshll.u32 %s2288_s18, 8  ;;  %vm1466_vm3 = vcmask 7168  }
   0xf   : > { %388 = vperm.xlu1 %1780, %v322_v2   ;;  %378 = vperm.xlu2 %1781, %v320_v5   ;;  %v492_v6 = vsel %vm490_vm1, %v491_v4, 0  ;;  %v1619_v7 = vld [vmem:[%s246_s6 + $0x10] sm:$0xf]  ;;  %v1712_v8 = vld [vmem:[%s246_s6 + $0x14] sm:$0x30]  ;;  %v318_v25 = vld [vmem:[%s2279_s2 + $0x40] sm:$0xff]  ;;  %s2188_s26 = scalar_lea.vmem %s2282_s5, %s1708_s23 }
  0x10   : > { %v1711_v9 = vld [vmem:[%s246_s6 + $0x14] sm:$0xf]  ;;  %v1620_v11 = vor.u32 %v1712_v8, %v1619_v7  ;;  %v1621_v12 = vld [vmem:[%s246_s6 + $0x18] sm:$0x30]  ;;  %v1611_v14 = vld [vmem:[%s246_s6] sm:$0xf] }
  0x11   : > { %v1624_v13 = vor.u32 %v1711_v9, %v1621_v12  ;;  %v1710_v15 = vld [vmem:[%s246_s6 + $0x4] sm:$0xf0]  ;;  %v1709_v18 = vld [vmem:[%s246_s6 + $0x4] sm:$0xf]  ;;  %v1613_v19 = vld [vmem:[%s246_s6 + $0x8] sm:$0xf0] }
  0x12   : > { %v494_v17 = vand.u32 %v1620_v11, %v492_v6  ;;  %v1612_v22 = vor.u32 %v1710_v15, %v1611_v14  ;;  %v1616_v23 = vor.u32 %v1709_v18, %v1613_v19  ;;  %v316_v27 = vld [vmem:[%s2279_s2 + $0x30] sm:$0xff]  ;;  %v317_v28 = vld [vmem:[%s2279_s2 + $0x38] sm:$0xff]  ;;  %v314_v29 = vld [vmem:[%s2279_s2 + $0x20] sm:$0xff] }
  0x13   : > { %v497_v21 = vand.u32 %v1624_v13, %v492_v6  ;;  %v315_v30 = vld [vmem:[%s2279_s2 + $0x28] sm:$0xff]  ;;  %v312_v32 = vld [vmem:[%s2279_s2 + $0x10] sm:$0xff]  ;;  %v313_v33 = vld [vmem:[%s2279_s2 + $0x18] sm:$0xff] }
  0x14   : > { %505 = vmatpush.bf16.msra.mxu0 %v494_v17  ;;  %v1714_v31 = vld [vmem:[%s2278_s1 + $0x8] sm:$0xff]  ;;  %v310_v34 = vld [vmem:[%s2279_s2] sm:$0xff]  ;;  %v1715_v37 = vld [vmem:[%s2278_s1 + $0x10] sm:$0xff] }
  0x15   : > { %554 = vmatpush.bf16.msra.mxu1 %v497_v21  ;;  %v311_v35 = vld [vmem:[%s2279_s2 + $0x8] sm:$0xff]  ;;  %v677_v36 = vld [vmem:[%s2281_s4] sm:$0xff]  ;;  %v679_v38 = vld [vmem:[%s2281_s4 + $0x10] sm:$0xff] }
  0x16   : > { %403 = vperm.xlu0 %1779, %v325_v10   ;;  %v680_v39 = vld [vmem:[%s2281_s4 + $0x18] sm:$0xff]  ;;  %v682_v40 = vld [vmem:[%s2281_s4 + $0x28] sm:$0xff]  ;;  %v683_v41 = vld [vmem:[%s2281_s4 + $0x30] sm:$0xff] }
  0x17   : > { %393 = vperm.xlu1 %1780, %v323_v16   ;;  %383 = vperm.xlu2 %1781, %v321_v20   ;;  %v678_v42 = vld [vmem:[%s2281_s4 + $0x8] sm:$0xff]  ;;  %v1716_v43 = vld [vmem:[%s2278_s1 + $0x18] sm:$0xff]  ;;  %v685_v44 = vld [vmem:[%s2281_s4 + $0x40] sm:$0xff] }
  0x18   : > { %506 = vmatpush.bf16.msra.mxu0 %v1612_v22  ;;  %v686_v45 = vld [vmem:[%s2281_s4 + $0x48] sm:$0xff]  ;;  %v681_v46 = vld [vmem:[%s2281_s4 + $0x20] sm:$0xff]  ;;  %v688_v47 = vld [vmem:[%s2281_s4 + $0x58] sm:$0xff] }
  0x19   : > { %555 = vmatpush.bf16.msra.mxu1 %v1616_v23  ;;  %v689_v48 = vld [vmem:[%s2281_s4 + $0x60] sm:$0xff]  ;;  %v684_v49 = vld [vmem:[%s2281_s4 + $0x38] sm:$0xff]  ;;  %v691_v51 = vld [vmem:[%s2281_s4 + $0x70] sm:$0xff] }
  0x1a   : > { %v1717_v50 = vld [vmem:[%s2278_s1 + $0x20] sm:$0xff]  ;;  %v692_v52 = vld [vmem:[%s2281_s4 + $0x78] sm:$0xff]  ;;  %v687_v53 = vld [vmem:[%s2281_s4 + $0x50] sm:$0xff] }
  0x1b   : > { %1625 = vmatmul.msk.bf16.vlgmr.msra.gmra.mxu0 %vm464_vm2, %v1713_v24  ;;  %v694_v54 = vld [vmem:[%s2281_s4 + $0x88] sm:$0xff]  ;;  %v695_v55 = vld [vmem:[%s2281_s4 + $0x90] sm:$0xff]  ;;  %v697_v58 = vld [vmem:[%s2281_s4 + $0xa0] sm:$0xff] }
  0x1c   : > { %1633 = vmatmul.msk.bf16.vlgmr.msra.gmra.mxu1 %vm464_vm2, %v1713_v24  ;;  %v690_v56 = vld [vmem:[%s2281_s4 + $0x68] sm:$0xff]  ;;  %v693_v60 = vld [vmem:[%s2281_s4 + $0x80] sm:$0xff]  ;;  %v700_v61 = vld [vmem:[%s2281_s4 + $0xb8] sm:$0xff] }
  0x1d   : > { %v1718_v57 = vld [vmem:[%s2278_s1 + $0x28] sm:$0xff]  ;;  %v701_v62 = vld [vmem:[%s2281_s4 + $0xc0] sm:$0xff]  ;;  %v696_v63 = vld [vmem:[%s2281_s4 + $0x98] sm:$0xff] }
  0x1e   : > { %368 = vperm.xlu0 %1779, %v318_v25   ;;  %v698_v59 = vld [vmem:[%s2281_s4 + $0xa8] sm:$0xff]  ;;  %v1719_v0 = vld [vmem:[%s2278_s1 + $0x30] sm:$0xff]  ;;  %v704_v3 = vld [vmem:[%s2281_s4 + $0xd8] sm:$0xff] }
  0x1f   : > { %373 = vperm.xlu1 %1780, %v319_v26   ;;  %358 = vperm.xlu2 %1781, %v316_v27   ;;  %v703_v1 = vld [vmem:[%s2281_s4 + $0xd0] sm:$0xff]  ;;  %v706_v6 = vld [vmem:[%s2281_s4 + $0xe8] sm:$0xff]  ;;  %v1720_v12 = vld [vmem:[%s2278_s1 + $0x38] sm:$0xff] }
  0x20   : > { %v699_v4 = vld [vmem:[%s2281_s4 + $0xb0] sm:$0xff]  ;;  %v702_v8 = vld [vmem:[%s2281_s4 + $0xc8] sm:$0xff]  ;;  %v705_v13 = vld [vmem:[%s2281_s4 + $0xe0] sm:$0xff] }
  0x21   : > { %v707_v7 = vld [vmem:[%s2281_s4 + $0xf0] sm:$0xff]  ;;  %v708_v17 = vld [vmem:[%s2281_s4 + $0xf8] sm:$0xff] }
  0x26   : > { %363 = vperm.xlu0 %1779, %v317_v28  }
  0x27   : > { %348 = vperm.xlu1 %1780, %v314_v29   ;;  %353 = vperm.xlu2 %1781, %v315_v30  }
  0x2b   : > { %1626 = vmatmul.msk.bf16.gmra.mxu0 %vm464_vm2, %v1714_v31 }
  0x2c   : > { %1634 = vmatmul.msk.bf16.gmra.mxu1 %vm464_vm2, %v1714_v31 }
  0x2e   : > { %338 = vperm.xlu0 %1779, %v312_v32  }
  0x2f   : > { %343 = vperm.xlu1 %1780, %v313_v33   ;;  %328 = vperm.xlu2 %1781, %v310_v34  }
  0x36   : > { %333 = vperm.xlu0 %1779, %v311_v35  }
  0x37   : > { %711 = vperm.xlu1 %1780, %v677_v36   ;;  %716 = vperm.xlu2 %1781, %v678_v42  }
  0x3b   : > { %1627 = vmatmul.msk.bf16.gmra.mxu0 %vm464_vm2, %v1715_v37 }
  0x3c   : > { %1635 = vmatmul.msk.bf16.gmra.mxu1 %vm464_vm2, %v1715_v37 }
  0x3e   : > { %721 = vperm.xlu0 %1779, %v679_v38  }
  0x3f   : > { %726 = vperm.xlu1 %1780, %v680_v39   ;;  %731 = vperm.xlu2 %1781, %v681_v46  }
  0x46   : > { %736 = vperm.xlu0 %1779, %v682_v40  }
  0x47   : > { %741 = vperm.xlu1 %1780, %v683_v41   ;;  %746 = vperm.xlu2 %1781, %v684_v49  }
  0x4b   : > { %1628 = vmatmul.msk.bf16.gmra.mxu0 %vm464_vm2, %v1716_v43 }
  0x4c   : > { %1636 = vmatmul.msk.bf16.gmra.mxu1 %vm464_vm2, %v1716_v43 }
  0x4e   : > { %751 = vperm.xlu0 %1779, %v685_v44  }
  0x4f   : > { %756 = vperm.xlu1 %1780, %v686_v45   ;;  %761 = vperm.xlu2 %1781, %v687_v53  }
  0x56   : > { %766 = vperm.xlu0 %1779, %v688_v47  }
  0x57   : > { %771 = vperm.xlu1 %1780, %v689_v48   ;;  %776 = vperm.xlu2 %1781, %v690_v56  }
  0x5b   : > { %1629 = vmatmul.msk.bf16.gmra.mxu0 %vm464_vm2, %v1717_v50 }
  0x5c   : > { %1637 = vmatmul.msk.bf16.gmra.mxu1 %vm464_vm2, %v1717_v50 }
  0x5e   : > { %781 = vperm.xlu0 %1779, %v691_v51  }
  0x5f   : > { %786 = vperm.xlu1 %1780, %v692_v52   ;;  %791 = vperm.xlu2 %1781, %v693_v60  }
  0x66   : > { %796 = vperm.xlu0 %1779, %v694_v54  }
  0x67   : > { %801 = vperm.xlu1 %1780, %v695_v55   ;;  %806 = vperm.xlu2 %1781, %v696_v63  }
  0x69   : > { %v2018_v2 = vpop.permute.xlu2 %378 }
  0x6b   : > { %1630 = vmatmul.msk.bf16.gmra.mxu0 %vm464_vm2, %v1718_v57 }
  0x6c   : > { %1638 = vmatmul.msk.bf16.gmra.mxu1 %vm464_vm2, %v1718_v57 }
  0x6e   : > { %811 = vperm.xlu0 %1779, %v697_v58  }
  0x6f   : > { %816 = vperm.xlu1 %1780, %v698_v59   ;;  %821 = vperm.xlu2 %1781, %v699_v4  }
  0x71   : > { %v2039_v9 = vpop.permute.xlu2 %383 }
  0x76   : > { %826 = vperm.xlu0 %1779, %v700_v61  }
  0x77   : > { %831 = vperm.xlu1 %1780, %v701_v62   ;;  %836 = vperm.xlu2 %1781, %v702_v8  }
  0x79   : > { %v359_v14 = vpop.permute.xlu2 %358 }
  0x7b   : > { %1631 = vmatmul.msk.bf16.gmra.mxu0 %vm464_vm2, %v1719_v0 }
  0x7c   : > { %1639 = vmatmul.msk.bf16.gmra.mxu1 %vm464_vm2, %v1719_v0 }
  0x7e   : > { %841 = vperm.xlu0 %1779, %v703_v1  }
  0x7f   : > { %846 = vperm.xlu1 %1780, %v704_v3   ;;  %851 = vperm.xlu2 %1781, %v705_v13  }
  0x80   : > { %v2028_v5 = vpop.permute.xlu0 %398 }
  0x81   : > { %v2043_v11 = vpop.permute.xlu1 %388  ;;  %v354_v19 = vpop.permute.xlu2 %353 }
  0x86   : > { %856 = vperm.xlu0 %1779, %v706_v6  }
  0x87   : > { %861 = vperm.xlu1 %1780, %v707_v7   ;;  %866 = vperm.xlu2 %1781, %v708_v17  }
  0x88   : > { %v2041_v10 = vpop.permute.xlu0 %403 }
  0x89   : > { %v2055_v16 = vpop.permute.xlu1 %393  ;;  %v329_v25 = vpop.permute.xlu2 %328 }
  0x8b   : > { %1632 = vmatmul.msk.bf16.gmra.mxu0 %vm464_vm2, %v1720_v12 }
  0x8c   : > { %1640 = vmatmul.msk.bf16.gmra.mxu1 %vm464_vm2, %v1720_v12 }
  0x90   : > { %v2053_v15 = vpop.permute.xlu0 %368 }
  0x91   : > { %v2060_v22 = vpop.permute.xlu1 %373 }
  0x98   : > { %v364_v18 = vpop.permute.xlu0 %363  ;;  %v508_v20 = vpop.f32.mrf.mxu0 }
  0x99   : > { %v557_v21 = vpop.f32.mrf.mxu1  ;;  %v509_v27 = vadd.f32 %v508_v20, %v329_v25  ;;  %v349_v29 = vpop.permute.xlu1 %348 }
  0x9a   : > { %v558_v28 = vadd.f32 %v557_v21, %v329_v25 }
  0x9b   : > { %v597_v33 = vmax.f32 %v509_v27, 0.0 }
  0x9c   : > { %v598_v34 = vmax.f32 %v558_v28, 0.0 }
  0xa0   : > { %v339_v23 = vpop.permute.xlu0 %338  ;;  %v510_v24 = vpop.f32.mrf.mxu0 }
  0xa1   : > { %v559_v26 = vpop.f32.mrf.mxu1  ;;  %v344_v41 = vpop.permute.xlu1 %343 }
  0xa8   : > { %v334_v30 = vpop.permute.xlu0 %333  ;;  %v513_v37 = vpop.f32.mrf.mxu0 }
  0xa9   : > { %v511_v31 = vadd.f32 %v510_v24, %v334_v30  ;;  %v560_v32 = vadd.f32 %v559_v26, %v334_v30  ;;  %v562_v38 = vpop.f32.mrf.mxu1  ;;  %v514_v42 = vadd.f32 %v513_v37, %v339_v23 }
  0xaa   : > { %v563_v43 = vadd.f32 %v562_v38, %v339_v23 }
  0xab   : > { %v599_v35 = vmax.f32 %v511_v31, 0.0  ;;  %v600_v36 = vmax.f32 %v560_v32, 0.0  ;;  %v601_v48 = vmax.f32 %v514_v42, 0.0 }
  0xac   : > { %v602_v50 = vmax.f32 %v563_v43, 0.0 }
  0xad   : > { %v2062_v39 = vpack.c.bf16 %v599_v35, %v597_v33  ;;  %v2064_v40 = vpack.c.bf16 %v600_v36, %v598_v34 }
  0xb0   : > { %v515_v44 = vpop.f32.mrf.mxu0 }
  0xb1   : > { %v516_v45 = vadd.f32 %v515_v44, %v344_v41  ;;  %v564_v46 = vpop.f32.mrf.mxu1 }
  0xb2   : > { %v565_v47 = vadd.f32 %v564_v46, %v344_v41 }
  0xb3   : > { %v603_v49 = vmax.f32 %v516_v45, 0.0 }
  0xb4   : > { %v604_v51 = vmax.f32 %v565_v47, 0.0 }
  0xb5   : > { %v2066_v52 = vpack.c.bf16 %v603_v49, %v601_v48 }
  0xb6   : > { %v2068_v53 = vpack.c.bf16 %v604_v51, %v602_v50 }
  0xb8   : > { %v518_v54 = vpop.f32.mrf.mxu0 }
  0xb9   : > { %v567_v55 = vpop.f32.mrf.mxu1  ;;  %v519_v56 = vadd.f32 %v518_v54, %v349_v29 }
  0xba   : > { %v568_v57 = vadd.f32 %v567_v55, %v349_v29 }
  0xbb   : > { %v605_v62 = vmax.f32 %v519_v56, 0.0 }
  0xbc   : > { %v606_v0 = vmax.f32 %v568_v57, 0.0 }
  0xc0   : > { %v520_v58 = vpop.f32.mrf.mxu0 }
  0xc1   : > { %v521_v59 = vadd.f32 %v520_v58, %v354_v19  ;;  %v569_v60 = vpop.f32.mrf.mxu1 }
  0xc2   : > { %v570_v61 = vadd.f32 %v569_v60, %v354_v19 }
  0xc3   : > { %v607_v63 = vmax.f32 %v521_v59, 0.0 }
  0xc4   : > { %v608_v1 = vmax.f32 %v570_v61, 0.0 }
  0xc5   : > { %v2070_v3 = vpack.c.bf16 %v607_v63, %v605_v62 }
  0xc6   : > { %v2072_v4 = vpack.c.bf16 %v608_v1, %v606_v0 }
  0xc8   : > { %v523_v6 = vpop.f32.mrf.mxu0 }
  0xc9   : > { %v572_v7 = vpop.f32.mrf.mxu1  ;;  %v524_v8 = vadd.f32 %v523_v6, %v359_v14 }
  0xca   : > { %v573_v12 = vadd.f32 %v572_v7, %v359_v14 }
  0xcb   : > { %v609_v23 = vmax.f32 %v524_v8, 0.0 }
  0xcc   : > { %v610_v25 = vmax.f32 %v573_v12, 0.0 }
  0xd0   : > { %v525_v13 = vpop.f32.mrf.mxu0 }
  0xd1   : > { %v526_v17 = vadd.f32 %v525_v13, %v364_v18  ;;  %v574_v20 = vpop.f32.mrf.mxu1 }
  0xd2   : > { %v575_v21 = vadd.f32 %v574_v20, %v364_v18 }
  0xd3   : > { %v611_v24 = vmax.f32 %v526_v17, 0.0 }
  0xd4   : > { %v612_v19 = vmax.f32 %v575_v21, 0.0 }
  0xd5   : > { %v2074_v26 = vpack.c.bf16 %v611_v24, %v609_v23 }
  0xd6   : > { %v2076_v27 = vpack.c.bf16 %v612_v19, %v610_v25 }
  0xd8   : > { %v528_v28 = vpop.f32.mrf.mxu0 }
  0xd9   : > { %v577_v29 = vpop.f32.mrf.mxu1  ;;  %v529_v12 = vadd.f32 %v528_v28, %v2053_v15 }
  0xda   : > { %v578_v17 = vadd.f32 %v577_v29, %v2053_v15  ;;  %v1721_v15 = vld [vmem:[%s2280_s3] sm:$0xff]  ;;  %v1730_v29 = vld [vmem:[%s2280_s3 + $0x48] sm:$0xff] }
  0xdb   : > { %v613_v25 = vmax.f32 %v529_v12, 0.0 }
  0xe0   : > { %v530_v30 = vpop.f32.mrf.mxu0 }
  0xe1   : > { %v579_v31 = vpop.f32.mrf.mxu1 }
  0xe2   : > { %v580_v7 = vadd.f32 %v579_v31, %v2060_v22  ;;  %v1732_v31 = vld [vmem:[%s2280_s3 + $0x58] sm:$0xff] }
  0xe4   : > { %v616_v23 = vmax.f32 %v580_v7, 0.0 }
  0xe8   : > { %v533_v32 = vpop.f32.mrf.mxu0 }
  0xe9   : > { %v582_v33 = vpop.f32.mrf.mxu1 }
  0xf0   : > { %v535_v34 = vpop.f32.mrf.mxu0 }
  0xf1   : > { %v584_v14 = vpop.f32.mrf.mxu1 }
  0xf2   : > { %v585_v60 = vadd.f32 %v584_v14, %v2039_v9 }
  0xf4   : > { %v620_v8 = vmax.f32 %v585_v60, 0.0 }
  0xf8   : > { %v538_v35 = vpop.f32.mrf.mxu0 }
  0xf9   : > { %v587_v36 = vpop.f32.mrf.mxu1  ;;  %v539_v50 = vadd.f32 %v538_v35, %v2043_v11 }
  0xfa   : > { %v588_v55 = vadd.f32 %v587_v36, %v2043_v11  ;;  %v531_v11 = vadd.f32 %v530_v30, %v2060_v22  ;;  %v614_v22 = vmax.f32 %v578_v17, 0.0  ;;  %v1731_v30 = vld [vmem:[%s2280_s3 + $0x50] sm:$0xff]  ;;  %v1733_v36 = vld [vmem:[%s2280_s3 + $0x60] sm:$0xff] }
  0xfb   : > { %v621_v63 = vmax.f32 %v539_v50, 0.0 }
  0xfc   : > { %v622_v0 = vmax.f32 %v588_v55, 0.0  ;;  %v670_v28 = vpack.c.bf16 %v616_v23, %v614_v22 }
 0x100   : > { %v540_v37 = vpop.f32.mrf.mxu0 }
 0x101   : > { %v589_v18 = vpop.f32.mrf.mxu1  ;;  %v541_v45 = vadd.f32 %v540_v37, %v2055_v16 }
 0x102   : > { %v590_v48 = vadd.f32 %v589_v18, %v2055_v16  ;;  %v534_v16 = vadd.f32 %v533_v32, %v2018_v2  ;;  %v712_v32 = vpop.permute.xlu1 %711 }
 0x103   : > { %v623_v58 = vmax.f32 %v541_v45, 0.0 }
 0x104   : > { %v624_v61 = vmax.f32 %v590_v48, 0.0  ;;  %v617_v13 = vmax.f32 %v534_v16, 0.0 }
 0x105   : > { %v673_v6 = vpack.c.bf16 %v623_v58, %v621_v63 }
 0x108   : > { %v543_v38 = vpop.f32.mrf.mxu0 }
 0x109   : > { %v592_v41 = vpop.f32.mrf.mxu1  ;;  %v544_v42 = vadd.f32 %v543_v38, %v2028_v5 }
 0x10a   : > { %v593_v43 = vadd.f32 %v592_v41, %v2028_v5  ;;  %v536_v5 = vadd.f32 %v535_v34, %v2039_v9  ;;  %v674_v9 = vpack.c.bf16 %v624_v61, %v622_v0  ;;  %v717_v34 = vpop.permute.xlu2 %716  ;;  %v727_v14 = vpop.permute.xlu1 %726 }
 0x10b   : > { %v625_v51 = vmax.f32 %v544_v42, 0.0 }
 0x10c   : > { %v626_v56 = vmax.f32 %v593_v43, 0.0  ;;  %v619_v1 = vmax.f32 %v536_v5, 0.0 }
 0x10e   : > { %v671_v21 = vpack.c.bf16 %v619_v1, %v617_v13 }
 0x110   : > { %v545_v44 = vpop.f32.mrf.mxu0 }
 0x111   : > { %v546_v46 = vadd.f32 %v545_v44, %v2041_v10  ;;  %v594_v47 = vpop.f32.mrf.mxu1 }
 0x112   : > { %v595_v49 = vadd.f32 %v594_v47, %v2041_v10  ;;  %v583_v10 = vadd.f32 %v582_v33, %v2018_v2  ;;  %v615_v2 = vmax.f32 %v531_v11, 0.0  ;;  %v722_v33 = vpop.permute.xlu0 %721  ;;  %v2151_v41 = vpop.permute.xlu2 %731 }
 0x113   : > { %v627_v54 = vmax.f32 %v546_v46, 0.0  ;;  %v2153_v44 = vpop.permute.xlu1 %741 }
 0x114   : > { %v628_v57 = vmax.f32 %v595_v49, 0.0  ;;  %v618_v20 = vmax.f32 %v583_v10, 0.0  ;;  %v669_v19 = vpack.c.bf16 %v615_v2, %v613_v25  ;;  %v1734_v10 = vld [vmem:[%s2280_s3 + $0x68] sm:$0xff] }
 0x115   : > { %v675_v59 = vpack.c.bf16 %v627_v54, %v625_v51 }
 0x116   : > { %v676_v62 = vpack.c.bf16 %v628_v57, %v626_v56  ;;  %v672_v24 = vpack.c.bf16 %v620_v8, %v618_v20 }
 0x117   : > { %965 = vmatpush.bf16.msrb.mxu0 %v675_v59  ;;  %1737 = vmatpush.bf16.msra.mxu2 %v675_v59 }
 0x118   : > { %1054 = vmatpush.bf16.msrb.mxu1 %v676_v62  ;;  %1745 = vmatpush.bf16.msra.mxu3 %v676_v62 }
 0x11a   : > { %v2146_v35 = vpop.permute.xlu0 %736  ;;  %v2155_v5 = vpop.permute.xlu2 %746 }
 0x11b   : > { %966 = vmatpush.bf16.msrb.mxu0 %v673_v6  ;;  %1738 = vmatpush.bf16.msra.mxu2 %v673_v6  ;;  %v757_v61 = vpop.permute.xlu1 %756 }
 0x11c   : > { %1055 = vmatpush.bf16.msrb.mxu1 %v674_v9  ;;  %1746 = vmatpush.bf16.msra.mxu3 %v674_v9 }
 0x11f   : > { %967 = vmatpush.bf16.msrb.mxu0 %v671_v21  ;;  %1739 = vmatpush.bf16.msra.mxu2 %v671_v21 }
 0x120   : > { %1056 = vmatpush.bf16.msrb.mxu1 %v672_v24  ;;  %1747 = vmatpush.bf16.msra.mxu3 %v672_v24 }
 0x122   : > { %v752_v46 = vpop.permute.xlu0 %751  ;;  %v762_v2 = vpop.permute.xlu2 %761 }
 0x123   : > { %968 = vmatpush.bf16.msrb.mxu0 %v669_v19  ;;  %1740 = vmatpush.bf16.msra.mxu2 %v669_v19 }
 0x124   : > { %1057 = vmatpush.bf16.msrb.mxu1 %v670_v28  ;;  %1748 = vmatpush.bf16.msra.mxu3 %v670_v28 }
 0x127   : > { %969 = vmatpush.bf16.msrb.mxu0 %v2074_v26  ;;  %1741 = vmatpush.bf16.msra.mxu2 %v2074_v26  ;;  %v1728_v26 = vld [vmem:[%s2280_s3 + $0x38] sm:$0xff] }
 0x128   : > { %1058 = vmatpush.bf16.msrb.mxu1 %v2076_v27  ;;  %1749 = vmatpush.bf16.msra.mxu3 %v2076_v27  ;;  %v1729_v27 = vld [vmem:[%s2280_s3 + $0x40] sm:$0xff] }
 0x12b   : > { %970 = vmatpush.bf16.msrb.mxu0 %v2070_v3  ;;  %1742 = vmatpush.bf16.msra.mxu2 %v2070_v3  ;;  %v1725_v3 = vld [vmem:[%s2280_s3 + $0x20] sm:$0xff] }
 0x12c   : > { %1059 = vmatpush.bf16.msrb.mxu1 %v2072_v4  ;;  %1750 = vmatpush.bf16.msra.mxu3 %v2072_v4  ;;  %v1724_v4 = vld [vmem:[%s2280_s3 + $0x18] sm:$0xff] }
 0x12f   : > { %971 = vmatpush.bf16.msrb.mxu0 %v2066_v52  ;;  %1743 = vmatpush.bf16.msra.mxu2 %v2066_v52  ;;  %v1722_v52 = vld [vmem:[%s2280_s3 + $0x8] sm:$0xff] }
 0x130   : > { %1060 = vmatpush.bf16.msrb.mxu1 %v2068_v53  ;;  %1751 = vmatpush.bf16.msra.mxu3 %v2068_v53  ;;  %v1726_v53 = vld [vmem:[%s2280_s3 + $0x28] sm:$0xff] }
 0x133   : > { %972 = vmatpush.bf16.msrb.mxu0 %v2062_v39  ;;  %1744 = vmatpush.bf16.msra.mxu2 %v2062_v39  ;;  %v1723_v39 = vld [vmem:[%s2280_s3 + $0x10] sm:$0xff] }
 0x134   : > { %1061 = vmatpush.bf16.msrb.mxu1 %v2064_v40  ;;  %1752 = vmatpush.bf16.msra.mxu3 %v2064_v40  ;;  %v1727_v40 = vld [vmem:[%s2280_s3 + $0x30] sm:$0xff] }
 0x136   : > { %973 = vmatmul.bf16.vlgmr.msrb.gmra.mxu0 %v1721_v15  ;;  %993 = vmatmul.bf16.vlgmr.msra.gmra.mxu2 %v1725_v3 }
 0x137   : > { %1062 = vmatmul.bf16.vlgmr.msrb.gmra.mxu1 %v1721_v15  ;;  %1082 = vmatmul.bf16.vlgmr.msra.gmra.mxu3 %v1725_v3 }
 0x146   : > { %978 = vmatmul.bf16.gmra.mxu0 %v1722_v52  ;;  %998 = vmatmul.bf16.gmra.mxu2 %v1726_v53 }
 0x147   : > { %1067 = vmatmul.bf16.gmra.mxu1 %v1722_v52  ;;  %1087 = vmatmul.bf16.gmra.mxu3 %v1726_v53 }
 0x156   : > { %983 = vmatmul.bf16.gmra.mxu0 %v1723_v39  ;;  %1003 = vmatmul.bf16.gmra.mxu2 %v1727_v40 }
 0x157   : > { %1072 = vmatmul.bf16.gmra.mxu1 %v1723_v39  ;;  %1092 = vmatmul.bf16.gmra.mxu3 %v1727_v40 }
 0x166   : > { %988 = vmatmul.bf16.gmra.mxu0 %v1724_v4  ;;  %1008 = vmatmul.bf16.gmra.mxu2 %v1728_v26 }
 0x167   : > { %1077 = vmatmul.bf16.gmra.mxu1 %v1724_v4  ;;  %1097 = vmatmul.bf16.gmra.mxu3 %v1728_v26  ;;  %v767_v26 = vpop.permute.xlu0 %766 }
 0x176   : > { %1013 = vmatmul.bf16.gmra.mxu2 %v1729_v27 }
 0x177   : > { %1102 = vmatmul.bf16.gmra.mxu3 %v1729_v27 }
 0x186   : > { %1018 = vmatmul.bf16.gmra.mxu2 %v1730_v29 }
 0x187   : > { %1107 = vmatmul.bf16.gmra.mxu3 %v1730_v29 }
 0x196   : > { %1023 = vmatmul.bf16.gmra.mxu2 %v1731_v30 }
 0x197   : > { %1112 = vmatmul.bf16.gmra.mxu3 %v1731_v30 }
 0x1a6   : > { %1028 = vmatmul.bf16.gmra.mxu2 %v1732_v31 }
 0x1a7   : > { %1117 = vmatmul.bf16.gmra.mxu3 %v1732_v31  ;;  %v1735_v31 = vld [vmem:[%s2280_s3 + $0x70] sm:$0xff] }
 0x1b3   : > { %v974_v37 = vpop.f32.mrf.mxu0 }
 0x1b4   : > { %v975_v18 = vadd.f32 %v974_v37, %v712_v32  ;;  %v1063_v38 = vpop.f32.mrf.mxu1 }
 0x1b5   : > { %v1064_v42 = vadd.f32 %v1063_v38, %v712_v32 }
 0x1b6   : > { %v1143_v43 = vmax.f32 %v975_v18, 0.0  ;;  %1033 = vmatmul.bf16.gmra.mxu2 %v1733_v36 }
 0x1b7   : > { %v1144_v45 = vmax.f32 %v1064_v42, 0.0  ;;  %1122 = vmatmul.bf16.gmra.mxu3 %v1733_v36 }
 0x1b9   : > { %v994_v47 = vpop.f32.mrf.mxu2  ;;  %v1271_v48 = vadd.f32 %v1144_v45, %v1143_v43 }
 0x1ba   : > { %v995_v49 = vadd.f32 %v994_v47, %v752_v46  ;;  %v1083_v50 = vpop.f32.mrf.mxu3 }
 0x1bb   : > { %v1084_v51 = vadd.f32 %v1083_v50, %v752_v46  ;;  %1370 = vadd.xlane.f32.xlu0 %v1271_v48  ;;  %v976_v54 = vpop.f32.mrf.mxu0  ;;  %v772_v48 = vpop.permute.xlu1 %771 }
 0x1bc   : > { %v1159_v55 = vmax.f32 %v995_v49, 0.0  ;;  %v1065_v56 = vpop.f32.mrf.mxu1  ;;  %v977_v58 = vadd.f32 %v976_v54, %v717_v34 }
 0x1bd   : > { %v1160_v57 = vmax.f32 %v1084_v51, 0.0  ;;  %v1066_v59 = vadd.f32 %v1065_v56, %v717_v34 }
 0x1be   : > { %v1145_v0 = vmax.f32 %v977_v58, 0.0 }
 0x1bf   : > { %v1279_v60 = vadd.f32 %v1160_v57, %v1159_v55  ;;  %v1146_v11 = vmax.f32 %v1066_v59, 0.0 }
 0x1c1   : > { %1386 = vadd.xlane.f32.xlu1 %v1279_v60  ;;  %v996_v62 = vpop.f32.mrf.mxu2  ;;  %v1272_v20 = vadd.f32 %v1146_v11, %v1145_v0 }
 0x1c2   : > { %v997_v16 = vadd.f32 %v996_v62, %v757_v61  ;;  %v1085_v63 = vpop.f32.mrf.mxu3 }
 0x1c3   : > { %v1086_v1 = vadd.f32 %v1085_v63, %v757_v61  ;;  %v979_v6 = vpop.f32.mrf.mxu0  ;;  %v777_v63 = vpop.permute.xlu2 %776 }
 0x1c4   : > { %v1161_v7 = vmax.f32 %v997_v16, 0.0  ;;  %v1068_v8 = vpop.f32.mrf.mxu1  ;;  %v980_v12 = vadd.f32 %v979_v6, %v722_v33  ;;  %v1736_v6 = vld [vmem:[%s2280_s3 + $0x78] sm:$0xff] }
 0x1c5   : > { %v1162_v9 = vmax.f32 %v1086_v1, 0.0  ;;  %v1069_v13 = vadd.f32 %v1068_v8, %v722_v33 }
 0x1c6   : > { %1038 = vmatmul.bf16.gmra.mxu2 %v1734_v10  ;;  %v1147_v25 = vmax.f32 %v980_v12, 0.0 }
 0x1c7   : > { %1127 = vmatmul.bf16.gmra.mxu3 %v1734_v10  ;;  %v1280_v17 = vadd.f32 %v1162_v9, %v1161_v7  ;;  %v1148_v22 = vmax.f32 %v1069_v13, 0.0 }
 0x1c9   : > { %1388 = vadd.xlane.f32.xlu2 %v1280_v17  ;;  %1372 = vadd.xlane.f32.xlu1 %v1272_v20  ;;  %v999_v21 = vpop.f32.mrf.mxu2  ;;  %v1273_v40 = vadd.f32 %v1148_v22, %v1147_v25 }
 0x1ca   : > { %v1000_v23 = vadd.f32 %v999_v21, %v762_v2  ;;  %v1088_v24 = vpop.f32.mrf.mxu3 }
 0x1cb   : > { %v1089_v19 = vadd.f32 %v1088_v24, %v762_v2  ;;  %v981_v28 = vpop.f32.mrf.mxu0 }
 0x1cc   : > { %v1163_v15 = vmax.f32 %v1000_v23, 0.0  ;;  %v1070_v3 = vpop.f32.mrf.mxu1  ;;  %v982_v53 = vadd.f32 %v981_v28, %v727_v14  ;;  %v782_v23 = vpop.permute.xlu0 %781 }
 0x1cd   : > { %v1164_v52 = vmax.f32 %v1089_v19, 0.0  ;;  %v1071_v39 = vadd.f32 %v1070_v3, %v727_v14 }
 0x1ce   : > { %v1149_v32 = vmax.f32 %v982_v53, 0.0 }
 0x1cf   : > { %v1281_v4 = vadd.f32 %v1164_v52, %v1163_v15  ;;  %v1150_v33 = vmax.f32 %v1071_v39, 0.0 }
 0x1d1   : > { %1374 = vadd.xlane.f32.xlu2 %v1273_v40  ;;  %1390 = vadd.xlane.f32.xlu0 %v1281_v4  ;;  %v1001_v27 = vpop.f32.mrf.mxu2  ;;  %v1274_v46 = vadd.f32 %v1150_v33, %v1149_v32 }
 0x1d2   : > { %v1002_v29 = vadd.f32 %v1001_v27, %v767_v26  ;;  %v1090_v30 = vpop.f32.mrf.mxu3  ;;  %v787_v27 = vpop.permute.xlu1 %786 }
 0x1d3   : > { %v1091_v34 = vadd.f32 %v1090_v30, %v767_v26  ;;  %v984_v36 = vpop.f32.mrf.mxu0 }
 0x1d4   : > { %v1165_v37 = vmax.f32 %v1002_v29, 0.0  ;;  %v985_v18 = vadd.f32 %v984_v36, %v2151_v41  ;;  %v1073_v14 = vpop.f32.mrf.mxu1 }
 0x1d5   : > { %v1166_v38 = vmax.f32 %v1091_v34, 0.0  ;;  %v1074_v42 = vadd.f32 %v1073_v14, %v2151_v41 }
 0x1d6   : > { %v1151_v43 = vmax.f32 %v985_v18, 0.0  ;;  %1043 = vmatmul.bf16.gmra.mxu2 %v1735_v31  ;;  %v792_v18 = vpop.permute.xlu2 %791 }
 0x1d7   : > { %v1152_v45 = vmax.f32 %v1074_v42, 0.0  ;;  %1132 = vmatmul.bf16.gmra.mxu3 %v1735_v31  ;;  %v1282_v47 = vadd.f32 %v1166_v38, %v1165_v37 }
 0x1d9   : > { %1376 = vadd.xlane.f32.xlu2 %v1274_v46  ;;  %1392 = vadd.xlane.f32.xlu1 %v1282_v47  ;;  %v1004_v49 = vpop.f32.mrf.mxu2  ;;  %v1275_v50 = vadd.f32 %v1152_v45, %v1151_v43  ;;  %v797_v46 = vpop.permute.xlu0 %796 }
 0x1da   : > { %v1005_v51 = vadd.f32 %v1004_v49, %v772_v48  ;;  %v1093_v54 = vpop.f32.mrf.mxu3 }
 0x1db   : > { %v1094_v55 = vadd.f32 %v1093_v54, %v772_v48  ;;  %1378 = vadd.xlane.f32.xlu0 %v1275_v50  ;;  %v986_v56 = vpop.f32.mrf.mxu0  ;;  %v802_v54 = vpop.permute.xlu1 %801 }
 0x1dc   : > { %v1167_v57 = vmax.f32 %v1005_v51, 0.0  ;;  %v987_v58 = vadd.f32 %v986_v56, %v2146_v35  ;;  %v1075_v41 = vpop.f32.mrf.mxu1 }
 0x1dd   : > { %v1168_v59 = vmax.f32 %v1094_v55, 0.0  ;;  %v1076_v60 = vadd.f32 %v1075_v41, %v2146_v35 }
 0x1de   : > { %v1153_v61 = vmax.f32 %v987_v58, 0.0 }
 0x1df   : > { %v1154_v62 = vmax.f32 %v1076_v60, 0.0  ;;  %v1283_v16 = vadd.f32 %v1168_v59, %v1167_v57 }
 0x1e1   : > { %1394 = vadd.xlane.f32.xlu2 %v1283_v16  ;;  %v1006_v10 = vpop.f32.mrf.mxu2  ;;  %v1276_v0 = vadd.f32 %v1154_v62, %v1153_v61  ;;  %v812_v58 = vpop.permute.xlu0 %811 }
 0x1e2   : > { %v1007_v11 = vadd.f32 %v1006_v10, %v777_v63  ;;  %v1095_v1 = vpop.f32.mrf.mxu3  ;;  %v807_v62 = vpop.permute.xlu2 %806 }
 0x1e3   : > { %v1096_v7 = vadd.f32 %v1095_v1, %v777_v63  ;;  %1380 = vadd.xlane.f32.xlu1 %v1276_v0  ;;  %v989_v8 = vpop.f32.mrf.mxu0  ;;  %v817_v10 = vpop.permute.xlu1 %816 }
 0x1e4   : > { %v1169_v9 = vmax.f32 %v1007_v11, 0.0  ;;  %v990_v12 = vadd.f32 %v989_v8, %v2153_v44  ;;  %v1078_v35 = vpop.f32.mrf.mxu1 }
 0x1e5   : > { %v1170_v13 = vmax.f32 %v1096_v7, 0.0  ;;  %v1079_v17 = vadd.f32 %v1078_v35, %v2153_v44 }
 0x1e6   : > { %v1155_v20 = vmax.f32 %v990_v12, 0.0  ;;  %1048 = vmatmul.bf16.gmra.mxu2 %v1736_v6 }
 0x1e7   : > { %v1156_v2 = vmax.f32 %v1079_v17, 0.0  ;;  %1137 = vmatmul.bf16.gmra.mxu3 %v1736_v6  ;;  %v1284_v21 = vadd.f32 %v1170_v13, %v1169_v9 }
 0x1e9   : > { %1396 = vadd.xlane.f32.xlu0 %v1284_v21  ;;  %v1009_v24 = vpop.f32.mrf.mxu2  ;;  %v1277_v25 = vadd.f32 %v1156_v2, %v1155_v20  ;;  %v827_v1 = vpop.permute.xlu0 %826 }
 0x1ea   : > { %v1010_v22 = vadd.f32 %v1009_v24, %v782_v23  ;;  %v1098_v19 = vpop.f32.mrf.mxu3  ;;  %v822_v35 = vpop.permute.xlu2 %821 }
 0x1eb   : > { %v1099_v28 = vadd.f32 %v1098_v19, %v782_v23  ;;  %1382 = vadd.xlane.f32.xlu2 %v1277_v25  ;;  %v991_v15 = vpop.f32.mrf.mxu0  ;;  %v832_v17 = vpop.permute.xlu1 %831 }
 0x1ec   : > { %v1171_v3 = vmax.f32 %v1010_v22, 0.0  ;;  %v992_v52 = vadd.f32 %v991_v15, %v2155_v5  ;;  %v1080_v53 = vpop.f32.mrf.mxu1 }
 0x1ed   : > { %v1172_v39 = vmax.f32 %v1099_v28, 0.0  ;;  %v1081_v44 = vadd.f32 %v1080_v53, %v2155_v5 }
 0x1ee   : > { %v1157_v40 = vmax.f32 %v992_v52, 0.0 }
 0x1ef   : > { %v1158_v4 = vmax.f32 %v1081_v44, 0.0  ;;  %v1285_v26 = vadd.f32 %v1172_v39, %v1171_v3 }
 0x1f1   : > { %1398 = vadd.xlane.f32.xlu1 %v1285_v26  ;;  %v1011_v29 = vpop.f32.mrf.mxu2  ;;  %v1278_v30 = vadd.f32 %v1158_v4, %v1157_v40  ;;  %v2174_v24 = vpop.permute.xlu0 %841 }
 0x1f2   : > { %v1012_v31 = vadd.f32 %v1011_v29, %v787_v27  ;;  %v1100_v32 = vpop.f32.mrf.mxu3  ;;  %v837_v28 = vpop.permute.xlu2 %836 }
 0x1f3   : > { %v1101_v33 = vadd.f32 %v1100_v32, %v787_v27  ;;  %1384 = vadd.xlane.f32.xlu0 %v1278_v30  ;;  %v2176_v3 = vpop.permute.xlu1 %846 }
 0x1f4   : > { %v1173_v34 = vmax.f32 %v1012_v31, 0.0 }
 0x1f5   : > { %v1174_v36 = vmax.f32 %v1101_v33, 0.0 }
 0x1f7   : > { %v1286_v37 = vadd.f32 %v1174_v36, %v1173_v34 }
 0x1f9   : > { %1400 = vadd.xlane.f32.xlu2 %v1286_v37  ;;  %v1014_v14 = vpop.f32.mrf.mxu2  ;;  %v2178_v4 = vpop.permute.xlu0 %856 }
 0x1fa   : > { %v1015_v38 = vadd.f32 %v1014_v14, %v792_v18  ;;  %v1103_v42 = vpop.f32.mrf.mxu3  ;;  %v2180_v29 = vpop.permute.xlu2 %851 }
 0x1fb   : > { %v1104_v5 = vadd.f32 %v1103_v42, %v792_v18  ;;  %v2183_v33 = vpop.permute.xlu1 %861 }
 0x1fc   : > { %v1175_v43 = vmax.f32 %v1015_v38, 0.0 }
 0x1fd   : > { %v1176_v45 = vmax.f32 %v1104_v5, 0.0 }
 0x1ff   : > { %v1287_v47 = vadd.f32 %v1176_v45, %v1175_v43 }
 0x201   : > { %1402 = vadd.xlane.f32.xlu0 %v1287_v47  ;;  %v1016_v48 = vpop.f32.mrf.mxu2 }
 0x202   : > { %v1017_v49 = vadd.f32 %v1016_v48, %v797_v46  ;;  %v1105_v50 = vpop.f32.mrf.mxu3  ;;  %v2192_v45 = vpop.permute.xlu2 %866 }
 0x203   : > { %v1106_v51 = vadd.f32 %v1105_v50, %v797_v46 }
 0x204   : > { %v1177_v55 = vmax.f32 %v1017_v49, 0.0 }
 0x205   : > { %v1178_v56 = vmax.f32 %v1106_v51, 0.0 }
 0x207   : > { %v1288_v57 = vadd.f32 %v1178_v56, %v1177_v55 }
 0x209   : > { %1404 = vadd.xlane.f32.xlu1 %v1288_v57  ;;  %v1019_v41 = vpop.f32.mrf.mxu2 }
 0x20a   : > { %v1020_v59 = vadd.f32 %v1019_v41, %v802_v54  ;;  %v1108_v60 = vpop.f32.mrf.mxu3 }
 0x20b   : > { %v1109_v61 = vadd.f32 %v1108_v60, %v802_v54 }
 0x20c   : > { %v1179_v16 = vmax.f32 %v1020_v59, 0.0 }
 0x20d   : > { %v1180_v63 = vmax.f32 %v1109_v61, 0.0 }
 0x20f   : > { %v1289_v0 = vadd.f32 %v1180_v63, %v1179_v16 }
 0x211   : > { %1406 = vadd.xlane.f32.xlu2 %v1289_v0  ;;  %v1021_v11 = vpop.f32.mrf.mxu2 }
 0x212   : > { %v1022_v6 = vadd.f32 %v1021_v11, %v807_v62  ;;  %v1110_v7 = vpop.f32.mrf.mxu3 }
 0x213   : > { %v1111_v8 = vadd.f32 %v1110_v7, %v807_v62 }
 0x214   : > { %v1181_v9 = vmax.f32 %v1022_v6, 0.0 }
 0x215   : > { %v1182_v12 = vmax.f32 %v1111_v8, 0.0 }
 0x217   : > { %v1290_v13 = vadd.f32 %v1182_v12, %v1181_v9 }
 0x219   : > { %1408 = vadd.xlane.f32.xlu0 %v1290_v13  ;;  %v1024_v20 = vpop.f32.mrf.mxu2 }
 0x21a   : > { %v1025_v2 = vadd.f32 %v1024_v20, %v812_v58  ;;  %v1113_v21 = vpop.f32.mrf.mxu3 }
 0x21b   : > { %v1114_v23 = vadd.f32 %v1113_v21, %v812_v58 }
 0x21c   : > { %v1183_v25 = vmax.f32 %v1025_v2, 0.0 }
 0x21d   : > { %v1184_v22 = vmax.f32 %v1114_v23, 0.0 }
 0x21f   : > { %v1291_v19 = vadd.f32 %v1184_v22, %v1183_v25 }
 0x221   : > { %1410 = vadd.xlane.f32.xlu1 %v1291_v19  ;;  %v1026_v15 = vpop.f32.mrf.mxu2 }
 0x222   : > { %v1027_v52 = vadd.f32 %v1026_v15, %v817_v10  ;;  %v1115_v53 = vpop.f32.mrf.mxu3 }
 0x223   : > { %v1116_v39 = vadd.f32 %v1115_v53, %v817_v10 }
 0x224   : > { %v1185_v44 = vmax.f32 %v1027_v52, 0.0 }
 0x225   : > { %v1186_v40 = vmax.f32 %v1116_v39, 0.0 }
 0x227   : > { %v1292_v26 = vadd.f32 %v1186_v40, %v1185_v44 }
 0x229   : > { %1412 = vadd.xlane.f32.xlu2 %v1292_v26  ;;  %v1029_v27 = vpop.f32.mrf.mxu2 }
 0x22a   : > { %v1030_v30 = vadd.f32 %v1029_v27, %v822_v35  ;;  %v1118_v31 = vpop.f32.mrf.mxu3 }
 0x22b   : > { %v1119_v32 = vadd.f32 %v1118_v31, %v822_v35 }
 0x22c   : > { %v1187_v34 = vmax.f32 %v1030_v30, 0.0 }
 0x22d   : > { %v1188_v36 = vmax.f32 %v1119_v32, 0.0 }
 0x22e   : > { %v1371_v37 = vpop.xlane.xlu0 %1370 }
 0x22f   : > { %v1434_v18 = vmul.f32 0.00390625, %v1371_v37  ;;  %v1293_v14 = vadd.f32 %v1188_v36, %v1187_v34 }
 0x231   : > { %1467 = vst.msk [vmem:[%s2188_s26] sm:$0xff] %vm1466_vm3, %v1434_v18  ;;  %1414 = vadd.xlane.f32.xlu0 %v1293_v14  ;;  %v1031_v38 = vpop.f32.mrf.mxu2 }
 0x232   : > { %v1032_v42 = vadd.f32 %v1031_v38, %v827_v1  ;;  %v1120_v5 = vpop.f32.mrf.mxu3 }
 0x233   : > { %v1121_v43 = vadd.f32 %v1120_v5, %v827_v1 }
 0x234   : > { %v1189_v46 = vmax.f32 %v1032_v42, 0.0  ;;  %v1387_v47 = vpop.xlane.xlu1 %1386 }
 0x235   : > { %v1190_v48 = vmax.f32 %v1121_v43, 0.0  ;;  %v1442_v49 = vmul.f32 0.00390625, %v1387_v47 }
 0x237   : > { %1475 = vst.msk [vmem:[%s2188_s26 + $0x40] sm:$0xff] %vm1466_vm3, %v1442_v49  ;;  %v1294_v50 = vadd.f32 %v1190_v48, %v1189_v46 }
 0x239   : > { %1416 = vadd.xlane.f32.xlu1 %v1294_v50  ;;  %v1034_v51 = vpop.f32.mrf.mxu2 }
 0x23a   : > { %v1035_v54 = vadd.f32 %v1034_v51, %v832_v17  ;;  %v1123_v55 = vpop.f32.mrf.mxu3 }
 0x23b   : > { %v1124_v56 = vadd.f32 %v1123_v55, %v832_v17 }
 0x23c   : > { %v1191_v57 = vmax.f32 %v1035_v54, 0.0  ;;  %v1389_v58 = vpop.xlane.xlu2 %1388  ;;  %v1373_v41 = vpop.xlane.xlu1 %1372 }
 0x23d   : > { %v1192_v59 = vmax.f32 %v1124_v56, 0.0  ;;  %v1443_v60 = vmul.f32 0.00390625, %v1389_v58  ;;  %v1435_v61 = vmul.f32 0.00390625, %v1373_v41 }
 0x23f   : > { %1476 = vst.msk [vmem:[%s2188_s26 + $0x48] sm:$0xff] %vm1466_vm3, %v1443_v60  ;;  %v1295_v62 = vadd.f32 %v1192_v59, %v1191_v57 }
 0x240   : > { %1468 = vst.msk [vmem:[%s2188_s26 + $0x8] sm:$0xff] %vm1466_vm3, %v1435_v61 }
 0x241   : > { %1418 = vadd.xlane.f32.xlu2 %v1295_v62  ;;  %v1036_v16 = vpop.f32.mrf.mxu2 }
 0x242   : > { %v1037_v63 = vadd.f32 %v1036_v16, %v837_v28  ;;  %v1125_v10 = vpop.f32.mrf.mxu3 }
 0x243   : > { %v1126_v0 = vadd.f32 %v1125_v10, %v837_v28 }
 0x244   : > { %v1193_v11 = vmax.f32 %v1037_v63, 0.0  ;;  %v1375_v1 = vpop.xlane.xlu2 %1374  ;;  %v1391_v6 = vpop.xlane.xlu0 %1390 }
 0x245   : > { %v1194_v7 = vmax.f32 %v1126_v0, 0.0  ;;  %v1436_v8 = vmul.f32 0.00390625, %v1375_v1  ;;  %v1444_v9 = vmul.f32 0.00390625, %v1391_v6 }
 0x247   : > { %1469 = vst.msk [vmem:[%s2188_s26 + $0x10] sm:$0xff] %vm1466_vm3, %v1436_v8  ;;  %v1296_v12 = vadd.f32 %v1194_v7, %v1193_v11 }
 0x248   : > { %1477 = vst.msk [vmem:[%s2188_s26 + $0x50] sm:$0xff] %vm1466_vm3, %v1444_v9 }
 0x249   : > { %1420 = vadd.xlane.f32.xlu0 %v1296_v12  ;;  %v1039_v35 = vpop.f32.mrf.mxu2 }
 0x24a   : > { %v1040_v13 = vadd.f32 %v1039_v35, %v2174_v24  ;;  %v1128_v17 = vpop.f32.mrf.mxu3 }
 0x24b   : > { %v1129_v20 = vadd.f32 %v1128_v17, %v2174_v24 }
 0x24c   : > { %v1195_v2 = vmax.f32 %v1040_v13, 0.0  ;;  %v1377_v21 = vpop.xlane.xlu2 %1376  ;;  %v1393_v23 = vpop.xlane.xlu1 %1392 }
 0x24d   : > { %v1196_v25 = vmax.f32 %v1129_v20, 0.0  ;;  %v1437_v22 = vmul.f32 0.00390625, %v1377_v21  ;;  %v1445_v19 = vmul.f32 0.00390625, %v1393_v23 }
 0x24e   : > { %v1379_v28 = vpop.xlane.xlu0 %1378 }
 0x24f   : > { %1470 = vst.msk [vmem:[%s2188_s26 + $0x18] sm:$0xff] %vm1466_vm3, %v1437_v22  ;;  %v1438_v15 = vmul.f32 0.00390625, %v1379_v28  ;;  %v1297_v52 = vadd.f32 %v1196_v25, %v1195_v2 }
 0x250   : > { %1478 = vst.msk [vmem:[%s2188_s26 + $0x58] sm:$0xff] %vm1466_vm3, %v1445_v19 }
 0x251   : > { %1471 = vst.msk [vmem:[%s2188_s26 + $0x20] sm:$0xff] %vm1466_vm3, %v1438_v15  ;;  %1422 = vadd.xlane.f32.xlu1 %v1297_v52  ;;  %v1041_v53 = vpop.f32.mrf.mxu2 }
 0x252   : > { %v1042_v24 = vadd.f32 %v1041_v53, %v2176_v3  ;;  %v1130_v39 = vpop.f32.mrf.mxu3 }
 0x253   : > { %v1131_v44 = vadd.f32 %v1130_v39, %v2176_v3 }
 0x254   : > { %v1197_v40 = vmax.f32 %v1042_v24, 0.0  ;;  %v1395_v26 = vpop.xlane.xlu2 %1394 }
 0x255   : > { %v1198_v27 = vmax.f32 %v1131_v44, 0.0  ;;  %v1446_v30 = vmul.f32 0.00390625, %v1395_v26 }
 0x256   : > { %v1381_v31 = vpop.xlane.xlu1 %1380 }
 0x257   : > { %1479 = vst.msk [vmem:[%s2188_s26 + $0x60] sm:$0xff] %vm1466_vm3, %v1446_v30  ;;  %v1439_v32 = vmul.f32 0.00390625, %v1381_v31  ;;  %v1298_v34 = vadd.f32 %v1198_v27, %v1197_v40 }
 0x259   : > { %1472 = vst.msk [vmem:[%s2188_s26 + $0x28] sm:$0xff] %vm1466_vm3, %v1439_v32  ;;  %1424 = vadd.xlane.f32.xlu2 %v1298_v34  ;;  %v1044_v36 = vpop.f32.mrf.mxu2 }
 0x25a   : > { %v1045_v37 = vadd.f32 %v1044_v36, %v2180_v29  ;;  %v1133_v18 = vpop.f32.mrf.mxu3 }
 0x25b   : > { %v1134_v3 = vadd.f32 %v1133_v18, %v2180_v29 }
 0x25c   : > { %v1199_v14 = vmax.f32 %v1045_v37, 0.0  ;;  %v1397_v38 = vpop.xlane.xlu0 %1396 }
 0x25d   : > { %v1200_v42 = vmax.f32 %v1134_v3, 0.0  ;;  %v1447_v5 = vmul.f32 0.00390625, %v1397_v38 }
 0x25e   : > { %v1383_v43 = vpop.xlane.xlu2 %1382 }
 0x25f   : > { %1480 = vst.msk [vmem:[%s2188_s26 + $0x68] sm:$0xff] %vm1466_vm3, %v1447_v5  ;;  %v1440_v46 = vmul.f32 0.00390625, %v1383_v43  ;;  %v1299_v47 = vadd.f32 %v1200_v42, %v1199_v14 }
 0x261   : > { %1473 = vst.msk [vmem:[%s2188_s26 + $0x30] sm:$0xff] %vm1466_vm3, %v1440_v46  ;;  %1426 = vadd.xlane.f32.xlu0 %v1299_v47  ;;  %v1046_v48 = vpop.f32.mrf.mxu2 }
 0x262   : > { %v1047_v49 = vadd.f32 %v1046_v48, %v2178_v4  ;;  %v1135_v50 = vpop.f32.mrf.mxu3 }
 0x263   : > { %v1136_v29 = vadd.f32 %v1135_v50, %v2178_v4 }
 0x264   : > { %v1201_v51 = vmax.f32 %v1047_v49, 0.0  ;;  %v1399_v54 = vpop.xlane.xlu1 %1398 }
 0x265   : > { %v1202_v55 = vmax.f32 %v1136_v29, 0.0  ;;  %v1448_v56 = vmul.f32 0.00390625, %v1399_v54 }
 0x266   : > { %v1385_v57 = vpop.xlane.xlu0 %1384 }
 0x267   : > { %1481 = vst.msk [vmem:[%s2188_s26 + $0x70] sm:$0xff] %vm1466_vm3, %v1448_v56  ;;  %v1441_v58 = vmul.f32 0.00390625, %v1385_v57  ;;  %v1300_v41 = vadd.f32 %v1202_v55, %v1201_v51 }
 0x269   : > { %1474 = vst.msk [vmem:[%s2188_s26 + $0x38] sm:$0xff] %vm1466_vm3, %v1441_v58  ;;  %1428 = vadd.xlane.f32.xlu1 %v1300_v41  ;;  %v1049_v59 = vpop.f32.mrf.mxu2 }
 0x26a   : > { %v1050_v60 = vadd.f32 %v1049_v59, %v2183_v33  ;;  %v1138_v61 = vpop.f32.mrf.mxu3 }
 0x26b   : > { %v1139_v62 = vadd.f32 %v1138_v61, %v2183_v33 }
 0x26c   : > { %v1203_v4 = vmax.f32 %v1050_v60, 0.0  ;;  %v1401_v16 = vpop.xlane.xlu2 %1400 }
 0x26d   : > { %v1204_v63 = vmax.f32 %v1139_v62, 0.0  ;;  %v1449_v10 = vmul.f32 0.00390625, %v1401_v16 }
 0x26f   : > { %1482 = vst.msk [vmem:[%s2188_s26 + $0x78] sm:$0xff] %vm1466_vm3, %v1449_v10  ;;  %v1301_v0 = vadd.f32 %v1204_v63, %v1203_v4 }
 0x271   : > { %1430 = vadd.xlane.f32.xlu2 %v1301_v0  ;;  %v1051_v11 = vpop.f32.mrf.mxu2 }
 0x272   : > { %v1052_v1 = vadd.f32 %v1051_v11, %v2192_v45  ;;  %v1140_v6 = vpop.f32.mrf.mxu3 }
 0x273   : > { %v1141_v7 = vadd.f32 %v1140_v6, %v2192_v45 }
 0x274   : > { %v1205_v8 = vmax.f32 %v1052_v1, 0.0  ;;  %v1403_v33 = vpop.xlane.xlu0 %1402 }
 0x275   : > { %v1206_v9 = vmax.f32 %v1141_v7, 0.0  ;;  %v1450_v12 = vmul.f32 0.00390625, %v1403_v33 }
 0x277   : > { %1483 = vst.msk [vmem:[%s2188_s26 + $0x80] sm:$0xff] %vm1466_vm3, %v1450_v12  ;;  %v1302_v35 = vadd.f32 %v1206_v9, %v1205_v8 }
 0x279   : > { %1432 = vadd.xlane.f32.xlu0 %v1302_v35 }
 0x27c   : > { %v1405_v13 = vpop.xlane.xlu1 %1404 }
 0x27d   : > { %v1451_v17 = vmul.f32 0.00390625, %v1405_v13 }
 0x27f   : > { %1484 = vst.msk [vmem:[%s2188_s26 + $0x88] sm:$0xff] %vm1466_vm3, %v1451_v17 }
 0x284   : > { %v1407_v20 = vpop.xlane.xlu2 %1406 }
 0x285   : > { %v1452_v2 = vmul.f32 0.00390625, %v1407_v20 }
 0x287   : > { %1485 = vst.msk [vmem:[%s2188_s26 + $0x90] sm:$0xff] %vm1466_vm3, %v1452_v2 }
 0x28c   : > { %v1409_v45 = vpop.xlane.xlu0 %1408 }
 0x28d   : > { %v1453_v21 = vmul.f32 0.00390625, %v1409_v45 }
 0x28f   : > { %1486 = vst.msk [vmem:[%s2188_s26 + $0x98] sm:$0xff] %vm1466_vm3, %v1453_v21 }
 0x294   : > { %v1411_v23 = vpop.xlane.xlu1 %1410 }
 0x295   : > { %v1454_v25 = vmul.f32 0.00390625, %v1411_v23 }
 0x297   : > { %1487 = vst.msk [vmem:[%s2188_s26 + $0xa0] sm:$0xff] %vm1466_vm3, %v1454_v25 }
 0x29c   : > { %v1413_v22 = vpop.xlane.xlu2 %1412 }
 0x29d   : > { %v1455_v19 = vmul.f32 0.00390625, %v1413_v22 }
 0x29f   : > { %1488 = vst.msk [vmem:[%s2188_s26 + $0xa8] sm:$0xff] %vm1466_vm3, %v1455_v19 }
 0x2a4   : > { %v1415_v28 = vpop.xlane.xlu0 %1414 }
 0x2a5   : > { %v1456_v15 = vmul.f32 0.00390625, %v1415_v28 }
 0x2a7   : > { %1489 = vst.msk [vmem:[%s2188_s26 + $0xb0] sm:$0xff] %vm1466_vm3, %v1456_v15 }
 0x2ac   : > { %v1417_v52 = vpop.xlane.xlu1 %1416 }
 0x2ad   : > { %v1457_v53 = vmul.f32 0.00390625, %v1417_v52 }
 0x2af   : > { %1490 = vst.msk [vmem:[%s2188_s26 + $0xb8] sm:$0xff] %vm1466_vm3, %v1457_v53 }
 0x2b4   : > { %v1419_v24 = vpop.xlane.xlu2 %1418 }
 0x2b5   : > { %v1458_v39 = vmul.f32 0.00390625, %v1419_v24 }
 0x2b7   : > { %1491 = vst.msk [vmem:[%s2188_s26 + $0xc0] sm:$0xff] %vm1466_vm3, %v1458_v39 }
 0x2bc   : > { %v1421_v44 = vpop.xlane.xlu0 %1420 }
 0x2bd   : > { %v1459_v40 = vmul.f32 0.00390625, %v1421_v44 }
 0x2bf   : > { %1492 = vst.msk [vmem:[%s2188_s26 + $0xc8] sm:$0xff] %vm1466_vm3, %v1459_v40 }
 0x2c4   : > { %v1423_v26 = vpop.xlane.xlu1 %1422 }
 0x2c5   : > { %v1460_v27 = vmul.f32 0.00390625, %v1423_v26 }
 0x2c7   : > { %1493 = vst.msk [vmem:[%s2188_s26 + $0xd0] sm:$0xff] %vm1466_vm3, %v1460_v27 }
 0x2cc   : > { %v1425_v30 = vpop.xlane.xlu2 %1424 }
 0x2cd   : > { %v1461_v31 = vmul.f32 0.00390625, %v1425_v30 }
 0x2cf   : > { %1494 = vst.msk [vmem:[%s2188_s26 + $0xd8] sm:$0xff] %vm1466_vm3, %v1461_v31 }
 0x2d4   : > { %v1427_v32 = vpop.xlane.xlu0 %1426 }
 0x2d5   : > { %v1462_v34 = vmul.f32 0.00390625, %v1427_v32 }
 0x2d7   : > { %1495 = vst.msk [vmem:[%s2188_s26 + $0xe0] sm:$0xff] %vm1466_vm3, %v1462_v34 }
 0x2dc   : > { %v1429_v36 = vpop.xlane.xlu1 %1428 }
 0x2dd   : > { %v1463_v37 = vmul.f32 0.00390625, %v1429_v36 }
 0x2df   : > { %1496 = vst.msk [vmem:[%s2188_s26 + $0xe8] sm:$0xff] %vm1466_vm3, %v1463_v37 }
 0x2e4   : > { %v1431_v18 = vpop.xlane.xlu2 %1430 }
 0x2e5   : > { %v1464_v3 = vmul.f32 0.00390625, %v1431_v18 }
 0x2e7   : > { %1497 = vst.msk [vmem:[%s2188_s26 + $0xf0] sm:$0xff] %vm1466_vm3, %v1464_v3 }
 0x2ec   : > { %v1433_v14 = vpop.xlane.xlu0 %1432 }
 0x2ed   : > { %v1465_v38 = vmul.f32 0.00390625, %v1433_v14 }
 0x2ef   : > { %1498 = vst.msk [vmem:[%s2188_s26 + $0xf8] sm:$0xff] %vm1466_vm3, %v1465_v38 }
 0x2f0 PF: > { %s15_s20 = sadd.s32 1, %s1804_s20   ;;  %s2283_s18 = smov %s1800_s19 }
 0x2f1   : > { %p12_p5 = scmp.ge.s32.totalorder %s15_s20, 4   ;;  %s2284_s19 = smov %s2286_s21 }
 0x2f3   :  { %14 = sbr.rel (!%p12_p5) target bundleno = 2 (0x2), region = 78 }

// kernel: efgh_backbone_forward.2
= control target key start
LH: loop header
LB: loop body
LE: loop exit
PB: predicated region body
PF: predicated region fallthrough
CT: control target
= control target key end

     0   :  { %s3264_s18 = smov 0   ;;  %s3266_s19 = smov 0   ;;  %s4768_s0 = inlined_call_operand.vmem [shape: bf16[2,3,256], index: 0, kind: input, shape index: {}]   ;;  %s4769_s1 = inlined_call_operand.vmem [shape: f32[192,3], index: 1, kind: input, shape index: {}]   ;;  %s4770_s2 = inlined_call_operand.vmem [shape: f32[192,1], index: 2, kind: input, shape index: {}]   ;;  %s4771_s3 = inlined_call_operand.vmem [shape: bf16[384,192], index: 3, kind: input, shape index: {}]   ;;  %s4772_s4 = inlined_call_operand.vmem [shape: f32[384,1], index: 4, kind: input, shape index: {}]   ;;  %s4773_s5 = inlined_call_operand.vmem [shape: f32[2,384,1], index: 5, kind: output, shape index: {}]  }
   0x1   :  { %s3268_s20 = smov 0  }
   0x2 LB: > { %s27_s21 = sadd.s32 1, %s3225_s19  ;;  %p2865_p0 = scmp.ge.s32.totalorder %s3229_s20, 1  ;;  %s3229_s20 = sphi %s3268_s20, %s15_s20   ;;  %s3225_s19 = sphi %s3266_s19, %s4863_s19   ;;  %s3221_s18 = sphi %s3264_s18, %s4862_s18  }
   0x3   : > { %p29_p1 = scmp.ge.s32.totalorder %s27_s21, 2  ;;  %p206_p2 = scmp.lt.s32.totalorder %s3229_s20, 3 }
   0x5   : > { %s4865_s21 = smov (%p29_p1, %s27_s21), 0  ;;  %p207_p3 = pnand %p2865_p0, %p206_p2 }
   0x7   : > { %210 = sbr.rel (%p207_p3) target bundleno = 1044 (0x414), region = 40 }
   0xc   : > { %v3287_v0 = vld [vmem:[%s4769_s1 + $0x20] sm:$0xff]  ;;  %v310_v1 = vld [vmem:[%s4769_s1 + $0x10] sm:$0xff]  ;;  %v3231_v3 = vmov 1   ;;  %v4774_v4 = vmov 0   ;;  %v3304_v5 = vld [vmem:[%s4769_s1 + $0x28] sm:$0xff]  ;;  %v4779_v20 = vmov 2  }
   0xd   : > { %v3295_v2 = vld [vmem:[%s4769_s1] sm:$0xff]  ;;  %3190 = vset.pattern.permute.xlu0 %v3231_v3  ;;  %3189 = vset.pattern.permute.xlu2 %v4774_v4  ;;  %v3309_v6 = vld [vmem:[%s4769_s1 + $0x18] sm:$0xff]  ;;  %v318_v10 = vld [vmem:[%s4769_s1 + $0x50] sm:$0xff]  ;;  %p239_p4 = scmp.lt.s32.totalorder %s3221_s18, 1  ;;  %vm1719_vm0 = vcmask 523264   ;;  %vm2743_vm1 = vcmask 7168  }
   0xe   : > { %3188 = vset.pattern.permute.xlu1 %v4774_v4  ;;  %354 = vperm.xlu2 %3189, %v3287_v0   ;;  %v3317_v7 = vld [vmem:[%s4769_s1 + $0x40] sm:$0xff]  ;;  %v315_v8 = vld [vmem:[%s4769_s1 + $0x38] sm:$0xff]  ;;  %v3337_v11 = vld [vmem:[%s4769_s1 + $0x70] sm:$0xff] }
   0xf   : > { %344 = vperm.xlu1 %3188, %v310_v1   ;;  %508 = vperm.xlu0 %3190, %v3295_v2   ;;  %v3327_v9 = vld [vmem:[%s4769_s1 + $0x58] sm:$0xff]  ;;  %v321_v12 = vld [vmem:[%s4769_s1 + $0x68] sm:$0xff]  ;;  %v324_v14 = vld [vmem:[%s4769_s1 + $0x80] sm:$0xff]  ;;  %s4867_s18 = smov (!%p239_p4, %s3221_s18), 1 }
  0x10   : > { %v3347_v13 = vld [vmem:[%s4769_s1 + $0x88] sm:$0xff]  ;;  %v3357_v15 = vld [vmem:[%s4769_s1 + $0xa0] sm:$0xff]  ;;  %v3362_v16 = vld [vmem:[%s4769_s1 + $0x98] sm:$0xff]  ;;  %s3111_s10 = sshll.u32 %s4867_s18, 2 }
  0x11   : > { %v3370_v17 = vld [vmem:[%s4769_s1 + $0xb8] sm:$0xff]  ;;  %v3375_v18 = vld [vmem:[%s4769_s1 + $0xb0] sm:$0xff]  ;;  %v309_v19 = vld [vmem:[%s4769_s1 + $0x8] sm:$0xff]  ;;  %s246_s15 = scalar_lea.vmem %s4768_s0, %s3111_s10  ;;  %s3160_s10 = smul.u32 384, %s4867_s18 }
  0x12   : > { %v314_v21 = vld [vmem:[%s4769_s1 + $0x30] sm:$0xff]  ;;  %v317_v22 = vld [vmem:[%s4769_s1 + $0x48] sm:$0xff]  ;;  %v320_v24 = vld [vmem:[%s4769_s1 + $0x60] sm:$0xff] }
  0x13   : > { %v323_v26 = vld [vmem:[%s4769_s1 + $0x78] sm:$0xff]  ;;  %v329_v27 = vld [vmem:[%s4769_s1 + $0xa8] sm:$0xff]  ;;  %v326_v29 = vld [vmem:[%s4769_s1 + $0x90] sm:$0xff]  ;;  %s4493_s16 = scalar_lea.vmem %s4773_s5, %s3160_s10 }
  0x14   : > { %v918_v54 = vld [vmem:[%s4770_s2 + $0x78] sm:$0xff]  ;;  %v917_v55 = vld [vmem:[%s4770_s2 + $0x70] sm:$0xff]  ;;  %v915_v59 = vld [vmem:[%s4770_s2 + $0x60] sm:$0xff] }
  0x15   : > { %v913_v60 = vld [vmem:[%s4770_s2 + $0x50] sm:$0xff]  ;;  %v916_v61 = vld [vmem:[%s4770_s2 + $0x68] sm:$0xff] }
  0x16   : > { %359 = vperm.xlu2 %3189, %v3304_v5  }
  0x17   : > { %349 = vperm.xlu1 %3188, %v3309_v6   ;;  %528 = vperm.xlu0 %3190, %v3304_v5  }
  0x1e   : > { %374 = vperm.xlu2 %3189, %v3317_v7  }
  0x1f   : > { %369 = vperm.xlu1 %3188, %v315_v8   ;;  %540 = vperm.xlu0 %3190, %v3317_v7  }
  0x26   : > { %389 = vperm.xlu2 %3189, %v3327_v9  }
  0x27   : > { %384 = vperm.xlu1 %3188, %v318_v10   ;;  %552 = vperm.xlu0 %3190, %v3327_v9  }
  0x2e   : > { %404 = vperm.xlu2 %3189, %v3337_v11  }
  0x2f   : > { %399 = vperm.xlu1 %3188, %v321_v12   ;;  %564 = vperm.xlu0 %3190, %v3337_v11  }
  0x36   : > { %419 = vperm.xlu2 %3189, %v3347_v13  }
  0x37   : > { %414 = vperm.xlu1 %3188, %v324_v14   ;;  %576 = vperm.xlu0 %3190, %v3347_v13  }
  0x3e   : > { %434 = vperm.xlu2 %3189, %v3357_v15  }
  0x3f   : > { %429 = vperm.xlu1 %3188, %v3362_v16   ;;  %588 = vperm.xlu0 %3190, %v3357_v15  }
  0x46   : > { %449 = vperm.xlu2 %3189, %v3370_v17  }
  0x47   : > { %444 = vperm.xlu1 %3188, %v3375_v18   ;;  %600 = vperm.xlu0 %3190, %v3370_v17  }
  0x4e   : > { %3192 = vset.pattern.permute.xlu2 %v3231_v3 }
  0x4f   : > { %3191 = vset.pattern.permute.xlu1 %v3231_v3  ;;  %3195 = vset.pattern.permute.xlu0 %v4779_v20  ;;  %v914_v3 = vld [vmem:[%s4770_s2 + $0x58] sm:$0xff] }
  0x50   : > { %516 = vperm.xlu2 %3192, %v310_v1   ;;  %512 = vperm.xlu1 %3191, %v309_v19  }
  0x51   : > { %714 = vperm.xlu0 %3195, %v310_v1   ;;  %v912_v1 = vld [vmem:[%s4770_s2 + $0x48] sm:$0xff] }
  0x58   : > { %524 = vperm.xlu2 %3192, %v3287_v0   ;;  %520 = vperm.xlu1 %3191, %v3309_v6  }
  0x59   : > { %734 = vperm.xlu0 %3195, %v315_v8  }
  0x60   : > { %536 = vperm.xlu2 %3192, %v315_v8   ;;  %532 = vperm.xlu1 %3191, %v314_v21   ;;  %v909_v8 = vld [vmem:[%s4770_s2 + $0x30] sm:$0xff] }
  0x61   : > { %746 = vperm.xlu0 %3195, %v318_v10  }
  0x68   : > { %548 = vperm.xlu2 %3192, %v318_v10   ;;  %544 = vperm.xlu1 %3191, %v317_v22   ;;  %v3392_v23 = vpop.permute.xlu2 %354 }
  0x69   : > { %758 = vperm.xlu0 %3195, %v321_v12  }
  0x70   : > { %560 = vperm.xlu2 %3192, %v321_v12   ;;  %556 = vperm.xlu1 %3191, %v320_v24   ;;  %v3397_v25 = vpop.permute.xlu2 %359  ;;  %v924_v12 = vld [vmem:[%s4770_s2 + $0xa8] sm:$0xff] }
  0x71   : > { %770 = vperm.xlu0 %3195, %v324_v14  }
  0x78   : > { %572 = vperm.xlu2 %3192, %v324_v14   ;;  %568 = vperm.xlu1 %3191, %v323_v26   ;;  %v3405_v28 = vpop.permute.xlu2 %374 }
  0x79   : > { %790 = vperm.xlu0 %3195, %v329_v27  }
  0x80   : > { %584 = vperm.xlu2 %3192, %v3362_v16   ;;  %580 = vperm.xlu1 %3191, %v326_v29   ;;  %v3411_v30 = vpop.permute.xlu2 %389 }
  0x81   : > { %778 = vperm.xlu0 %3195, %v326_v29   ;;  %v3413_v31 = vpop.permute.xlu1 %344  ;;  %v3415_v32 = vpop.permute.xlu0 %508 }
  0x82   : > { %4802 = vst [vmem:[#allocation3_spill] sm:$0xff] %v3413_v31 }
  0x88   : > { %596 = vperm.xlu2 %3192, %v3375_v18   ;;  %592 = vperm.xlu1 %3191, %v329_v27   ;;  %v3418_v33 = vpop.permute.xlu2 %404 }
  0x89   : > { %3202 = vset.pattern.permute.xlu0 %v4774_v4  ;;  %v3421_v34 = vpop.permute.xlu1 %349  ;;  %v3423_v35 = vpop.permute.xlu0 %528 }
  0x8a   : > { %4803 = vst [vmem:[#allocation4_spill] sm:$0xff] %v3421_v34  ;;  %334 = vperm.xlu0 %3202, %v3295_v2  }
  0x90   : > { %3194 = vset.pattern.permute.xlu2 %v4779_v20  ;;  %3193 = vset.pattern.permute.xlu1 %v4779_v20  ;;  %v3428_v36 = vpop.permute.xlu2 %419 }
  0x91   : > { %4804 = vst [vmem:[#allocation5_spill] sm:$0xff] %v3428_v36  ;;  %v3430_v37 = vpop.permute.xlu1 %369  ;;  %710 = vperm.xlu2 %3194, %v309_v19   ;;  %706 = vperm.xlu1 %3193, %v3295_v2   ;;  %v3433_v38 = vpop.permute.xlu0 %540  ;;  %v911_v2 = vld [vmem:[%s4770_s2 + $0x40] sm:$0xff] }
  0x92   : > { %339 = vperm.xlu0 %3202, %v309_v19  }
  0x98   : > { %v3435_v39 = vpop.permute.xlu2 %434 }
  0x99   : > { %v3437_v40 = vpop.permute.xlu1 %384  ;;  %722 = vperm.xlu2 %3194, %v3287_v0   ;;  %718 = vperm.xlu1 %3193, %v3309_v6   ;;  %v3441_v41 = vpop.permute.xlu0 %552 }
  0x9a   : > { %364 = vperm.xlu0 %3202, %v314_v21  }
  0xa0   : > { %v3443_v42 = vpop.permute.xlu2 %449 }
  0xa1   : > { %v3445_v43 = vpop.permute.xlu1 %399  ;;  %730 = vperm.xlu2 %3194, %v314_v21   ;;  %726 = vperm.xlu1 %3193, %v3304_v5   ;;  %v3448_v44 = vpop.permute.xlu0 %564  ;;  %v910_v21 = vld [vmem:[%s4770_s2 + $0x38] sm:$0xff] }
  0xa2   : > { %379 = vperm.xlu0 %3202, %v317_v22  }
  0xa9   : > { %v3450_v45 = vpop.permute.xlu1 %414  ;;  %742 = vperm.xlu2 %3194, %v317_v22   ;;  %738 = vperm.xlu1 %3193, %v3317_v7   ;;  %v3453_v46 = vpop.permute.xlu0 %576 }
  0xaa   : > { %4805 = vst [vmem:[#allocation6_spill] sm:$0xff] %v3450_v45  ;;  %394 = vperm.xlu0 %3202, %v320_v24   ;;  %v3455_v47 = vpop.permute.xlu2 %516 }
  0xab   : > { %4806 = vst [vmem:[#allocation7_spill] sm:$0xff] %v3453_v46 }
  0xac   : > { %4807 = vst [vmem:[#allocation8_spill] sm:$0xff] %v3455_v47 }
  0xb1   : > { %v3457_v48 = vpop.permute.xlu1 %429  ;;  %754 = vperm.xlu2 %3194, %v320_v24   ;;  %750 = vperm.xlu1 %3193, %v3327_v9   ;;  %v3460_v49 = vpop.permute.xlu0 %588  ;;  %v926_v24 = vld [vmem:[%s4770_s2 + $0xb8] sm:$0xff] }
  0xb2   : > { %4808 = vst [vmem:[#allocation9_spill] sm:$0xff] %v3457_v48  ;;  %409 = vperm.xlu0 %3202, %v323_v26   ;;  %v3462_v50 = vpop.permute.xlu2 %524 }
  0xb3   : > { %4809 = vst [vmem:[#allocation10_spill] sm:$0xff] %v3462_v50 }
  0xb9   : > { %v3464_v51 = vpop.permute.xlu1 %444  ;;  %766 = vperm.xlu2 %3194, %v323_v26   ;;  %762 = vperm.xlu1 %3193, %v3337_v11   ;;  %v3467_v52 = vpop.permute.xlu0 %600 }
  0xba   : > { %4810 = vst [vmem:[#allocation11_spill] sm:$0xff] %v3464_v51  ;;  %424 = vperm.xlu0 %3202, %v326_v29   ;;  %v3469_v53 = vpop.permute.xlu2 %536  ;;  %v919_v29 = vld [vmem:[%s4770_s2 + $0x80] sm:$0xff] }
  0xbb   : > { %4811 = vst [vmem:[#allocation12_spill] sm:$0xff] %v3467_v52 }
  0xc1   : > { %3197 = vset.pattern.permute.xlu2 %v4774_v4  ;;  %3196 = vset.pattern.permute.xlu1 %v4774_v4 }
  0xc2   : > { %439 = vperm.xlu0 %3202, %v329_v27   ;;  %v3479_v56 = vpop.permute.xlu2 %548  ;;  %1004 = vperm.xlu2 %3197, %v918_v54   ;;  %v3481_v57 = vpop.permute.xlu1 %512 }
  0xc3   : > { %4812 = vst [vmem:[#allocation13_spill] sm:$0xff] %v3481_v57  ;;  %999 = vperm.xlu1 %3196, %v917_v55   ;;  %v3483_v58 = vpop.permute.xlu0 %714  ;;  %v908_v55 = vld [vmem:[%s4770_s2 + $0x28] sm:$0xff] }
  0xc4   : > { %4813 = vst [vmem:[#allocation14_spill] sm:$0xff] %v3483_v58 }
  0xca   : > { %989 = vperm.xlu0 %3202, %v915_v59   ;;  %v3494_v62 = vpop.permute.xlu2 %560  ;;  %979 = vperm.xlu2 %3197, %v913_v60   ;;  %v3496_v63 = vpop.permute.xlu1 %520  ;;  %v907_v59 = vld [vmem:[%s4770_s2 + $0x20] sm:$0xff] }
  0xcb   : > { %4814 = vst [vmem:[#allocation15_spill] sm:$0xff] %v3496_v63  ;;  %994 = vperm.xlu1 %3196, %v916_v61   ;;  %v3498_v0 = vpop.permute.xlu0 %734  ;;  %v306_v60 = vld [vmem:[%s246_s15] sm:$0xf] }
  0xcc   : > { %4815 = vst [vmem:[#allocation16_spill] sm:$0xff] %v3498_v0 }
  0xd2   : > { %974 = vperm.xlu0 %3202, %v912_v1   ;;  %v3509_v5 = vpop.permute.xlu2 %572  ;;  %969 = vperm.xlu2 %3197, %v911_v2   ;;  %v3511_v6 = vpop.permute.xlu1 %532  ;;  %v307_v2 = vunpack.c.l.bf16 %v306_v60 }
  0xd3   : > { %4816 = vst [vmem:[#allocation17_spill] sm:$0xff] %v3509_v5  ;;  %984 = vperm.xlu1 %3196, %v914_v3   ;;  %v3513_v7 = vpop.permute.xlu0 %746  ;;  %v1216_v3 = vld [vmem:[%s4772_s4 + $0x8] sm:$0xff] }
  0xd4   : > { %v801_v60 = vperm.slane %v307_v2, 2  ;;  %v802_v46 = vperm.slane %v307_v2, 6 }
  0xda   : > { %959 = vperm.xlu0 %3202, %v909_v8   ;;  %v3518_v9 = vpop.permute.xlu2 %584  ;;  %3199 = vset.pattern.permute.xlu2 %v4779_v20  ;;  %v3521_v10 = vpop.permute.xlu1 %544  ;;  %v453_v8 = vperm.slane %v307_v2, 0 }
  0xdb   : > { %4817 = vst [vmem:[#allocation18_spill] sm:$0xff] %v3518_v9  ;;  %3198 = vset.pattern.permute.xlu1 %v4779_v20  ;;  %v3524_v11 = vpop.permute.xlu0 %758  ;;  %798 = vperm.xlu2 %3199, %v3370_v17   ;;  %v922_v17 = vld [vmem:[%s4770_s2 + $0x98] sm:$0xff] }
  0xdc   : > { %794 = vperm.xlu1 %3198, %v3375_v18  }
  0xe2   : > { %1034 = vperm.xlu0 %3202, %v924_v12   ;;  %v3531_v14 = vpop.permute.xlu2 %596  ;;  %v3533_v19 = vpop.permute.xlu1 %556  ;;  %v454_v12 = vperm.slane %v307_v2, 4 }
  0xe3   : > { %4818 = vst [vmem:[#allocation19_spill] sm:$0xff] %v3531_v14  ;;  %v3538_v22 = vpop.permute.xlu0 %770  ;;  %786 = vperm.xlu2 %3199, %v3357_v15   ;;  %v925_v15 = vld [vmem:[%s4770_s2 + $0xb0] sm:$0xff] }
  0xe4   : > { %4819 = vst [vmem:[#allocation20_spill] sm:$0xff] %v3538_v22  ;;  %3200 = vset.pattern.permute.xlu1 %v4774_v4 }
  0xe5   : > { %964 = vperm.xlu1 %3200, %v910_v21  }
  0xea   : > { %1024 = vperm.xlu0 %3202, %v922_v17   ;;  %v3549_v18 = vpop.permute.xlu1 %568  ;;  %v923_v17 = vld [vmem:[%s4770_s2 + $0xa0] sm:$0xff] }
  0xeb   : > { %v3557_v26 = vpop.permute.xlu0 %790  ;;  %v3559_v27 = vpop.permute.xlu2 %710  ;;  %3201 = vset.pattern.permute.xlu2 %v4774_v4 }
  0xec   : > { %4820 = vst [vmem:[#allocation21_spill] sm:$0xff] %v3557_v26  ;;  %1044 = vperm.xlu2 %3201, %v926_v24  }
  0xed   : > { %4821 = vst [vmem:[#allocation22_spill] sm:$0xff] %v3559_v27  ;;  %1039 = vperm.xlu1 %3200, %v925_v15   ;;  %v603_v15 = vperm.slane %v307_v2, 1 }
  0xef   : > { %v3598_v22 = vperm.slane %v603_v15, 1  ;;  %v906_v15 = vld [vmem:[%s4770_s2 + $0x18] sm:$0xff] }
  0xf1   : > { %v639_v34 = vmul.f32 %v3598_v22, %v3549_v18 }
  0xf2   : > { %1009 = vperm.xlu0 %3202, %v919_v29   ;;  %v3569_v54 = vpop.permute.xlu1 %580  ;;  %v604_v29 = vperm.slane %v307_v2, 5 }
  0xf3   : > { %v3577_v61 = vpop.permute.xlu0 %778  ;;  %v3579_v1 = vpop.permute.xlu2 %722 }
  0xf4   : > { %4822 = vst [vmem:[#allocation23_spill] sm:$0xff] %v3579_v1  ;;  %954 = vperm.xlu2 %3201, %v908_v55   ;;  %v3590_v55 = vperm.slane %v453_v8, 0  ;;  %v3600_v45 = vperm.slane %v604_v29, 1  ;;  %v609_v8 = vmul.f32 %v3598_v22, %v3415_v32 }
  0xf5   : > { %949 = vperm.xlu1 %3200, %v907_v59   ;;  %v3592_v59 = vperm.slane %v454_v12, 0  ;;  %v3608_v12 = vperm.slane %v801_v60, 2 }
  0xf6   : > { %v610_v2 = vmul.f32 %v3600_v45, %v3415_v32  ;;  %v905_v32 = vld [vmem:[%s4770_s2 + $0x10] sm:$0xff]  ;;  %v475_v47 = vmul.f32 %v3590_v55, %v3405_v28  ;;  %v481_v63 = vmul.f32 %v3590_v55, %v3411_v30  ;;  %v640_v48 = vmul.f32 %v3600_v45, %v3549_v18 }
  0xf7   : > { %v488_v31 = vmul.f32 %v3592_v59, %v3418_v33  ;;  %v3727_v9 = vmul.f32 %v3600_v45, %v3433_v38  ;;  %v479_v0 = vmul.f32 %v3590_v55, %v3437_v40  ;;  %v3763_v52 = vmul.f32 %v3592_v59, %v3437_v40 }
  0xf8   : > { %v485_v40 = vmul.f32 %v3590_v55, %v3445_v43 }
  0xfa   : > { %1270 = vperm.xlu0 %3202, %v1216_v3   ;;  %v3584_v21 = vpop.permute.xlu1 %592  ;;  %v1219_v3 = vld [vmem:[%s4772_s4 + $0x20] sm:$0xff] }
  0xfb   : > { %4823 = vst [vmem:[#allocation24_spill] sm:$0xff] %v3584_v21  ;;  %v731_v24 = vpop.permute.xlu2 %730 }
  0xfc   : > { %v335_v4 = vpop.permute.xlu0 %334  ;;  %1029 = vperm.xlu2 %3201, %v923_v17  }
  0xfd   : > { %3203 = vset.pattern.permute.xlu1 %v4779_v20  ;;  %v459_v17 = vmul.f32 %v3590_v55, %v335_v4  ;;  %v460_v20 = vmul.f32 %v3592_v59, %v335_v4 }
  0xfe   : > { %782 = vperm.xlu1 %3203, %v3362_v16   ;;  %v3610_v16 = vperm.slane %v802_v46, 2  ;;  %v4825_v46 = vmov 0  }
  0xff   : > { %v657_v5 = vadd.f32 %v609_v8, %v459_v17  ;;  %v658_v4 = vadd.f32 %v610_v2, %v460_v20  ;;  %v1222_v20 = vld [vmem:[%s4772_s4 + $0x38] sm:$0xff]  ;;  %v819_v2 = vmul.f32 %v3608_v12, %v731_v24 }
 0x102   : > { %1285 = vperm.xlu0 %3202, %v1219_v3  }
 0x103   : > { %v3615_v29 = vpop.permute.xlu2 %742  ;;  %v707_v36 = vpop.permute.xlu1 %706 }
 0x104   : > { %v807_v27 = vmul.f32 %v3608_v12, %v707_v36  ;;  %v808_v57 = vmul.f32 %v3610_v16, %v707_v36  ;;  %v3619_v58 = vpop.permute.xlu0 %339  ;;  %944 = vperm.xlu2 %3201, %v906_v15   ;;  %v921_v36 = vld [vmem:[%s4770_s2 + $0x90] sm:$0xff]  ;;  %v820_v15 = vmul.f32 %v3610_v16, %v731_v24  ;;  %v904_v24 = vld [vmem:[%s4770_s2 + $0x8] sm:$0xff] }
 0x105   : > { %4824 = vst [vmem:[#allocation25_spill] sm:$0xff] %v3619_v58  ;;  %v1225_v58 = vld [vmem:[%s4772_s4 + $0x50] sm:$0xff] }
 0x106   : > { %3204 = vset.pattern.permute.xlu1 %v4825_v46  ;;  %v3625_v60 = vadd.f32 %v807_v27, %v657_v5  ;;  %v3627_v3 = vadd.f32 %v808_v57, %v658_v4  ;;  %v621_v5 = vmul.f32 %v3598_v22, %v3511_v6  ;;  %v622_v57 = vmul.f32 %v3600_v45, %v3511_v6 }
 0x107   : > { %939 = vperm.xlu1 %3204, %v905_v32  }
 0x108   : > { %4826 = vst [vmem:[#allocation26_spill] sm:$0xff] %v3625_v60  ;;  %v4829_v60 = vmov 2  }
 0x109   : > { %4827 = vst [vmem:[#allocation27_spill] sm:$0xff] %v3627_v3 }
 0x10a   : > { %1300 = vperm.xlu0 %3202, %v1222_v20  }
 0x10b   : > { %v3635_v17 = vpop.permute.xlu2 %754  ;;  %v3637_v8 = vpop.permute.xlu1 %718 }
 0x10c   : > { %4828 = vst [vmem:[#allocation28_spill] sm:$0xff] %v3637_v8  ;;  %v365_v27 = vpop.permute.xlu0 %364  ;;  %1019 = vperm.xlu2 %3201, %v921_v36  }
 0x10d   : > { %v471_v4 = vmul.f32 %v3590_v55, %v365_v27  ;;  %v472_v32 = vmul.f32 %v3592_v59, %v365_v27 }
 0x10f   : > { %v669_v20 = vadd.f32 %v621_v5, %v471_v4  ;;  %v670_v3 = vadd.f32 %v622_v57, %v472_v32  ;;  %3205 = vset.pattern.permute.xlu1 %v4829_v60  ;;  %v903_v60 = vld [vmem:[%s4770_s2] sm:$0xff]  ;;  %v1218_v4 = vld [vmem:[%s4772_s4 + $0x18] sm:$0xff] }
 0x110   : > { %774 = vperm.xlu1 %3205, %v3347_v13   ;;  %v1228_v13 = vld [vmem:[%s4772_s4 + $0x68] sm:$0xff] }
 0x111   : > { %v3652_v6 = vadd.f32 %v819_v2, %v669_v20  ;;  %v3654_v8 = vadd.f32 %v820_v15, %v670_v3  ;;  %v920_v15 = vld [vmem:[%s4770_s2 + $0x88] sm:$0xff] }
 0x112   : > { %1315 = vperm.xlu0 %3202, %v1225_v58   ;;  %v1215_v58 = vld [vmem:[%s4772_s4] sm:$0xff] }
 0x113   : > { %4830 = vst [vmem:[#allocation29_spill] sm:$0xff] %v3652_v6  ;;  %v767_v36 = vpop.permute.xlu2 %766  ;;  %v3659_v5 = vpop.permute.xlu1 %726 }
 0x114   : > { %4831 = vst [vmem:[#allocation30_spill] sm:$0xff] %v3654_v8  ;;  %v3661_v57 = vpop.permute.xlu0 %379  ;;  %934 = vperm.xlu2 %3201, %v904_v24   ;;  %v645_v8 = vmul.f32 %v3598_v22, %v3569_v54 }
 0x115   : > { %4832 = vst [vmem:[#allocation31_spill] sm:$0xff] %v3659_v5  ;;  %v631_v5 = vmul.f32 %v3598_v22, %v3441_v41 }
 0x118   : > { %3206 = vset.pattern.permute.xlu1 %v4825_v46  ;;  %v1231_v46 = vld [vmem:[%s4772_s4 + $0x80] sm:$0xff] }
 0x119   : > { %929 = vperm.xlu1 %3206, %v903_v60   ;;  %v1217_v60 = vld [vmem:[%s4772_s4 + $0x10] sm:$0xff] }
 0x11a   : > { %1330 = vperm.xlu0 %3202, %v1228_v13   ;;  %v1234_v13 = vld [vmem:[%s4772_s4 + $0x98] sm:$0xff] }
 0x11b   : > { %v3673_v3 = vpop.permute.xlu1 %738 }
 0x11c   : > { %v3675_v27 = vpop.permute.xlu0 %394  ;;  %v3677_v2 = vpop.permute.xlu2 %1004  ;;  %1265 = vperm.xlu2 %3201, %v1215_v58   ;;  %v625_v58 = vmul.f32 %v3598_v22, %v3433_v38 }
 0x121   : > { %1014 = vperm.xlu1 %3206, %v920_v15  }
 0x122   : > { %1345 = vperm.xlu0 %3202, %v1231_v46  }
 0x123   : > { %v3688_v32 = vpop.permute.xlu1 %750 }
 0x124   : > { %v410_v20 = vpop.permute.xlu0 %409  ;;  %v3690_v24 = vpop.permute.xlu2 %979  ;;  %1280 = vperm.xlu2 %3201, %v1218_v4   ;;  %v3706_v4 = vmul.f32 %v3592_v59, %v3405_v28  ;;  %v487_v28 = vmul.f32 %v3590_v55, %v3418_v33  ;;  %v646_v33 = vmul.f32 %v3600_v45, %v3569_v54  ;;  %v843_v54 = vmul.f32 %v3608_v12, %v3577_v61 }
 0x125   : > { %v489_v15 = vmul.f32 %v3590_v55, %v410_v20  ;;  %v490_v46 = vmul.f32 %v3592_v59, %v410_v20  ;;  %v1221_v20 = vld [vmem:[%s4772_s4 + $0x30] sm:$0xff] }
 0x127   : > { %v687_v1 = vadd.f32 %v639_v34, %v489_v15  ;;  %v688_v26 = vadd.f32 %v640_v48, %v490_v46  ;;  %v638_v34 = vmul.f32 %v3600_v45, %v3448_v44  ;;  %v837_v48 = vmul.f32 %v3608_v12, %v767_v36  ;;  %v1220_v15 = vld [vmem:[%s4772_s4 + $0x28] sm:$0xff] }
 0x128   : > { %v844_v46 = vmul.f32 %v3610_v16, %v3577_v61 }
 0x129   : > { %1275 = vperm.xlu1 %3206, %v1217_v60   ;;  %v3719_v60 = vmul.f32 %v3592_v59, %v3411_v30  ;;  %v885_v14 = vadd.f32 %v837_v48, %v687_v1  ;;  %v483_v48 = vmul.f32 %v3590_v55, %v3675_v27 }
 0x12a   : > { %1360 = vperm.xlu0 %3202, %v1234_v13   ;;  %v3729_v13 = vadd.f32 %v625_v58, %v475_v47  ;;  %v637_v47 = vmul.f32 %v3598_v22, %v3448_v44  ;;  %v838_v58 = vmul.f32 %v3610_v16, %v767_v36  ;;  %v1237_v44 = vld [vmem:[%s4772_s4 + $0xb0] sm:$0xff] }
 0x12b   : > { %v763_v18 = vpop.permute.xlu1 %762 }
 0x12c   : > { %v425_v30 = vpop.permute.xlu0 %424  ;;  %v3733_v21 = vpop.permute.xlu2 %969  ;;  %1295 = vperm.xlu2 %3201, %v1221_v20   ;;  %v835_v51 = vmul.f32 %v3608_v12, %v763_v18  ;;  %v836_v36 = vmul.f32 %v3610_v16, %v763_v18  ;;  %v886_v50 = vadd.f32 %v838_v58, %v688_v26  ;;  %v685_v1 = vadd.f32 %v637_v47, %v487_v28  ;;  %v1224_v18 = vld [vmem:[%s4772_s4 + $0x48] sm:$0xff] }
 0x12d   : > { %v495_v38 = vmul.f32 %v3590_v55, %v425_v30  ;;  %v496_v6 = vmul.f32 %v3592_v59, %v425_v30  ;;  %v686_v26 = vadd.f32 %v638_v34, %v488_v31  ;;  %v1077_v28 = vadd.f32 %v3677_v2, %v885_v14 }
 0x12e   : > { %v883_v31 = vadd.f32 %v835_v51, %v685_v1  ;;  %v1078_v47 = vadd.f32 %v3677_v2, %v886_v50  ;;  %v629_v34 = vmul.f32 %v3598_v22, %v3479_v56  ;;  %v633_v58 = vmul.f32 %v3598_v22, %v3533_v19 }
 0x12f   : > { %v693_v20 = vadd.f32 %v645_v8, %v495_v38  ;;  %v694_v30 = vadd.f32 %v646_v33, %v496_v6  ;;  %v3771_v6 = vmul.f32 %v3600_v45, %v3441_v41  ;;  %v3773_v33 = vadd.f32 %v631_v5, %v481_v63 }
 0x130   : > { %v486_v38 = vmul.f32 %v3592_v59, %v3445_v43  ;;  %v484_v41 = vmul.f32 %v3592_v59, %v3675_v27  ;;  %v884_v5 = vadd.f32 %v836_v36, %v686_v26  ;;  %v635_v43 = vmul.f32 %v3598_v22, %v3494_v62 }
 0x131   : > { %1290 = vperm.xlu1 %3206, %v1220_v15   ;;  %v3765_v61 = vadd.f32 %v843_v54, %v693_v20  ;;  %v3767_v8 = vadd.f32 %v844_v46, %v694_v30  ;;  %v634_v27 = vmul.f32 %v3600_v45, %v3533_v19  ;;  %v630_v51 = vmul.f32 %v3600_v45, %v3479_v56  ;;  %v1223_v46 = vld [vmem:[%s4772_s4 + $0x40] sm:$0xff]  ;;  %v1240_v56 = vld [vmem:[%s4772_s4 + $0xc8] sm:$0xff] }
 0x132   : > { %1375 = vperm.xlu0 %3202, %v1237_v44   ;;  %v636_v50 = vmul.f32 %v3600_v45, %v3494_v62  ;;  %v833_v20 = vmul.f32 %v3608_v12, %v3524_v11  ;;  %v834_v19 = vmul.f32 %v3610_v16, %v3524_v11  ;;  %v681_v30 = vadd.f32 %v633_v58, %v483_v48 }
 0x133   : > { %v682_v44 = vadd.f32 %v634_v27, %v484_v41  ;;  %v1125_v36 = vmax.f32 %v1077_v28, 0.0  ;;  %v1126_v26 = vmax.f32 %v1078_v47, 0.0  ;;  %v827_v48 = vmul.f32 %v3608_v12, %v3513_v7  ;;  %v1227_v28 = vld [vmem:[%s4772_s4 + $0x60] sm:$0xff] }
 0x134   : > { %v3786_v63 = vpop.permute.xlu0 %439  ;;  %1310 = vperm.xlu2 %3201, %v1224_v18   ;;  %v677_v18 = vadd.f32 %v629_v34, %v479_v0  ;;  %v684_v11 = vadd.f32 %v636_v50, %v486_v38  ;;  %v477_v0 = vmul.f32 %v3590_v55, %v3661_v57  ;;  %v828_v38 = vmul.f32 %v3610_v16, %v3513_v7 }
 0x135   : > { %v1000_v15 = vpop.permute.xlu1 %999  ;;  %v3802_v54 = vpop.permute.xlu2 %798  ;;  %v627_v50 = vmul.f32 %v3598_v22, %v3521_v10 }
 0x136   : > { %v1075_v14 = vadd.f32 %v1000_v15, %v883_v31  ;;  %v1076_v2 = vadd.f32 %v1000_v15, %v884_v5  ;;  %v683_v31 = vadd.f32 %v635_v43, %v485_v40  ;;  %v831_v5 = vmul.f32 %v3608_v12, %v3635_v17 }
 0x137   : > { %v832_v15 = vmul.f32 %v3610_v16, %v3635_v17  ;;  %v478_v40 = vmul.f32 %v3592_v59, %v3661_v57  ;;  %v882_v27 = vadd.f32 %v834_v19, %v684_v11  ;;  %v675_v19 = vadd.f32 %v627_v50, %v477_v0  ;;  %v1230_v0 = vld [vmem:[%s4772_s4 + $0x78] sm:$0xff] }
 0x138   : > { %v1123_v62 = vmax.f32 %v1075_v14, 0.0  ;;  %v1124_v1 = vmax.f32 %v1076_v2, 0.0  ;;  %v879_v47 = vadd.f32 %v831_v5, %v681_v30  ;;  %v881_v43 = vadd.f32 %v833_v20, %v683_v31  ;;  %v1226_v20 = vld [vmem:[%s4772_s4 + $0x58] sm:$0xff] }
 0x139   : > { %1305 = vperm.xlu1 %3206, %v1223_v46   ;;  %v880_v17 = vadd.f32 %v832_v15, %v682_v44  ;;  %v628_v14 = vmul.f32 %v3600_v45, %v3521_v10  ;;  %v678_v30 = vadd.f32 %v630_v51, %v3763_v52  ;;  %v875_v44 = vadd.f32 %v827_v48, %v677_v18  ;;  %v1243_v10 = vld [vmem:[%s4772_s4 + $0xe0] sm:$0xff] }
 0x13a   : > { %1390 = vperm.xlu0 %3202, %v1240_v56   ;;  %v1205_v41 = vpack.c.bf16 %v1125_v36, %v1123_v62  ;;  %v1206_v58 = vpack.c.bf16 %v1126_v26, %v1124_v1  ;;  %v829_v52 = vmul.f32 %v3608_v12, %v3688_v32  ;;  %v830_v51 = vmul.f32 %v3610_v16, %v3688_v32 }
 0x13b   : > { %v676_v36 = vadd.f32 %v628_v14, %v478_v40  ;;  %v825_v5 = vmul.f32 %v3608_v12, %v3615_v29  ;;  %v823_v15 = vmul.f32 %v3608_v12, %v3673_v3  ;;  %v824_v11 = vmul.f32 %v3610_v16, %v3673_v3 }
 0x13c   : > { %v990_v34 = vpop.permute.xlu0 %989  ;;  %1792 = vmatpush.bf16.msra.mxu0 %v1205_v41  ;;  %2050 = vmatpush.bf16.msra.mxu2 %v1206_v58  ;;  %v876_v48 = vadd.f32 %v828_v38, %v678_v30  ;;  %v680_v41 = vadd.f32 %v3771_v6, %v3719_v60  ;;  %v826_v58 = vmul.f32 %v3610_v16, %v3615_v29 }
 0x13d   : > { %v1071_v2 = vadd.f32 %v990_v34, %v879_v47  ;;  %v1072_v46 = vadd.f32 %v990_v34, %v880_v17  ;;  %1325 = vperm.xlu2 %3201, %v1227_v28   ;;  %v995_v57 = vpop.permute.xlu1 %994  ;;  %v3834_v62 = vpop.permute.xlu2 %786  ;;  %v674_v40 = vadd.f32 %v3727_v9, %v3706_v4  ;;  %v1067_v3 = vadd.f32 %v3690_v24, %v875_v44 }
 0x13e   : > { %v1073_v56 = vadd.f32 %v995_v57, %v881_v43  ;;  %v1074_v7 = vadd.f32 %v995_v57, %v882_v27  ;;  %v1068_v47 = vadd.f32 %v3690_v24, %v876_v48  ;;  %v873_v17 = vadd.f32 %v825_v5, %v675_v19  ;;  %v1229_v24 = vld [vmem:[%s4772_s4 + $0x70] sm:$0xff] }
 0x13f   : > { %v1119_v1 = vmax.f32 %v1071_v2, 0.0  ;;  %v1120_v26 = vmax.f32 %v1072_v46, 0.0  ;;  %v874_v60 = vadd.f32 %v826_v58, %v676_v36  ;;  %v877_v29 = vadd.f32 %v829_v52, %v3773_v33  ;;  %v1246_v33 = vld [vmem:[%s4772_s4 + $0xf8] sm:$0xff] }
 0x140   : > { %v1121_v18 = vmax.f32 %v1073_v56, 0.0  ;;  %v1122_v31 = vmax.f32 %v1074_v7, 0.0  ;;  %v878_v6 = vadd.f32 %v830_v51, %v680_v41  ;;  %v871_v34 = vadd.f32 %v823_v15, %v3729_v13 }
 0x141   : > { %1320 = vperm.xlu1 %3206, %v1226_v20   ;;  %v872_v43 = vadd.f32 %v824_v11, %v674_v40  ;;  %v1115_v2 = vmax.f32 %v1067_v3, 0.0  ;;  %v1116_v46 = vmax.f32 %v1068_v47, 0.0  ;;  %v469_v7 = vmul.f32 %v3590_v55, %v3397_v25 }
 0x142   : > { %1405 = vperm.xlu0 %3202, %v1243_v10   ;;  %v1203_v32 = vpack.c.bf16 %v1121_v18, %v1119_v1  ;;  %v1204_v28 = vpack.c.bf16 %v1122_v31, %v1120_v26  ;;  %v1063_v57 = vadd.f32 %v3733_v21, %v871_v34  ;;  %v619_v20 = vmul.f32 %v3598_v22, %v3423_v35 }
 0x143   : > { %v1064_v13 = vadd.f32 %v3733_v21, %v872_v43  ;;  %v1233_v21 = vld [vmem:[%s4772_s4 + $0x90] sm:$0xff]  ;;  %v470_v10 = vmul.f32 %v3592_v59, %v3397_v25  ;;  %v620_v52 = vmul.f32 %v3600_v45, %v3423_v35  ;;  %v3888_v31 = vmul.f32 %v3590_v55, %v3392_v23  ;;  %v1232_v35 = vld [vmem:[%s4772_s4 + $0x88] sm:$0xff] }
 0x144   : > { %v975_v38 = vpop.permute.xlu0 %974  ;;  %1793 = vmatpush.bf16.msra.mxu0 %v1203_v32  ;;  %2051 = vmatpush.bf16.msra.mxu2 %v1204_v28  ;;  %v1111_v51 = vmax.f32 %v1063_v57, 0.0  ;;  %v3892_v5 = vmul.f32 %v3592_v59, %v3392_v23  ;;  %v3894_v15 = vadd.f32 %v619_v20, %v469_v7  ;;  %v473_v58 = vmul.f32 %v3590_v55, %v3430_v37  ;;  %v1249_v28 = vld [vmem:[%s4772_s4 + $0x110] sm:$0xff] }
 0x145   : > { %1340 = vperm.xlu2 %3201, %v1230_v0   ;;  %v985_v27 = vpop.permute.xlu1 %984  ;;  %v1065_v50 = vadd.f32 %v975_v38, %v873_v17  ;;  %v1066_v14 = vadd.f32 %v975_v38, %v874_v60  ;;  %v1112_v18 = vmax.f32 %v1064_v13, 0.0  ;;  %v3899_v41 = vadd.f32 %v620_v52, %v470_v10  ;;  %v4833_v38 = vld [vmem:[#allocation12_spill] sm:$0xff]  ;;  %v4837_v13 = vld [vmem:[#allocation11_spill] sm:$0xff]  ;;  %v4838_v7 = vld [vmem:[#allocation29_spill] sm:$0xff] }
 0x146   : > { %v1069_v9 = vadd.f32 %v985_v27, %v877_v29  ;;  %v1070_v4 = vadd.f32 %v985_v27, %v878_v6  ;;  %v3873_v56 = vpop.permute.xlu2 %1044  ;;  %v474_v32 = vmul.f32 %v3592_v59, %v3430_v37  ;;  %v649_v23 = vmul.f32 %v3598_v22, %v3460_v49  ;;  %v4834_v29 = vld [vmem:[#allocation16_spill] sm:$0xff]  ;;  %v4835_v27 = vld [vmem:[#allocation10_spill] sm:$0xff]  ;;  %v1235_v52 = vld [vmem:[%s4772_s4 + $0xa0] sm:$0xff] }
 0x147   : > { %v1113_v19 = vmax.f32 %v1065_v50, 0.0  ;;  %v1114_v36 = vmax.f32 %v1066_v14, 0.0  ;;  %v650_v0 = vmul.f32 %v3600_v45, %v3460_v49  ;;  %v623_v40 = vmul.f32 %v3598_v22, %v3469_v53 }
 0x148   : > { %v1117_v30 = vmax.f32 %v1069_v9, 0.0  ;;  %v1118_v44 = vmax.f32 %v1070_v4, 0.0  ;;  %v624_v3 = vmul.f32 %v3600_v45, %v3469_v53  ;;  %v499_v37 = vmul.f32 %v3590_v55, %v3435_v39  ;;  %v4836_v9 = vld [vmem:[#allocation19_spill] sm:$0xff] }
 0x149   : > { %1335 = vperm.xlu1 %3206, %v1229_v24   ;;  %v1199_v25 = vpack.c.bf16 %v1113_v19, %v1111_v51  ;;  %v1200_v48 = vpack.c.bf16 %v1114_v36, %v1112_v18  ;;  %v500_v47 = vmul.f32 %v3592_v59, %v3435_v39  ;;  %v505_v17 = vmul.f32 %v3590_v55, %v3443_v42  ;;  %v4839_v19 = vld [vmem:[#allocation30_spill] sm:$0xff] }
 0x14a   : > { %1420 = vperm.xlu0 %3202, %v1246_v33   ;;  %v1201_v1 = vpack.c.bf16 %v1117_v30, %v1115_v2  ;;  %v1202_v26 = vpack.c.bf16 %v1118_v44, %v1116_v46  ;;  %v506_v49 = vmul.f32 %v3592_v59, %v3443_v42  ;;  %v655_v60 = vmul.f32 %v3598_v22, %v4833_v38  ;;  %v1236_v42 = vld [vmem:[%s4772_s4 + $0xa8] sm:$0xff] }
 0x14b   : > { %v656_v53 = vmul.f32 %v3600_v45, %v4833_v38  ;;  %v821_v6 = vmul.f32 %v3608_v12, %v4834_v29  ;;  %v822_v34 = vmul.f32 %v3610_v16, %v4834_v29  ;;  %v3939_v50 = vmul.f32 %v3598_v22, %v4835_v27  ;;  %v4841_v29 = vld [vmem:[#allocation21_spill] sm:$0xff] }
 0x14c   : > { %1794 = vmatpush.bf16.msra.mxu0 %v1201_v1  ;;  %2052 = vmatpush.bf16.msra.mxu2 %v1202_v26  ;;  %v960_v39 = vpop.permute.xlu0 %959  ;;  %v3943_v14 = vmul.f32 %v3600_v45, %v4835_v27  ;;  %v653_v4 = vmul.f32 %v3598_v22, %v4836_v9  ;;  %v654_v24 = vmul.f32 %v3600_v45, %v4836_v9 }
 0x14d   : > { %1355 = vperm.xlu2 %3201, %v1233_v21   ;;  %v697_v2 = vadd.f32 %v649_v23, %v499_v37  ;;  %v698_v46 = vadd.f32 %v650_v0, %v500_v47  ;;  %v671_v33 = vadd.f32 %v623_v40, %v473_v58  ;;  %v672_v57 = vadd.f32 %v624_v3, %v474_v32  ;;  %v1252_v32 = vld [vmem:[%s4772_s4 + $0x128] sm:$0xff] }
 0x14e   : > { %v795_v11 = vpop.permute.xlu1 %794  ;;  %v3932_v43 = vpop.permute.xlu2 %954  ;;  %v503_v30 = vmul.f32 %v3590_v55, %v4837_v13  ;;  %v504_v44 = vmul.f32 %v3592_v59, %v4837_v13  ;;  %v1059_v20 = vadd.f32 %v960_v39, %v4838_v7  ;;  %v1060_v36 = vadd.f32 %v960_v39, %v4839_v19  ;;  %v1238_v7 = vld [vmem:[%s4772_s4 + $0xb8] sm:$0xff] }
 0x14f   : > { %v703_v1 = vadd.f32 %v655_v60, %v505_v17  ;;  %v704_v26 = vadd.f32 %v656_v53, %v506_v49  ;;  %v869_v21 = vadd.f32 %v821_v6, %v671_v33  ;;  %v870_v10 = vadd.f32 %v822_v34, %v672_v57 }
 0x150   : > { %1795 = vmatpush.bf16.msra.mxu0 %v1199_v25  ;;  %2053 = vmatpush.bf16.msra.mxu2 %v1200_v48  ;;  %v701_v51 = vadd.f32 %v653_v4, %v503_v30  ;;  %v702_v18 = vadd.f32 %v654_v24, %v504_v44  ;;  %v4840_v25 = vld [vmem:[#allocation24_spill] sm:$0xff]  ;;  %v501_v23 = vmul.f32 %v3590_v55, %v3786_v63  ;;  %v1107_v47 = vmax.f32 %v1059_v20, 0.0  ;;  %v4842_v20 = vld [vmem:[#allocation23_spill] sm:$0xff] }
 0x151   : > { %1350 = vperm.xlu1 %3206, %v1232_v35   ;;  %v651_v48 = vmul.f32 %v3598_v22, %v4840_v25  ;;  %v853_v35 = vmul.f32 %v3608_v12, %v3802_v54  ;;  %v502_v3 = vmul.f32 %v3592_v59, %v3786_v63  ;;  %v847_v37 = vmul.f32 %v3608_v12, %v3834_v62 }
 0x152   : > { %1435 = vperm.xlu0 %3202, %v1249_v28   ;;  %v854_v28 = vmul.f32 %v3610_v16, %v3802_v54  ;;  %v1108_v17 = vmax.f32 %v1060_v36, 0.0  ;;  %v851_v49 = vmul.f32 %v3608_v12, %v795_v11  ;;  %v852_v38 = vmul.f32 %v3610_v16, %v795_v11  ;;  %v1239_v54 = vld [vmem:[%s4772_s4 + $0xc0] sm:$0xff] }
 0x153   : > { %v849_v63 = vmul.f32 %v3608_v12, %v4841_v29  ;;  %v652_v6 = vmul.f32 %v3600_v45, %v4840_v25  ;;  %v848_v34 = vmul.f32 %v3610_v16, %v3834_v62  ;;  %v901_v39 = vadd.f32 %v853_v35, %v703_v1  ;;  %v4843_v36 = vld [vmem:[#allocation31_spill] sm:$0xff] }
 0x154   : > { %v902_v27 = vadd.f32 %v854_v28, %v704_v26  ;;  %v850_v24 = vmul.f32 %v3610_v16, %v4841_v29  ;;  %v895_v13 = vadd.f32 %v847_v37, %v697_v2  ;;  %v899_v44 = vadd.f32 %v851_v49, %v701_v51  ;;  %v1035_v26 = vpop.permute.xlu0 %1034 }
 0x155   : > { %1370 = vperm.xlu2 %3201, %v1236_v42   ;;  %v699_v42 = vadd.f32 %v651_v48, %v501_v23  ;;  %v700_v33 = vadd.f32 %v652_v6, %v502_v3  ;;  %v1093_v57 = vadd.f32 %v3873_v56, %v901_v39  ;;  %v900_v62 = vadd.f32 %v852_v38, %v702_v18 }
 0x156   : > { %v1030_v11 = vpop.permute.xlu2 %1029  ;;  %v1094_v30 = vadd.f32 %v3873_v56, %v902_v27  ;;  %v815_v19 = vmul.f32 %v3608_v12, %v4842_v20  ;;  %v817_v1 = vmul.f32 %v3608_v12, %v4843_v36  ;;  %v818_v2 = vmul.f32 %v3610_v16, %v4843_v36 }
 0x157   : > { %v965_v58 = vpop.permute.xlu1 %964  ;;  %v1087_v51 = vadd.f32 %v1030_v11, %v895_v13  ;;  %v816_v48 = vmul.f32 %v3610_v16, %v4842_v20  ;;  %v898_v35 = vadd.f32 %v850_v24, %v700_v33  ;;  %v665_v3 = vadd.f32 %v3939_v50, %v3888_v31  ;;  %v1245_v33 = vld [vmem:[%s4772_s4 + $0xf0] sm:$0xff]  ;;  %v4845_v20 = vld [vmem:[#allocation3_spill] sm:$0xff] }
 0x158   : > { %v1061_v0 = vadd.f32 %v965_v58, %v869_v21  ;;  %v1062_v40 = vadd.f32 %v965_v58, %v870_v10  ;;  %v896_v21 = vadd.f32 %v848_v34, %v698_v46  ;;  %v1255_v10 = vld [vmem:[%s4772_s4 + $0x140] sm:$0xff]  ;;  %v1242_v46 = vld [vmem:[%s4772_s4 + $0xd8] sm:$0xff]  ;;  %v666_v37 = vadd.f32 %v3943_v14, %v3892_v5 }
 0x159   : > { %1365 = vperm.xlu1 %3206, %v1235_v52   ;;  %v897_v52 = vadd.f32 %v849_v63, %v699_v42  ;;  %v866_v49 = vadd.f32 %v818_v2, %v3899_v41  ;;  %v1135_v38 = vmax.f32 %v1087_v51, 0.0  ;;  %v863_v29 = vadd.f32 %v815_v19, %v665_v3  ;;  %v1258_v14 = vld [vmem:[%s4772_s4 + $0x158] sm:$0xff]  ;;  %v4848_v51 = vld [vmem:[#allocation15_spill] sm:$0xff]  ;;  %v4850_v3 = vld [vmem:[#allocation28_spill] sm:$0xff] }
 0x15a   : > { %v1109_v60 = vmax.f32 %v1061_v0, 0.0  ;;  %v1110_v53 = vmax.f32 %v1062_v40, 0.0  ;;  %1450 = vperm.xlu0 %3202, %v1252_v32   ;;  %v1088_v58 = vadd.f32 %v1030_v11, %v896_v21  ;;  %v1141_v32 = vmax.f32 %v1093_v57, 0.0  ;;  %v1261_v21 = vld [vmem:[%s4772_s4 + $0x170] sm:$0xff] }
 0x15b   : > { %v1089_v23 = vadd.f32 %v1035_v26, %v897_v52  ;;  %v1142_v40 = vmax.f32 %v1094_v30, 0.0  ;;  %v1058_v6 = vadd.f32 %v3932_v43, %v866_v49  ;;  %v864_v5 = vadd.f32 %v816_v48, %v666_v37  ;;  %v4844_v30 = vld [vmem:[#allocation18_spill] sm:$0xff] }
 0x15c   : > { %v1197_v9 = vpack.c.bf16 %v1109_v60, %v1107_v47  ;;  %v1198_v4 = vpack.c.bf16 %v1110_v53, %v1108_v17  ;;  %v865_v47 = vadd.f32 %v817_v1, %v3894_v15  ;;  %v1090_v17 = vadd.f32 %v1035_v26, %v898_v35  ;;  %v1241_v15 = vld [vmem:[%s4772_s4 + $0xd0] sm:$0xff] }
 0x15d   : > { %1385 = vperm.xlu2 %3201, %v1239_v54   ;;  %v1136_v54 = vmax.f32 %v1088_v58, 0.0  ;;  %v1137_v34 = vmax.f32 %v1089_v23, 0.0  ;;  %v463_v19 = vmul.f32 %v3590_v55, %v4845_v20  ;;  %v464_v36 = vmul.f32 %v3592_v59, %v4845_v20  ;;  %v4846_v1 = vld [vmem:[#allocation9_spill] sm:$0xff] }
 0x15e   : > { %1796 = vmatpush.bf16.msra.mxu0 %v1197_v9  ;;  %2054 = vmatpush.bf16.msra.mxu2 %v1198_v4  ;;  %v1057_v63 = vadd.f32 %v3932_v43, %v865_v47  ;;  %v4013_v31 = vpop.permute.xlu2 %944  ;;  %v1138_v41 = vmax.f32 %v1090_v17, 0.0  ;;  %v1106_v9 = vmax.f32 %v1058_v6, 0.0  ;;  %v497_v2 = vmul.f32 %v3590_v55, %v4846_v1  ;;  %v1248_v17 = vld [vmem:[%s4772_s4 + $0x108] sm:$0xff] }
 0x15f   : > { %v1040_v56 = vpop.permute.xlu1 %1039  ;;  %v1211_v27 = vpack.c.bf16 %v1137_v34, %v1135_v38  ;;  %v498_v26 = vmul.f32 %v3592_v59, %v4846_v1  ;;  %v813_v37 = vmul.f32 %v3608_v12, %v4850_v3  ;;  %v814_v47 = vmul.f32 %v3610_v16, %v4850_v3 }
 0x160   : > { %v1091_v18 = vadd.f32 %v1040_v56, %v899_v44  ;;  %v1092_v25 = vadd.f32 %v1040_v56, %v900_v62  ;;  %v1212_v43 = vpack.c.bf16 %v1138_v41, %v1136_v54  ;;  %v1105_v11 = vmax.f32 %v1057_v63, 0.0  ;;  %v4847_v56 = vld [vmem:[#allocation4_spill] sm:$0xff]  ;;  %v4851_v54 = vld [vmem:[#allocation14_spill] sm:$0xff] }
 0x161   : > { %1380 = vperm.xlu1 %3206, %v1238_v7   ;;  %v647_v44 = vmul.f32 %v3598_v22, %v4844_v30  ;;  %v648_v62 = vmul.f32 %v3600_v45, %v4844_v30  ;;  %v1244_v7 = vld [vmem:[%s4772_s4 + $0xe8] sm:$0xff]  ;;  %v466_v52 = vmul.f32 %v3592_v59, %v4847_v56  ;;  %v812_v63 = vmul.f32 %v3610_v16, %v4851_v54 }
 0x162   : > { %1465 = vperm.xlu0 %3202, %v1255_v10   ;;  %v1139_v28 = vmax.f32 %v1091_v18, 0.0  ;;  %v1140_v0 = vmax.f32 %v1092_v25, 0.0  ;;  %v465_v10 = vmul.f32 %v3590_v55, %v4847_v56  ;;  %v615_v18 = vmul.f32 %v3598_v22, %v4848_v51 }
 0x163   : > { %v616_v25 = vmul.f32 %v3600_v45, %v4848_v51  ;;  %v695_v58 = vadd.f32 %v647_v44, %v497_v2 }
 0x164   : > { %v1213_v60 = vpack.c.bf16 %v1141_v32, %v1139_v28  ;;  %v1214_v53 = vpack.c.bf16 %v1142_v40, %v1140_v0  ;;  %v696_v32 = vadd.f32 %v648_v62, %v498_v26  ;;  %v4849_v28 = vld [vmem:[#allocation8_spill] sm:$0xff]  ;;  %v663_v6 = vadd.f32 %v615_v18, %v465_v10  ;;  %v1250_v26 = vld [vmem:[%s4772_s4 + $0x118] sm:$0xff] }
 0x165   : > { %1400 = vperm.xlu2 %3201, %v1242_v46   ;;  %v613_v0 = vmul.f32 %v3598_v22, %v4849_v28  ;;  %v614_v40 = vmul.f32 %v3600_v45, %v4849_v28  ;;  %v664_v34 = vadd.f32 %v616_v25, %v466_v52  ;;  %v4853_v52 = vld [vmem:[#allocation13_spill] sm:$0xff] }
 0x166   : > { %1925 = vmatpush.bf16.msra.mxu1 %v1213_v60  ;;  %2183 = vmatpush.bf16.msra.mxu3 %v1214_v53  ;;  %v1020_v48 = vpop.permute.xlu2 %1019  ;;  %v611_v51 = vmul.f32 %v3598_v22, %v4853_v52  ;;  %v612_v18 = vmul.f32 %v3600_v45, %v4853_v52 }
 0x167   : > { %v950_v50 = vpop.permute.xlu1 %949  ;;  %v1083_v49 = vadd.f32 %v1020_v48, %v3765_v61  ;;  %v1084_v38 = vadd.f32 %v1020_v48, %v3767_v8  ;;  %v862_v61 = vadd.f32 %v814_v47, %v664_v34  ;;  %v1247_v8 = vld [vmem:[%s4772_s4 + $0x100] sm:$0xff]  ;;  %v1254_v48 = vld [vmem:[%s4772_s4 + $0x138] sm:$0xff] }
 0x168   : > { %v1055_v39 = vadd.f32 %v950_v50, %v863_v29  ;;  %v1056_v42 = vadd.f32 %v950_v50, %v864_v5  ;;  %v811_v29 = vmul.f32 %v3608_v12, %v4851_v54  ;;  %v1025_v5 = vpop.permute.xlu0 %1024  ;;  %v661_v50 = vadd.f32 %v613_v0, %v463_v19  ;;  %v1253_v0 = vld [vmem:[%s4772_s4 + $0x130] sm:$0xff] }
 0x169   : > { %1395 = vperm.xlu1 %3206, %v1241_v15  }
 0x16a   : > { %v1103_v4 = vmax.f32 %v1055_v39, 0.0  ;;  %v1104_v24 = vmax.f32 %v1056_v42, 0.0  ;;  %1480 = vperm.xlu0 %3202, %v1258_v14   ;;  %1926 = vmatpush.bf16.msra.mxu1 %v1211_v27  ;;  %v662_v14 = vadd.f32 %v614_v40, %v464_v36  ;;  %v861_v39 = vadd.f32 %v813_v37, %v663_v6  ;;  %v4855_v37 = vld [vmem:[#allocation17_spill] sm:$0xff] }
 0x16b   : > { %2184 = vmatpush.bf16.msra.mxu3 %v1212_v43  ;;  %v1131_v42 = vmax.f32 %v1083_v49, 0.0  ;;  %v1132_v27 = vmax.f32 %v1084_v38, 0.0  ;;  %v641_v47 = vmul.f32 %v3598_v22, %v4855_v37 }
 0x16c   : > { %v1195_v57 = vpack.c.bf16 %v1105_v11, %v1103_v4  ;;  %v1196_v13 = vpack.c.bf16 %v1106_v9, %v1104_v24  ;;  %v1053_v9 = vadd.f32 %v4013_v31, %v861_v39  ;;  %v1054_v4 = vadd.f32 %v4013_v31, %v862_v61 }
 0x16d   : > { %1415 = vperm.xlu2 %3201, %v1245_v33   ;;  %v859_v24 = vadd.f32 %v811_v29, %v661_v50  ;;  %v860_v33 = vadd.f32 %v812_v63, %v662_v14  ;;  %v1257_v29 = vld [vmem:[%s4772_s4 + $0x150] sm:$0xff]  ;;  %v4857_v63 = vld [vmem:[#allocation6_spill] sm:$0xff]  ;;  %v4859_v14 = vld [vmem:[#allocation7_spill] sm:$0xff] }
 0x16e   : > { %1797 = vmatpush.bf16.msra.mxu0 %v1195_v57  ;;  %2055 = vmatpush.bf16.msra.mxu2 %v1196_v13  ;;  %v1101_v20 = vmax.f32 %v1053_v9, 0.0  ;;  %v1102_v19 = vmax.f32 %v1054_v4, 0.0  ;;  %v935_v28 = vpop.permute.xlu2 %934  ;;  %v491_v6 = vmul.f32 %v3590_v55, %v4857_v63  ;;  %v492_v34 = vmul.f32 %v3592_v59, %v4857_v63  ;;  %v1256_v4 = vld [vmem:[%s4772_s4 + $0x148] sm:$0xff]  ;;  %v2895_v63 = vld [vmem:[%s4771_s3 + $0x30] sm:$0xf] }
 0x16f   : > { %v643_v39 = vmul.f32 %v3598_v22, %v4859_v14  ;;  %v644_v61 = vmul.f32 %v3600_v45, %v4859_v14  ;;  %v3121_v14 = vld [vmem:[%s4771_s3 + $0x44] sm:$0xf0] }
 0x170   : > { %v783_v35 = vpop.permute.xlu1 %782 }
 0x171   : > { %v845_v23 = vmul.f32 %v3608_v12, %v783_v35  ;;  %v846_v46 = vmul.f32 %v3610_v16, %v783_v35  ;;  %1410 = vperm.xlu1 %3206, %v1244_v7   ;;  %v1251_v7 = vld [vmem:[%s4772_s4 + $0x120] sm:$0xff]  ;;  %v4854_v35 = vld [vmem:[#allocation22_spill] sm:$0xff] }
 0x172   : > { %1495 = vperm.xlu0 %3202, %v1261_v21   ;;  %v4852_v21 = vld [vmem:[#allocation25_spill] sm:$0xff] }
 0x173   : > { %v893_v60 = vadd.f32 %v845_v23, %v695_v58  ;;  %v894_v53 = vadd.f32 %v846_v46, %v696_v32  ;;  %v461_v56 = vmul.f32 %v3590_v55, %v4852_v21  ;;  %v462_v10 = vmul.f32 %v3592_v59, %v4852_v21 }
 0x174   : > { %v809_v58 = vmul.f32 %v3608_v12, %v4854_v35  ;;  %v810_v32 = vmul.f32 %v3610_v16, %v4854_v35  ;;  %v3112_v35 = vld [vmem:[%s4771_s3 + $0x4] sm:$0xf] }
 0x175   : > { %1430 = vperm.xlu2 %3201, %v1248_v17   ;;  %v1085_v15 = vadd.f32 %v1025_v5, %v893_v60  ;;  %v1086_v41 = vadd.f32 %v1025_v5, %v894_v53  ;;  %v659_v23 = vadd.f32 %v611_v51, %v461_v56  ;;  %v660_v46 = vadd.f32 %v612_v18, %v462_v10  ;;  %v4856_v60 = vld [vmem:[#allocation5_spill] sm:$0xff]  ;;  %v4858_v5 = vld [vmem:[#allocation20_spill] sm:$0xff]  ;;  %v1259_v18 = vld [vmem:[%s4772_s4 + $0x160] sm:$0xff] }
 0x176   : > { %v642_v17 = vmul.f32 %v3600_v45, %v4855_v37  ;;  %v493_v53 = vmul.f32 %v3590_v55, %v4856_v60  ;;  %v494_v54 = vmul.f32 %v3592_v59, %v4856_v60  ;;  %v3114_v37 = vld [vmem:[%s4771_s3 + $0x14] sm:$0xf] }
 0x177   : > { %v1133_v43 = vmax.f32 %v1085_v15, 0.0  ;;  %v1134_v11 = vmax.f32 %v1086_v41, 0.0  ;;  %v857_v40 = vadd.f32 %v809_v58, %v659_v23  ;;  %v858_v3 = vadd.f32 %v810_v32, %v660_v46  ;;  %v2873_v58 = vld [vmem:[%s4771_s3 + $0x8] sm:$0xf0] }
 0x178   : > { %v839_v15 = vmul.f32 %v3608_v12, %v4858_v5  ;;  %v840_v41 = vmul.f32 %v3610_v16, %v4858_v5  ;;  %v2876_v46 = vor.u32 %v3112_v35, %v2873_v58  ;;  %v3118_v5 = vld [vmem:[%s4771_s3 + $0x34] sm:$0xf] }
 0x179   : > { %1425 = vperm.xlu1 %3206, %v1247_v8   ;;  %v940_v57 = vpop.permute.xlu1 %939  ;;  %v1209_v13 = vpack.c.bf16 %v1133_v43, %v1131_v42  ;;  %v1210_v30 = vpack.c.bf16 %v1134_v11, %v1132_v27  ;;  %v1049_v49 = vadd.f32 %v935_v28, %v857_v40  ;;  %v1050_v38 = vadd.f32 %v935_v28, %v858_v3  ;;  %v4860_v8 = vld [vmem:[#allocation26_spill] sm:$0xff]  ;;  %v4861_v27 = vld [vmem:[#allocation27_spill] sm:$0xff] }
 0x17a   : > { %v1051_v44 = vadd.f32 %v940_v57, %v859_v24  ;;  %v1052_v62 = vadd.f32 %v940_v57, %v860_v33  ;;  %v689_v43 = vadd.f32 %v641_v47, %v491_v6  ;;  %v690_v11 = vadd.f32 %v642_v17, %v492_v34  ;;  %v1010_v24 = vpop.permute.xlu0 %1009  ;;  %v1262_v28 = vld [vmem:[%s4772_s4 + $0x178] sm:$0xff] }
 0x17b   : > { %1927 = vmatpush.bf16.msra.mxu1 %v1209_v13  ;;  %2185 = vmatpush.bf16.msra.mxu3 %v1210_v30  ;;  %v1097_v59 = vmax.f32 %v1049_v49, 0.0  ;;  %v1098_v9 = vmax.f32 %v1050_v38, 0.0  ;;  %v2871_v13 = vld [vmem:[%s4771_s3] sm:$0xf]  ;;  %v3113_v30 = vld [vmem:[%s4771_s3 + $0x4] sm:$0xf0] }
 0x17c   : > { %v1099_v36 = vmax.f32 %v1051_v44, 0.0  ;;  %v1100_v1 = vmax.f32 %v1052_v62, 0.0  ;;  %v887_v44 = vadd.f32 %v839_v15, %v689_v43  ;;  %v888_v62 = vadd.f32 %v840_v41, %v690_v11  ;;  %v3115_v40 = vld [vmem:[%s4771_s3 + $0x14] sm:$0xf0]  ;;  %v2881_v47 = vld [vmem:[%s4771_s3 + $0x18] sm:$0xf0] }
 0x17d   : > { %1445 = vperm.xlu2 %3201, %v1251_v7   ;;  %v691_v7 = vadd.f32 %v643_v39, %v493_v53  ;;  %v2884_v17 = vor.u32 %v3114_v37, %v2881_v47  ;;  %v2887_v49 = vld [vmem:[%s4771_s3 + $0x20] sm:$0xf]  ;;  %v3117_v38 = vld [vmem:[%s4771_s3 + $0x24] sm:$0xf0]  ;;  %v3116_v53 = vld [vmem:[%s4771_s3 + $0x24] sm:$0xf] }
 0x17e   : > { %v1193_v31 = vpack.c.bf16 %v1101_v20, %v1099_v36  ;;  %v1194_v2 = vpack.c.bf16 %v1102_v19, %v1100_v1  ;;  %v692_v20 = vadd.f32 %v644_v61, %v494_v54  ;;  %v1079_v1 = vadd.f32 %v1010_v24, %v887_v44  ;;  %v2889_v54 = vld [vmem:[%s4771_s3 + $0x28] sm:$0xf0]  ;;  %v3119_v6 = vld [vmem:[%s4771_s3 + $0x34] sm:$0xf0]  ;;  %v2897_v15 = vld [vmem:[%s4771_s3 + $0x38] sm:$0xf0] }
 0x17f   : > { %v2888_v60 = vor.u32 %v3117_v38, %v2887_v49  ;;  %v2896_v34 = vor.u32 %v3119_v6, %v2895_v63  ;;  %v2900_v41 = vor.u32 %v3118_v5, %v2897_v15  ;;  %v3120_v61 = vld [vmem:[%s4771_s3 + $0x44] sm:$0xf]  ;;  %v3122_v11 = vld [vmem:[%s4771_s3 + $0x54] sm:$0xf]  ;;  %v3127_v44 = vld [vmem:[%s4771_s3 + $0x74] sm:$0xf0] }
 0x180   : > { %1798 = vmatpush.bf16.msra.mxu0 %v1193_v31  ;;  %2056 = vmatpush.bf16.msra.mxu2 %v1194_v2  ;;  %v1127_v52 = vmax.f32 %v1079_v1, 0.0  ;;  %v3130_v5 = vld [vmem:[%s4771_s3 + $0x94] sm:$0xf]  ;;  %v2945_v15 = vld [vmem:[%s4771_s3 + $0x98] sm:$0xf0] }
 0x181   : > { %1440 = vperm.xlu1 %3206, %v1250_v26   ;;  %v1260_v26 = vld [vmem:[%s4772_s4 + $0x168] sm:$0xff] }
 0x182   : > { %v775_v25 = vpop.permute.xlu1 %774 }
 0x183   : > { %v841_v33 = vmul.f32 %v3608_v12, %v775_v25  ;;  %v842_v22 = vmul.f32 %v3610_v16, %v775_v25  ;;  %v1080_v12 = vadd.f32 %v1010_v24, %v888_v62  ;;  %v2872_v16 = vor.u32 %v3113_v30, %v2871_v13  ;;  %v3125_v24 = vld [vmem:[%s4771_s3 + $0x64] sm:$0xf0]  ;;  %v1266_v13 = vpop.permute.xlu2 %1265  ;;  %v2927_v30 = vld [vmem:[%s4771_s3 + $0x70] sm:$0xf] }
 0x184   : > { %v2928_v62 = vor.u32 %v3127_v44, %v2927_v30 }
 0x185   : > { %1460 = vperm.xlu2 %3201, %v1254_v48   ;;  %v889_v31 = vadd.f32 %v841_v33, %v691_v7  ;;  %v890_v2 = vadd.f32 %v842_v22, %v692_v20  ;;  %v1128_v51 = vmax.f32 %v1080_v12, 0.0  ;;  %v3124_v22 = vld [vmem:[%s4771_s3 + $0x64] sm:$0xf]  ;;  %v1271_v7 = vpop.permute.xlu0 %1270  ;;  %v3126_v20 = vld [vmem:[%s4771_s3 + $0x74] sm:$0xf] }
 0x189   : > { %1455 = vperm.xlu1 %3206, %v1253_v0   ;;  %v2879_v0 = vld [vmem:[%s4771_s3 + $0x10] sm:$0xf] }
 0x18a   : > { %v2880_v3 = vor.u32 %v3115_v40, %v2879_v0 }
 0x18b   : > { %v930_v50 = vpop.permute.xlu1 %929 }
 0x18c   : > { %v1047_v42 = vadd.f32 %v930_v50, %v4860_v8  ;;  %v1048_v55 = vadd.f32 %v930_v50, %v4861_v27  ;;  %v2903_v50 = vld [vmem:[%s4771_s3 + $0x40] sm:$0xf]  ;;  %v2905_v8 = vld [vmem:[%s4771_s3 + $0x48] sm:$0xf0]  ;;  %v2911_v27 = vld [vmem:[%s4771_s3 + $0x50] sm:$0xf] }
 0x18d   : > { %1475 = vperm.xlu2 %3201, %v1257_v29   ;;  %v2892_v29 = vor.u32 %v3116_v53, %v2889_v54  ;;  %v2904_v39 = vor.u32 %v3121_v14, %v2903_v50 }
 0x18e   : > { %v1095_v57 = vmax.f32 %v1047_v42, 0.0  ;;  %v1096_v45 = vmax.f32 %v1048_v55, 0.0  ;;  %v2908_v42 = vor.u32 %v3120_v61, %v2905_v8  ;;  %v3123_v55 = vld [vmem:[%s4771_s3 + $0x54] sm:$0xf0]  ;;  %v2948_v8 = vor.u32 %v3130_v5, %v2945_v15 }
 0x18f   : > { %v2912_v43 = vor.u32 %v3123_v55, %v2911_v27 }
 0x190   : > { %v1191_v19 = vpack.c.bf16 %v1097_v59, %v1095_v57  ;;  %v1192_v36 = vpack.c.bf16 %v1098_v9, %v1096_v45  ;;  %v2913_v59 = vld [vmem:[%s4771_s3 + $0x58] sm:$0xf0]  ;;  %v2921_v57 = vld [vmem:[%s4771_s3 + $0x68] sm:$0xf0] }
 0x191   : > { %1470 = vperm.xlu1 %3206, %v1256_v4   ;;  %v2916_v9 = vor.u32 %v3122_v11, %v2913_v59  ;;  %v2919_v4 = vld [vmem:[%s4771_s3 + $0x60] sm:$0xf]  ;;  %v2924_v45 = vor.u32 %v3124_v22, %v2921_v57 }
 0x192   : > { %1799 = vmatpush.bf16.msra.mxu0 %v1191_v19  ;;  %2057 = vmatpush.bf16.msra.mxu2 %v1192_v36  ;;  %v2920_v33 = vor.u32 %v3125_v24, %v2919_v4  ;;  %v2929_v19 = vld [vmem:[%s4771_s3 + $0x78] sm:$0xf0]  ;;  %v4247_v36 = vpop.permute.xlu2 %1280  ;;  %v2951_v24 = vld [vmem:[%s4771_s3 + $0xa0] sm:$0xf] }
 0x193   : > { %v1015_v21 = vpop.permute.xlu1 %1014  ;;  %v2932_v1 = vor.u32 %v3126_v20, %v2929_v19 }
 0x194   : > { %v1081_v56 = vadd.f32 %v1015_v21, %v889_v31  ;;  %v1082_v10 = vadd.f32 %v1015_v21, %v890_v2  ;;  %v3129_v31 = vld [vmem:[%s4771_s3 + $0x84] sm:$0xf0]  ;;  %v4259_v2 = vpop.permute.xlu0 %1285 }
 0x195   : > { %1490 = vperm.xlu2 %3201, %v1260_v26   ;;  %1800 = vmatmul.bf16.vlgmr.msra.gmra.mxu0 %v2872_v16 }
 0x196   : > { %v1129_v25 = vmax.f32 %v1081_v56, 0.0  ;;  %v1130_v48 = vmax.f32 %v1082_v10, 0.0  ;;  %2058 = vmatmul.bf16.vlgmr.msra.gmra.mxu2 %v2872_v16  ;;  %v2935_v16 = vld [vmem:[%s4771_s3 + $0x80] sm:$0xf]  ;;  %v3128_v10 = vld [vmem:[%s4771_s3 + $0x84] sm:$0xf] }
 0x197   : > { %v2936_v21 = vor.u32 %v3129_v31, %v2935_v16 }
 0x198   : > { %v1207_v32 = vpack.c.bf16 %v1129_v25, %v1127_v52  ;;  %v1208_v23 = vpack.c.bf16 %v1130_v48, %v1128_v51  ;;  %v2937_v52 = vld [vmem:[%s4771_s3 + $0x88] sm:$0xf0] }
 0x199   : > { %1485 = vperm.xlu1 %3206, %v1259_v18   ;;  %v2940_v48 = vor.u32 %v3128_v10, %v2937_v52 }
 0x19a   : > { %1928 = vmatpush.bf16.msra.mxu1 %v1207_v32  ;;  %2186 = vmatpush.bf16.msra.mxu3 %v1208_v23  ;;  %v4261_v26 = vpop.permute.xlu2 %1295 }
 0x19b   : > { %v4249_v12 = vpop.permute.xlu1 %1275 }
 0x19c   : > { %v4271_v18 = vpop.permute.xlu0 %1300 }
 0x19d   : > { %3061 = vmatmul.msk.bf16.vlgmr.msra.gmra.mxu1 %vm1719_vm0, %v2876_v46  ;;  %3085 = vmatmul.msk.bf16.vlgmr.msra.gmra.mxu3 %vm1719_vm0, %v2876_v46  ;;  %v2943_v46 = vld [vmem:[%s4771_s3 + $0x90] sm:$0xf] }
 0x1a1   : > { %1500 = vperm.xlu1 %3206, %v1262_v28   ;;  %v3131_v28 = vld [vmem:[%s4771_s3 + $0x94] sm:$0xf0] }
 0x1a2   : > { %v4273_v32 = vpop.permute.xlu2 %1310  ;;  %v2944_v49 = vor.u32 %v3131_v28, %v2943_v46 }
 0x1a3   : > { %v4269_v51 = vpop.permute.xlu1 %1290 }
 0x1a4   : > { %v4285_v53 = vpop.permute.xlu0 %1315 }
 0x1a5   : > { %1805 = vmatmul.bf16.gmra.mxu0 %v2880_v3 }
 0x1a6   : > { %2063 = vmatmul.bf16.gmra.mxu2 %v2880_v3 }
 0x1aa   : > { %v4287_v63 = vpop.permute.xlu2 %1325 }
 0x1ab   : > { %v4283_v37 = vpop.permute.xlu1 %1305 }
 0x1ac   : > { %v4297_v59 = vpop.permute.xlu0 %1330 }
 0x1ad   : > { %3062 = vmatmul.msk.bf16.gmra.mxu1 %vm1719_vm0, %v2884_v17  ;;  %3086 = vmatmul.msk.bf16.gmra.mxu3 %vm1719_vm0, %v2884_v17 }
 0x1b2   : > { %v4308_v22 = vpop.permute.xlu2 %1340 }
 0x1b3   : > { %v4295_v55 = vpop.permute.xlu1 %1320 }
 0x1b4   : > { %v4320_v10 = vpop.permute.xlu0 %1345 }
 0x1b5   : > { %1810 = vmatmul.bf16.gmra.mxu0 %v2888_v60 }
 0x1b6   : > { %2068 = vmatmul.bf16.gmra.mxu2 %v2888_v60 }
 0x1bb   : > { %v4311_v16 = vpop.permute.xlu1 %1335 }
 0x1bd   : > { %3063 = vmatmul.msk.bf16.gmra.mxu1 %vm1719_vm0, %v2892_v29  ;;  %3087 = vmatmul.msk.bf16.gmra.mxu3 %vm1719_vm0, %v2892_v29 }
 0x1c5   : > { %1815 = vmatmul.bf16.gmra.mxu0 %v2896_v34 }
 0x1c6   : > { %2073 = vmatmul.bf16.gmra.mxu2 %v2896_v34 }
 0x1cd   : > { %3064 = vmatmul.msk.bf16.gmra.mxu1 %vm1719_vm0, %v2900_v41  ;;  %3088 = vmatmul.msk.bf16.gmra.mxu3 %vm1719_vm0, %v2900_v41 }
 0x1d5   : > { %1820 = vmatmul.bf16.gmra.mxu0 %v2904_v39 }
 0x1d6   : > { %2078 = vmatmul.bf16.gmra.mxu2 %v2904_v39 }
 0x1dd   : > { %3065 = vmatmul.msk.bf16.gmra.mxu1 %vm1719_vm0, %v2908_v42  ;;  %3089 = vmatmul.msk.bf16.gmra.mxu3 %vm1719_vm0, %v2908_v42 }
 0x1e5   : > { %1825 = vmatmul.bf16.gmra.mxu0 %v2912_v43 }
 0x1e6   : > { %2083 = vmatmul.bf16.gmra.mxu2 %v2912_v43 }
 0x1ed   : > { %3066 = vmatmul.msk.bf16.gmra.mxu1 %vm1719_vm0, %v2916_v9  ;;  %3090 = vmatmul.msk.bf16.gmra.mxu3 %vm1719_vm0, %v2916_v9 }
 0x1f5   : > { %1830 = vmatmul.bf16.gmra.mxu0 %v2920_v33 }
 0x1f6   : > { %2088 = vmatmul.bf16.gmra.mxu2 %v2920_v33  ;;  %v3133_v33 = vld [vmem:[%s4771_s3 + $0xa4] sm:$0xf0] }
 0x1fd   : > { %3067 = vmatmul.msk.bf16.gmra.mxu1 %vm1719_vm0, %v2924_v45  ;;  %3091 = vmatmul.msk.bf16.gmra.mxu3 %vm1719_vm0, %v2924_v45 }
 0x205   : > { %1835 = vmatmul.bf16.gmra.mxu0 %v2928_v62 }
 0x206   : > { %2093 = vmatmul.bf16.gmra.mxu2 %v2928_v62  ;;  %v2952_v62 = vor.u32 %v3133_v33, %v2951_v24 }
 0x20d   : > { %3068 = vmatmul.msk.bf16.gmra.mxu1 %vm1719_vm0, %v2932_v1  ;;  %3092 = vmatmul.msk.bf16.gmra.mxu3 %vm1719_vm0, %v2932_v1 }
 0x212   : > { %v1801_v56 = vpop.f32.mrf.mxu0 }
 0x213   : > { %v1802_v23 = vadd.f32 %v1801_v56, %v1266_v13  ;;  %v2953_v56 = vld [vmem:[%s4771_s3 + $0xa8] sm:$0xf0] }
 0x215   : > { %1840 = vmatmul.bf16.gmra.mxu0 %v2936_v21 }
 0x216   : > { %2098 = vmatmul.bf16.gmra.mxu2 %v2936_v21 }
 0x219   : > { %v2059_v25 = vpop.f32.mrf.mxu2 }
 0x21a   : > { %v1803_v35 = vpop.f32.mrf.mxu0  ;;  %v1930_v58 = vpop.f32.mrf.mxu1  ;;  %v2060_v0 = vadd.f32 %v2059_v25, %v1266_v13 }
 0x21b   : > { %v1931_v40 = vadd.f32 %v1930_v58, %v1802_v23  ;;  %v1804_v6 = vadd.f32 %v1803_v35, %v1271_v7  ;;  %v4323_v35 = vpop.permute.xlu2 %1355 }
 0x21d   : > { %3069 = vmatmul.msk.bf16.gmra.mxu1 %vm1719_vm0, %v2940_v48  ;;  %3093 = vmatmul.msk.bf16.gmra.mxu3 %vm1719_vm0, %v2940_v48  ;;  %v2308_v54 = vmax.f32 %v1931_v40, 0.0 }
 0x220   : > { %v2188_v3 = vpop.f32.mrf.mxu3 }
 0x221   : > { %v2061_v47 = vpop.f32.mrf.mxu2  ;;  %v2189_v17 = vadd.f32 %v2188_v3, %v2060_v0 }
 0x222   : > { %v1806_v38 = vpop.f32.mrf.mxu0  ;;  %v1932_v60 = vpop.f32.mrf.mxu1  ;;  %v2062_v41 = vadd.f32 %v2061_v47, %v1271_v7 }
 0x223   : > { %v2309_v29 = vmax.f32 %v2189_v17, 0.0  ;;  %v1933_v50 = vadd.f32 %v1932_v60, %v1804_v6  ;;  %v1807_v9 = vadd.f32 %v1806_v38, %v4249_v12  ;;  %v4334_v38 = vpop.permute.xlu1 %1350  ;;  %v4337_v6 = vpop.permute.xlu0 %1360 }
 0x225   : > { %v2500_v34 = vmax.f32 %v2308_v54, %v2309_v29  ;;  %1845 = vmatmul.bf16.gmra.mxu0 %v2944_v49  ;;  %v2310_v43 = vmax.f32 %v1933_v50, 0.0 }
 0x226   : > { %2103 = vmatmul.bf16.gmra.mxu2 %v2944_v49  ;;  %v3135_v49 = vld [vmem:[%s4771_s3 + $0xb4] sm:$0xf0] }
 0x227   : > { %2647 = vmax.xlane.f32.xlu2 %v2500_v34 }
 0x228   : > { %v2190_v14 = vpop.f32.mrf.mxu3 }
 0x229   : > { %v2064_v39 = vpop.f32.mrf.mxu2  ;;  %v2191_v61 = vadd.f32 %v2190_v14, %v2062_v41  ;;  %v4339_v14 = vpop.permute.xlu2 %1370 }
 0x22a   : > { %v1808_v42 = vpop.f32.mrf.mxu0  ;;  %v1935_v27 = vpop.f32.mrf.mxu1  ;;  %v2065_v57 = vadd.f32 %v2064_v39, %v4249_v12  ;;  %v3132_v12 = vld [vmem:[%s4771_s3 + $0xa4] sm:$0xf] }
 0x22b   : > { %v2311_v11 = vmax.f32 %v2191_v61, 0.0  ;;  %v1936_v45 = vadd.f32 %v1935_v27, %v1807_v9  ;;  %v1809_v31 = vadd.f32 %v1808_v42, %v4247_v36  ;;  %v2956_v46 = vor.u32 %v3132_v12, %v2953_v56  ;;  %v2961_v27 = vld [vmem:[%s4771_s3 + $0xb8] sm:$0xf0] }
 0x22d   : > { %3070 = vmatmul.msk.bf16.gmra.mxu1 %vm1719_vm0, %v2948_v8  ;;  %3094 = vmatmul.msk.bf16.gmra.mxu3 %vm1719_vm0, %v2948_v8  ;;  %v2501_v4 = vmax.f32 %v2310_v43, %v2311_v11  ;;  %v2312_v19 = vmax.f32 %v1936_v45, 0.0 }
 0x22f   : > { %2649 = vmax.xlane.f32.xlu0 %v2501_v4  ;;  %v4349_v4 = vpop.permute.xlu1 %1365 }
 0x230   : > { %v2193_v13 = vpop.f32.mrf.mxu3 }
 0x231   : > { %v2066_v30 = vpop.f32.mrf.mxu2  ;;  %v2194_v44 = vadd.f32 %v2193_v13, %v2065_v57 }
 0x232   : > { %v1811_v7 = vpop.f32.mrf.mxu0  ;;  %v1937_v20 = vpop.f32.mrf.mxu1  ;;  %v2067_v52 = vadd.f32 %v2066_v30, %v4247_v36  ;;  %v2959_v36 = vld [vmem:[%s4771_s3 + $0xb0] sm:$0xf] }
 0x233   : > { %v2313_v1 = vmax.f32 %v2194_v44, 0.0  ;;  %v1938_v25 = vadd.f32 %v1937_v20, %v1809_v31  ;;  %v1812_v47 = vadd.f32 %v1811_v7, %v4259_v2  ;;  %v2960_v15 = vor.u32 %v3135_v49, %v2959_v36  ;;  %v4351_v30 = vpop.permute.xlu0 %1375  ;;  %v4353_v7 = vpop.permute.xlu2 %1385 }
 0x235   : > { %v2502_v21 = vmax.f32 %v2312_v19, %v2313_v1  ;;  %1850 = vmatmul.bf16.gmra.mxu0 %v2952_v62  ;;  %v2314_v40 = vmax.f32 %v1938_v25, 0.0  ;;  %v2967_v19 = vld [vmem:[%s4771_s3 + $0xc0] sm:$0xf]  ;;  %v3137_v1 = vld [vmem:[%s4771_s3 + $0xc4] sm:$0xf0] }
 0x236   : > { %2108 = vmatmul.bf16.gmra.mxu2 %v2952_v62  ;;  %v2968_v25 = vor.u32 %v3137_v1, %v2967_v19  ;;  %v2977_v19 = vld [vmem:[%s4771_s3 + $0xd8] sm:$0xf0] }
 0x237   : > { %2651 = vmax.xlane.f32.xlu1 %v2502_v21 }
 0x238   : > { %v2195_v48 = vpop.f32.mrf.mxu3 }
 0x239   : > { %v2069_v58 = vpop.f32.mrf.mxu2  ;;  %v2196_v23 = vadd.f32 %v2195_v48, %v2067_v52 }
 0x23a   : > { %v1813_v28 = vpop.f32.mrf.mxu0  ;;  %v1940_v0 = vpop.f32.mrf.mxu1  ;;  %v2070_v60 = vadd.f32 %v2069_v58, %v4259_v2  ;;  %v3134_v2 = vld [vmem:[%s4771_s3 + $0xb4] sm:$0xf] }
 0x23b   : > { %v2315_v3 = vmax.f32 %v2196_v23, 0.0  ;;  %v1941_v54 = vadd.f32 %v1940_v0, %v1812_v47  ;;  %v1814_v8 = vadd.f32 %v1813_v28, %v4269_v51  ;;  %v2964_v57 = vor.u32 %v3134_v2, %v2961_v27  ;;  %v4365_v23 = vpop.permute.xlu1 %1380  ;;  %v4367_v0 = vpop.permute.xlu0 %1390  ;;  %v2969_v47 = vld [vmem:[%s4771_s3 + $0xc8] sm:$0xf0] }
 0x23d   : > { %3071 = vmatmul.msk.bf16.gmra.mxu1 %vm1719_vm0, %v2956_v46  ;;  %3095 = vmatmul.msk.bf16.gmra.mxu3 %vm1719_vm0, %v2956_v46  ;;  %v2503_v17 = vmax.f32 %v2314_v40, %v2315_v3  ;;  %v2316_v39 = vmax.f32 %v1941_v54, 0.0 }
 0x23f   : > { %2653 = vmax.xlane.f32.xlu2 %v2503_v17  ;;  %v4376_v17 = vpop.permute.xlu2 %1400 }
 0x240   : > { %v2198_v29 = vpop.f32.mrf.mxu3 }
 0x241   : > { %v2071_v34 = vpop.f32.mrf.mxu2  ;;  %v2199_v5 = vadd.f32 %v2198_v29, %v2070_v60 }
 0x242   : > { %v1816_v41 = vpop.f32.mrf.mxu0  ;;  %v1942_v50 = vpop.f32.mrf.mxu1  ;;  %v2072_v43 = vadd.f32 %v2071_v34, %v4269_v51 }
 0x243   : > { %v2317_v61 = vmax.f32 %v2199_v5, 0.0  ;;  %v1943_v11 = vadd.f32 %v1942_v50, %v1814_v8  ;;  %v1817_v20 = vadd.f32 %v1816_v41, %v4261_v26  ;;  %v4390_v2 = vpop.permute.xlu0 %1405 }
 0x245   : > { %v2504_v42 = vmax.f32 %v2316_v39, %v2317_v61  ;;  %1855 = vmatmul.bf16.gmra.mxu0 %v2960_v15  ;;  %v2318_v44 = vmax.f32 %v1943_v11, 0.0  ;;  %v4379_v39 = vpop.permute.xlu1 %1395 }
 0x246   : > { %2113 = vmatmul.bf16.gmra.mxu2 %v2960_v15 }
 0x247   : > { %2655 = vmax.xlane.f32.xlu2 %v2504_v42  ;;  %v3139_v42 = vld [vmem:[%s4771_s3 + $0xd4] sm:$0xf0] }
 0x248   : > { %v2200_v9 = vpop.f32.mrf.mxu3 }
 0x249   : > { %v2074_v24 = vpop.f32.mrf.mxu2  ;;  %v2201_v33 = vadd.f32 %v2200_v9, %v2072_v43  ;;  %v4393_v9 = vpop.permute.xlu2 %1415 }
 0x24a   : > { %v1818_v45 = vpop.f32.mrf.mxu0  ;;  %v1945_v13 = vpop.f32.mrf.mxu1  ;;  %v2075_v31 = vadd.f32 %v2074_v24, %v4261_v26  ;;  %v3136_v26 = vld [vmem:[%s4771_s3 + $0xc4] sm:$0xf] }
 0x24b   : > { %v2319_v62 = vmax.f32 %v2201_v33, 0.0  ;;  %v1946_v21 = vadd.f32 %v1945_v13, %v1817_v20  ;;  %v1819_v40 = vadd.f32 %v1818_v45, %v4271_v18  ;;  %v2972_v34 = vor.u32 %v3136_v26, %v2969_v47  ;;  %v2983_v47 = vld [vmem:[%s4771_s3 + $0xe0] sm:$0xf] }
 0x24d   : > { %3072 = vmatmul.msk.bf16.gmra.mxu1 %vm1719_vm0, %v2964_v57  ;;  %3096 = vmatmul.msk.bf16.gmra.mxu3 %vm1719_vm0, %v2964_v57  ;;  %v2505_v51 = vmax.f32 %v2318_v44, %v2319_v62  ;;  %v2320_v46 = vmax.f32 %v1946_v21, 0.0  ;;  %v4402_v1 = vpop.permute.xlu1 %1410 }
 0x24f   : > { %2657 = vmax.xlane.f32.xlu0 %v2505_v51 }
 0x250   : > { %v2203_v12 = vpop.f32.mrf.mxu3 }
 0x251   : > { %v2076_v56 = vpop.f32.mrf.mxu2  ;;  %v2204_v52 = vadd.f32 %v2203_v12, %v2075_v31 }
 0x252   : > { %v1821_v48 = vpop.f32.mrf.mxu0  ;;  %v1947_v58 = vpop.f32.mrf.mxu1  ;;  %v2077_v36 = vadd.f32 %v2076_v56, %v4271_v18  ;;  %v2975_v18 = vld [vmem:[%s4771_s3 + $0xd0] sm:$0xf] }
 0x253   : > { %v2321_v28 = vmax.f32 %v2204_v52, 0.0  ;;  %v1948_v49 = vadd.f32 %v1947_v58, %v1819_v40  ;;  %v1822_v61 = vadd.f32 %v1821_v48, %v4283_v37  ;;  %v2976_v57 = vor.u32 %v3139_v42, %v2975_v18  ;;  %v4405_v56 = vpop.permute.xlu0 %1420 }
 0x255   : > { %v2506_v3 = vmax.f32 %v2320_v46, %v2321_v28  ;;  %1860 = vmatmul.bf16.gmra.mxu0 %v2968_v25  ;;  %v2322_v41 = vmax.f32 %v1948_v49, 0.0  ;;  %v4407_v28 = vpop.permute.xlu2 %1430 }
 0x256   : > { %2118 = vmatmul.bf16.gmra.mxu2 %v2968_v25 }
 0x257   : > { %2659 = vmax.xlane.f32.xlu1 %v2506_v3 }
 0x258   : > { %v2205_v60 = vpop.f32.mrf.mxu3 }
 0x259   : > { %v2079_v54 = vpop.f32.mrf.mxu2  ;;  %v2206_v29 = vadd.f32 %v2205_v60, %v2077_v36  ;;  %v3141_v36 = vld [vmem:[%s4771_s3 + $0xe4] sm:$0xf0] }
 0x25a   : > { %v1823_v5 = vpop.f32.mrf.mxu0  ;;  %v1950_v15 = vpop.f32.mrf.mxu1  ;;  %v2080_v27 = vadd.f32 %v2079_v54, %v4283_v37  ;;  %v3138_v37 = vld [vmem:[%s4771_s3 + $0xd4] sm:$0xf] }
 0x25b   : > { %v2323_v50 = vmax.f32 %v2206_v29, 0.0  ;;  %v1951_v43 = vadd.f32 %v1950_v15, %v1822_v61  ;;  %v1824_v20 = vadd.f32 %v1823_v5, %v4273_v32  ;;  %v2980_v48 = vor.u32 %v3138_v37, %v2977_v19  ;;  %v4419_v29 = vpop.permute.xlu1 %1425  ;;  %v4421_v61 = vpop.permute.xlu0 %1435 }
 0x25c   : > { %v2984_v15 = vor.u32 %v3141_v36, %v2983_v47 }
 0x25d   : > { %3073 = vmatmul.msk.bf16.gmra.mxu1 %vm1719_vm0, %v2972_v34  ;;  %3097 = vmatmul.msk.bf16.gmra.mxu3 %vm1719_vm0, %v2972_v34  ;;  %v2507_v8 = vmax.f32 %v2322_v41, %v2323_v50  ;;  %v2324_v44 = vmax.f32 %v1951_v43, 0.0  ;;  %v4423_v42 = vpop.permute.xlu2 %1445 }
 0x25f   : > { %2661 = vmax.xlane.f32.xlu2 %v2507_v8 }
 0x260   : > { %v2208_v11 = vpop.f32.mrf.mxu3 }
 0x261   : > { %v2081_v24 = vpop.f32.mrf.mxu2  ;;  %v2209_v33 = vadd.f32 %v2208_v11, %v2080_v27  ;;  %v2985_v11 = vld [vmem:[%s4771_s3 + $0xe8] sm:$0xf0] }
 0x262   : > { %v1826_v45 = vpop.f32.mrf.mxu0  ;;  %v1952_v13 = vpop.f32.mrf.mxu1  ;;  %v2082_v31 = vadd.f32 %v2081_v24, %v4273_v32 }
 0x263   : > { %v2325_v62 = vmax.f32 %v2209_v33, 0.0  ;;  %v1953_v21 = vadd.f32 %v1952_v13, %v1824_v20  ;;  %v1827_v26 = vadd.f32 %v1826_v45, %v4285_v53 }
 0x265   : > { %1865 = vmatmul.bf16.gmra.mxu0 %v2976_v57  ;;  %v2508_v51 = vmax.f32 %v2324_v44, %v2325_v62  ;;  %v2326_v40 = vmax.f32 %v1953_v21, 0.0 }
 0x266   : > { %2123 = vmatmul.bf16.gmra.mxu2 %v2976_v57 }
 0x267   : > { %2663 = vmax.xlane.f32.xlu0 %v2508_v51  ;;  %v4433_v51 = vpop.permute.xlu1 %1440 }
 0x268   : > { %v2210_v12 = vpop.f32.mrf.mxu3 }
 0x269   : > { %v2084_v52 = vpop.f32.mrf.mxu2  ;;  %v2211_v25 = vadd.f32 %v2210_v12, %v2082_v31  ;;  %v4435_v31 = vpop.permute.xlu0 %1450  ;;  %v2991_v12 = vld [vmem:[%s4771_s3 + $0xf0] sm:$0xf] }
 0x26a   : > { %v1828_v58 = vpop.f32.mrf.mxu0  ;;  %v1955_v46 = vpop.f32.mrf.mxu1  ;;  %v2085_v49 = vadd.f32 %v2084_v52, %v4285_v53  ;;  %v3140_v53 = vld [vmem:[%s4771_s3 + $0xe4] sm:$0xf]  ;;  %v3143_v52 = vld [vmem:[%s4771_s3 + $0xf4] sm:$0xf0] }
 0x26b   : > { %v2327_v3 = vmax.f32 %v2211_v25, 0.0  ;;  %v1956_v60 = vadd.f32 %v1955_v46, %v1827_v26  ;;  %v1829_v27 = vadd.f32 %v1828_v58, %v4295_v55  ;;  %v2988_v44 = vor.u32 %v3140_v53, %v2985_v11  ;;  %v4446_v25 = vpop.permute.xlu2 %1460 }
 0x26c   : > { %v2992_v26 = vor.u32 %v3143_v52, %v2991_v12 }
 0x26d   : > { %3074 = vmatmul.msk.bf16.gmra.mxu1 %vm1719_vm0, %v2980_v48  ;;  %3098 = vmatmul.msk.bf16.gmra.mxu3 %vm1719_vm0, %v2980_v48  ;;  %v2509_v32 = vmax.f32 %v2326_v40, %v2327_v3  ;;  %v2328_v8 = vmax.f32 %v1956_v60, 0.0 }
 0x26f   : > { %2665 = vmax.xlane.f32.xlu1 %v2509_v32  ;;  %v4449_v60 = vpop.permute.xlu1 %1455 }
 0x270   : > { %v2213_v54 = vpop.f32.mrf.mxu3 }
 0x271   : > { %v2086_v34 = vpop.f32.mrf.mxu2  ;;  %v2214_v5 = vadd.f32 %v2213_v54, %v2085_v49 }
 0x272   : > { %v1831_v41 = vpop.f32.mrf.mxu0  ;;  %v1957_v50 = vpop.f32.mrf.mxu1  ;;  %v2087_v24 = vadd.f32 %v2086_v34, %v4295_v55 }
 0x273   : > { %v2329_v18 = vmax.f32 %v2214_v5, 0.0  ;;  %v1958_v33 = vadd.f32 %v1957_v50, %v1829_v27  ;;  %v1832_v21 = vadd.f32 %v1831_v41, %v4287_v63  ;;  %v2993_v5 = vld [vmem:[%s4771_s3 + $0xf8] sm:$0xf0] }
 0x275   : > { %v2510_v43 = vmax.f32 %v2328_v8, %v2329_v18  ;;  %1870 = vmatmul.bf16.gmra.mxu0 %v2984_v15  ;;  %v2330_v37 = vmax.f32 %v1958_v33, 0.0  ;;  %v4461_v18 = vpop.permute.xlu2 %1475 }
 0x276   : > { %2128 = vmatmul.bf16.gmra.mxu2 %v2984_v15  ;;  %v4458_v15 = vpop.permute.xlu0 %1465 }
 0x277   : > { %2667 = vmax.xlane.f32.xlu2 %v2510_v43 }
 0x278   : > { %v2215_v57 = vpop.f32.mrf.mxu3 }
 0x279   : > { %v2089_v45 = vpop.f32.mrf.mxu2  ;;  %v2216_v13 = vadd.f32 %v2215_v57, %v2087_v24 }
 0x27a   : > { %v1833_v62 = vpop.f32.mrf.mxu0  ;;  %v1960_v20 = vpop.f32.mrf.mxu1  ;;  %v2090_v48 = vadd.f32 %v2089_v45, %v4287_v63  ;;  %v3142_v63 = vld [vmem:[%s4771_s3 + $0xf4] sm:$0xf] }
 0x27b   : > { %v2331_v19 = vmax.f32 %v2216_v13, 0.0  ;;  %v1961_v58 = vadd.f32 %v1960_v20, %v1832_v21  ;;  %v1834_v54 = vadd.f32 %v1833_v62, %v4297_v59  ;;  %v2996_v53 = vor.u32 %v3142_v63, %v2993_v5  ;;  %v4472_v62 = vpop.permute.xlu1 %1470 }
 0x27d   : > { %3075 = vmatmul.msk.bf16.gmra.mxu1 %vm1719_vm0, %v2988_v44  ;;  %3099 = vmatmul.msk.bf16.gmra.mxu3 %vm1719_vm0, %v2988_v44  ;;  %v2511_v55 = vmax.f32 %v2330_v37, %v2331_v19  ;;  %v2332_v36 = vmax.f32 %v1961_v58, 0.0  ;;  %v3145_v44 = vld [vmem:[%s4771_s3 + $0x104] sm:$0xf0] }
 0x27e   : > { %v4475_v21 = vpop.permute.xlu0 %1480 }
 0x27f   : > { %2669 = vmax.xlane.f32.xlu0 %v2511_v55 }
 0x280   : > { %v2218_v46 = vpop.f32.mrf.mxu3 }
 0x281   : > { %v2091_v40 = vpop.f32.mrf.mxu2  ;;  %v2219_v3 = vadd.f32 %v2218_v46, %v2090_v48  ;;  %v4477_v46 = vpop.permute.xlu2 %1490 }
 0x282   : > { %v1836_v32 = vpop.f32.mrf.mxu0  ;;  %v1962_v47 = vpop.f32.mrf.mxu1  ;;  %v2092_v41 = vadd.f32 %v2091_v40, %v4297_v59  ;;  %v2999_v59 = vld [vmem:[%s4771_s3 + $0x100] sm:$0xf] }
 0x283   : > { %v2333_v49 = vmax.f32 %v2219_v3, 0.0  ;;  %v1963_v50 = vadd.f32 %v1962_v47, %v1834_v54  ;;  %v1837_v45 = vadd.f32 %v1836_v32, %v4311_v16  ;;  %v3000_v52 = vor.u32 %v3145_v44, %v2999_v59  ;;  %v3001_v47 = vld [vmem:[%s4771_s3 + $0x108] sm:$0xf0] }
 0x285   : > { %v2512_v34 = vmax.f32 %v2332_v36, %v2333_v49  ;;  %1875 = vmatmul.bf16.gmra.mxu0 %v2992_v26  ;;  %v2334_v33 = vmax.f32 %v1963_v50, 0.0 }
 0x286   : > { %2133 = vmatmul.bf16.gmra.mxu2 %v2992_v26 }
 0x287   : > { %2671 = vmax.xlane.f32.xlu1 %v2512_v34  ;;  %v4488_v34 = vpop.permute.xlu1 %1485 }
 0x288   : > { %v2220_v8 = vpop.f32.mrf.mxu3 }
 0x289   : > { %v2094_v27 = vpop.f32.mrf.mxu2  ;;  %v2221_v43 = vadd.f32 %v2220_v8, %v2092_v41 }
 0x28a   : > { %v1838_v11 = vpop.f32.mrf.mxu0  ;;  %v1965_v24 = vpop.f32.mrf.mxu1  ;;  %v2095_v20 = vadd.f32 %v2094_v27, %v4311_v16  ;;  %v3144_v16 = vld [vmem:[%s4771_s3 + $0x104] sm:$0xf] }
 0x28b   : > { %v2335_v57 = vmax.f32 %v2221_v43, 0.0  ;;  %v1966_v37 = vadd.f32 %v1965_v24, %v1837_v45  ;;  %v1839_v26 = vadd.f32 %v1838_v11, %v4308_v22  ;;  %v3004_v41 = vor.u32 %v3144_v16, %v3001_v47  ;;  %v4495_v27 = vpop.permute.xlu0 %1495 }
 0x28d   : > { %3076 = vmatmul.msk.bf16.gmra.mxu1 %vm1719_vm0, %v2996_v53  ;;  %3100 = vmatmul.msk.bf16.gmra.mxu3 %vm1719_vm0, %v2996_v53  ;;  %v2513_v13 = vmax.f32 %v2334_v33, %v2335_v57  ;;  %v2336_v40 = vmax.f32 %v1966_v37, 0.0  ;;  %v3007_v33 = vld [vmem:[%s4771_s3 + $0x110] sm:$0xf]  ;;  %v3147_v57 = vld [vmem:[%s4771_s3 + $0x114] sm:$0xf0] }
 0x28e   : > { %v3008_v37 = vor.u32 %v3147_v57, %v3007_v33 }
 0x28f   : > { %2673 = vmax.xlane.f32.xlu2 %v2513_v13 }
 0x290   : > { %v2223_v19 = vpop.f32.mrf.mxu3 }
 0x291   : > { %v2096_v55 = vpop.f32.mrf.mxu2  ;;  %v2224_v12 = vadd.f32 %v2223_v19, %v2095_v20 }
 0x292   : > { %v1841_v48 = vpop.f32.mrf.mxu0  ;;  %v1967_v58 = vpop.f32.mrf.mxu1  ;;  %v2097_v36 = vadd.f32 %v2096_v55, %v4308_v22 }
 0x293   : > { %v2337_v3 = vmax.f32 %v2224_v12, 0.0  ;;  %v1968_v49 = vadd.f32 %v1967_v58, %v1839_v26  ;;  %v1842_v11 = vadd.f32 %v1841_v48, %v4320_v10  ;;  %v4509_v12 = vpop.permute.xlu1 %1500  ;;  %v3009_v26 = vld [vmem:[%s4771_s3 + $0x118] sm:$0xf0] }
 0x295   : > { %v2514_v32 = vmax.f32 %v2336_v40, %v2337_v3  ;;  %1880 = vmatmul.bf16.gmra.mxu0 %v3000_v52  ;;  %v2338_v22 = vmax.f32 %v1968_v49, 0.0 }
 0x296   : > { %2138 = vmatmul.bf16.gmra.mxu2 %v3000_v52 }
 0x297   : > { %2675 = vmax.xlane.f32.xlu0 %v2514_v32 }
 0x298   : > { %v2225_v54 = vpop.f32.mrf.mxu3 }
 0x299   : > { %v2099_v63 = vpop.f32.mrf.mxu2  ;;  %v2226_v5 = vadd.f32 %v2225_v54, %v2097_v36 }
 0x29a   : > { %v1843_v50 = vpop.f32.mrf.mxu0  ;;  %v1970_v8 = vpop.f32.mrf.mxu1  ;;  %v2100_v45 = vadd.f32 %v2099_v63, %v4320_v10  ;;  %v3146_v10 = vld [vmem:[%s4771_s3 + $0x114] sm:$0xf] }
 0x29b   : > { %v2339_v43 = vmax.f32 %v2226_v5, 0.0  ;;  %v2648_v53 = vpop.xlane.xlu2 %2647  ;;  %v1971_v13 = vadd.f32 %v1970_v8, %v1842_v11  ;;  %v1844_v40 = vadd.f32 %v1843_v50, %v4334_v38  ;;  %v3012_v54 = vor.u32 %v3146_v10, %v3009_v26 }
 0x29c   : > { %2744 = vst.msk [vmem:[%s4493_s16] sm:$0xff] %vm2743_vm1, %v2648_v53  ;;  %v3149_v53 = vld [vmem:[%s4771_s3 + $0x124] sm:$0xf0] }
 0x29d   : > { %3077 = vmatmul.msk.bf16.gmra.mxu1 %vm1719_vm0, %v3004_v41  ;;  %3101 = vmatmul.msk.bf16.gmra.mxu3 %vm1719_vm0, %v3004_v41  ;;  %v2515_v24 = vmax.f32 %v2338_v22, %v2339_v43  ;;  %v2340_v52 = vmax.f32 %v1971_v13, 0.0  ;;  %v3015_v43 = vld [vmem:[%s4771_s3 + $0x120] sm:$0xf] }
 0x29e   : > { %v3016_v13 = vor.u32 %v3149_v53, %v3015_v43 }
 0x29f   : > { %2677 = vmax.xlane.f32.xlu1 %v2515_v24 }
 0x2a0   : > { %v2228_v59 = vpop.f32.mrf.mxu3 }
 0x2a1   : > { %v2101_v44 = vpop.f32.mrf.mxu2  ;;  %v2229_v20 = vadd.f32 %v2228_v59, %v2100_v45 }
 0x2a2   : > { %v1846_v19 = vpop.f32.mrf.mxu0  ;;  %v1972_v55 = vpop.f32.mrf.mxu1  ;;  %v2102_v32 = vadd.f32 %v2101_v44, %v4334_v38 }
 0x2a3   : > { %v2341_v48 = vmax.f32 %v2229_v20, 0.0  ;;  %v2650_v58 = vpop.xlane.xlu0 %2649  ;;  %v1973_v16 = vadd.f32 %v1972_v55, %v1844_v40  ;;  %v1847_v22 = vadd.f32 %v1846_v19, %v4323_v35 }
 0x2a4   : > { %2745 = vst.msk [vmem:[%s4493_s16 + $0x8] sm:$0xff] %vm2743_vm1, %v2650_v58 }
 0x2a5   : > { %v2516_v3 = vmax.f32 %v2340_v52, %v2341_v48  ;;  %1885 = vmatmul.bf16.gmra.mxu0 %v3008_v37  ;;  %v2342_v41 = vmax.f32 %v1973_v16, 0.0  ;;  %v3017_v48 = vld [vmem:[%s4771_s3 + $0x128] sm:$0xf0] }
 0x2a6   : > { %2143 = vmatmul.bf16.gmra.mxu2 %v3008_v37 }
 0x2a7   : > { %2679 = vmax.xlane.f32.xlu2 %v2516_v3 }
 0x2a8   : > { %v2230_v47 = vpop.f32.mrf.mxu3 }
 0x2a9   : > { %v2104_v36 = vpop.f32.mrf.mxu2  ;;  %v2231_v49 = vadd.f32 %v2230_v47, %v2102_v32 }
 0x2aa   : > { %v1848_v63 = vpop.f32.mrf.mxu0  ;;  %v1975_v5 = vpop.f32.mrf.mxu1  ;;  %v2105_v11 = vadd.f32 %v2104_v36, %v4323_v35  ;;  %v3148_v35 = vld [vmem:[%s4771_s3 + $0x124] sm:$0xf] }
 0x2ab   : > { %v2343_v50 = vmax.f32 %v2231_v49, 0.0  ;;  %v2652_v8 = vpop.xlane.xlu1 %2651  ;;  %v1976_v24 = vadd.f32 %v1975_v5, %v1847_v22  ;;  %v1849_v55 = vadd.f32 %v1848_v63, %v4337_v6  ;;  %v3020_v32 = vor.u32 %v3148_v35, %v3017_v48  ;;  %v3023_v5 = vld [vmem:[%s4771_s3 + $0x130] sm:$0xf] }
 0x2ac   : > { %2746 = vst.msk [vmem:[%s4493_s16 + $0x10] sm:$0xff] %vm2743_vm1, %v2652_v8 }
 0x2ad   : > { %3078 = vmatmul.msk.bf16.gmra.mxu1 %vm1719_vm0, %v3012_v54  ;;  %3102 = vmatmul.msk.bf16.gmra.mxu3 %vm1719_vm0, %v3012_v54  ;;  %v2517_v38 = vmax.f32 %v2342_v41, %v2343_v50  ;;  %v2344_v20 = vmax.f32 %v1976_v24, 0.0  ;;  %v3151_v41 = vld [vmem:[%s4771_s3 + $0x134] sm:$0xf0] }
 0x2ae   : > { %v3024_v53 = vor.u32 %v3151_v41, %v3023_v5 }
 0x2af   : > { %2681 = vmax.xlane.f32.xlu0 %v2517_v38 }
 0x2b0   : > { %v2233_v33 = vpop.f32.mrf.mxu3 }
 0x2b1   : > { %v2106_v57 = vpop.f32.mrf.mxu2  ;;  %v2234_v45 = vadd.f32 %v2233_v33, %v2105_v11 }
 0x2b2   : > { %v1851_v59 = vpop.f32.mrf.mxu0  ;;  %v1977_v44 = vpop.f32.mrf.mxu1  ;;  %v2107_v58 = vadd.f32 %v2106_v57, %v4337_v6 }
 0x2b3   : > { %v2345_v37 = vmax.f32 %v2234_v45, 0.0  ;;  %v2654_v19 = vpop.xlane.xlu2 %2653  ;;  %v1978_v40 = vadd.f32 %v1977_v44, %v1849_v55  ;;  %v1852_v63 = vadd.f32 %v1851_v59, %v4349_v4  ;;  %v3025_v44 = vld [vmem:[%s4771_s3 + $0x138] sm:$0xf0] }
 0x2b4   : > { %2747 = vst.msk [vmem:[%s4493_s16 + $0x18] sm:$0xff] %vm2743_vm1, %v2654_v19 }
 0x2b5   : > { %v2518_v52 = vmax.f32 %v2344_v20, %v2345_v37  ;;  %1890 = vmatmul.bf16.gmra.mxu0 %v3016_v13  ;;  %v2346_v36 = vmax.f32 %v1978_v40, 0.0 }
 0x2b6   : > { %2148 = vmatmul.bf16.gmra.mxu2 %v3016_v13 }
 0x2b7   : > { %2683 = vmax.xlane.f32.xlu1 %v2518_v52 }
 0x2b8   : > { %v2235_v3 = vpop.f32.mrf.mxu3 }
 0x2b9   : > { %v2109_v10 = vpop.f32.mrf.mxu2  ;;  %v2236_v26 = vadd.f32 %v2235_v3, %v2107_v58 }
 0x2ba   : > { %v1853_v16 = vpop.f32.mrf.mxu0  ;;  %v1980_v47 = vpop.f32.mrf.mxu1  ;;  %v2110_v50 = vadd.f32 %v2109_v10, %v4349_v4  ;;  %v3150_v4 = vld [vmem:[%s4771_s3 + $0x134] sm:$0xf] }
 0x2bb   : > { %v2347_v49 = vmax.f32 %v2236_v26, 0.0  ;;  %v2656_v54 = vpop.xlane.xlu2 %2655  ;;  %v1981_v8 = vadd.f32 %v1980_v47, %v1852_v63  ;;  %v1854_v13 = vadd.f32 %v1853_v16, %v4339_v14  ;;  %v3028_v35 = vor.u32 %v3150_v4, %v3025_v44  ;;  %v3153_v16 = vld [vmem:[%s4771_s3 + $0x144] sm:$0xf0] }
 0x2bc   : > { %2748 = vst.msk [vmem:[%s4493_s16 + $0x20] sm:$0xff] %vm2743_vm1, %v2656_v54 }
 0x2bd   : > { %3079 = vmatmul.msk.bf16.gmra.mxu1 %vm1719_vm0, %v3020_v32  ;;  %3103 = vmatmul.msk.bf16.gmra.mxu3 %vm1719_vm0, %v3020_v32  ;;  %v2519_v6 = vmax.f32 %v2346_v36, %v2347_v49  ;;  %v2348_v33 = vmax.f32 %v1981_v8, 0.0  ;;  %v3031_v32 = vld [vmem:[%s4771_s3 + $0x140] sm:$0xf] }
 0x2bf   : > { %2685 = vmax.xlane.f32.xlu2 %v2519_v6  ;;  %v3032_v6 = vor.u32 %v3153_v16, %v3031_v32 }
 0x2c0   : > { %v2238_v22 = vpop.f32.mrf.mxu3 }
 0x2c1   : > { %v2111_v38 = vpop.f32.mrf.mxu2  ;;  %v2239_v43 = vadd.f32 %v2238_v22, %v2110_v50 }
 0x2c2   : > { %v1856_v11 = vpop.f32.mrf.mxu0  ;;  %v1982_v24 = vpop.f32.mrf.mxu1  ;;  %v2112_v20 = vadd.f32 %v2111_v38, %v4339_v14 }
 0x2c3   : > { %v2349_v57 = vmax.f32 %v2239_v43, 0.0  ;;  %v2658_v45 = vpop.xlane.xlu0 %2657  ;;  %v1983_v37 = vadd.f32 %v1982_v24, %v1854_v13  ;;  %v1857_v26 = vadd.f32 %v1856_v11, %v4351_v30 }
 0x2c4   : > { %2749 = vst.msk [vmem:[%s4493_s16 + $0x28] sm:$0xff] %vm2743_vm1, %v2658_v45 }
 0x2c5   : > { %v2520_v59 = vmax.f32 %v2348_v33, %v2349_v57  ;;  %1895 = vmatmul.bf16.gmra.mxu0 %v3024_v53  ;;  %v2350_v40 = vmax.f32 %v1983_v37, 0.0 }
 0x2c6   : > { %2153 = vmatmul.bf16.gmra.mxu2 %v3024_v53  ;;  %v3033_v53 = vld [vmem:[%s4771_s3 + $0x148] sm:$0xf0] }
 0x2c7   : > { %2687 = vmax.xlane.f32.xlu0 %v2520_v59 }
 0x2c8   : > { %v2240_v19 = vpop.f32.mrf.mxu3 }
 0x2c9   : > { %v2114_v55 = vpop.f32.mrf.mxu2  ;;  %v2241_v52 = vadd.f32 %v2240_v19, %v2112_v20 }
 0x2ca   : > { %v1858_v48 = vpop.f32.mrf.mxu0  ;;  %v1985_v58 = vpop.f32.mrf.mxu1  ;;  %v2115_v47 = vadd.f32 %v2114_v55, %v4351_v30  ;;  %v3152_v30 = vld [vmem:[%s4771_s3 + $0x144] sm:$0xf]  ;;  %v3039_v55 = vld [vmem:[%s4771_s3 + $0x150] sm:$0xf] }
 0x2cb   : > { %v2351_v3 = vmax.f32 %v2241_v52, 0.0  ;;  %v2660_v10 = vpop.xlane.xlu1 %2659  ;;  %v1986_v36 = vadd.f32 %v1985_v58, %v1857_v26  ;;  %v1859_v38 = vadd.f32 %v1858_v48, %v4365_v23  ;;  %v3036_v13 = vor.u32 %v3152_v30, %v3033_v53  ;;  %v3155_v52 = vld [vmem:[%s4771_s3 + $0x154] sm:$0xf0] }
 0x2cc   : > { %2750 = vst.msk [vmem:[%s4493_s16 + $0x30] sm:$0xff] %vm2743_vm1, %v2660_v10  ;;  %v3040_v10 = vor.u32 %v3155_v52, %v3039_v55 }
 0x2cd   : > { %3080 = vmatmul.msk.bf16.gmra.mxu1 %vm1719_vm0, %v3028_v35  ;;  %3104 = vmatmul.msk.bf16.gmra.mxu3 %vm1719_vm0, %v3028_v35  ;;  %v2521_v14 = vmax.f32 %v2350_v40, %v2351_v3  ;;  %v2352_v50 = vmax.f32 %v1986_v36, 0.0 }
 0x2cf   : > { %2689 = vmax.xlane.f32.xlu1 %v2521_v14 }
 0x2d0   : > { %v2243_v49 = vpop.f32.mrf.mxu3 }
 0x2d1   : > { %v2116_v54 = vpop.f32.mrf.mxu2  ;;  %v2244_v63 = vadd.f32 %v2243_v49, %v2115_v47 }
 0x2d2   : > { %v1861_v5 = vpop.f32.mrf.mxu0  ;;  %v1987_v41 = vpop.f32.mrf.mxu1  ;;  %v2117_v11 = vadd.f32 %v2116_v54, %v4365_v23  ;;  %v3041_v54 = vld [vmem:[%s4771_s3 + $0x158] sm:$0xf0] }
 0x2d3   : > { %v2353_v8 = vmax.f32 %v2244_v63, 0.0  ;;  %v2662_v22 = vpop.xlane.xlu2 %2661  ;;  %v1988_v24 = vadd.f32 %v1987_v41, %v1859_v38  ;;  %v1862_v19 = vadd.f32 %v1861_v5, %v4353_v7 }
 0x2d4   : > { %2751 = vst.msk [vmem:[%s4493_s16 + $0x38] sm:$0xff] %vm2743_vm1, %v2662_v22 }
 0x2d5   : > { %v2522_v43 = vmax.f32 %v2352_v50, %v2353_v8  ;;  %1900 = vmatmul.bf16.gmra.mxu0 %v3032_v6  ;;  %v2354_v44 = vmax.f32 %v1988_v24, 0.0 }
 0x2d6   : > { %2158 = vmatmul.bf16.gmra.mxu2 %v3032_v6 }
 0x2d7   : > { %2691 = vmax.xlane.f32.xlu2 %v2522_v43 }
 0x2d8   : > { %v2245_v33 = vpop.f32.mrf.mxu3 }
 0x2d9   : > { %v2119_v57 = vpop.f32.mrf.mxu2  ;;  %v2246_v45 = vadd.f32 %v2245_v33, %v2117_v11  ;;  %v3157_v33 = vld [vmem:[%s4771_s3 + $0x164] sm:$0xf0] }
 0x2da   : > { %v1863_v59 = vpop.f32.mrf.mxu0  ;;  %v1990_v4 = vpop.f32.mrf.mxu1  ;;  %v2120_v35 = vadd.f32 %v2119_v57, %v4353_v7  ;;  %v3154_v7 = vld [vmem:[%s4771_s3 + $0x154] sm:$0xf] }
 0x2db   : > { %v2355_v20 = vmax.f32 %v2246_v45, 0.0  ;;  %v2664_v37 = vpop.xlane.xlu0 %2663  ;;  %v1991_v48 = vadd.f32 %v1990_v4, %v1862_v19  ;;  %v1864_v36 = vadd.f32 %v1863_v59, %v4367_v0  ;;  %v3044_v8 = vor.u32 %v3154_v7, %v3041_v54 }
 0x2dc   : > { %2752 = vst.msk [vmem:[%s4493_s16 + $0x40] sm:$0xff] %vm2743_vm1, %v2664_v37 }
 0x2dd   : > { %3081 = vmatmul.msk.bf16.gmra.mxu1 %vm1719_vm0, %v3036_v13  ;;  %3105 = vmatmul.msk.bf16.gmra.mxu3 %vm1719_vm0, %v3036_v13  ;;  %v2523_v23 = vmax.f32 %v2354_v44, %v2355_v20  ;;  %v2356_v32 = vmax.f32 %v1991_v48, 0.0  ;;  %v3049_v48 = vld [vmem:[%s4771_s3 + $0x168] sm:$0xf0] }
 0x2df   : > { %2693 = vmax.xlane.f32.xlu0 %v2523_v23 }
 0x2e0   : > { %v2248_v58 = vpop.f32.mrf.mxu3 }
 0x2e1   : > { %v2121_v40 = vpop.f32.mrf.mxu2  ;;  %v2249_v3 = vadd.f32 %v2248_v58, %v2120_v35 }
 0x2e2   : > { %v1866_v26 = vpop.f32.mrf.mxu0  ;;  %v1992_v14 = vpop.f32.mrf.mxu1  ;;  %v2122_v63 = vadd.f32 %v2121_v40, %v4367_v0  ;;  %v3047_v0 = vld [vmem:[%s4771_s3 + $0x160] sm:$0xf] }
 0x2e3   : > { %v2357_v16 = vmax.f32 %v2249_v3, 0.0  ;;  %v2666_v47 = vpop.xlane.xlu1 %2665  ;;  %v1993_v6 = vadd.f32 %v1992_v14, %v1864_v36  ;;  %v1867_v11 = vadd.f32 %v1866_v26, %v4379_v39  ;;  %v3048_v44 = vor.u32 %v3157_v33, %v3047_v0  ;;  %v3057_v33 = vld [vmem:[%s4771_s3 + $0x178] sm:$0xf0] }
 0x2e4   : > { %2753 = vst.msk [vmem:[%s4493_s16 + $0x48] sm:$0xff] %vm2743_vm1, %v2666_v47 }
 0x2e5   : > { %v2524_v49 = vmax.f32 %v2356_v32, %v2357_v16  ;;  %1905 = vmatmul.bf16.gmra.mxu0 %v3040_v10  ;;  %v2358_v43 = vmax.f32 %v1993_v6, 0.0 }
 0x2e6   : > { %2163 = vmatmul.bf16.gmra.mxu2 %v3040_v10 }
 0x2e7   : > { %2695 = vmax.xlane.f32.xlu1 %v2524_v49 }
 0x2e8   : > { %v2250_v5 = vpop.f32.mrf.mxu3 }
 0x2e9   : > { %v2124_v41 = vpop.f32.mrf.mxu2  ;;  %v2251_v50 = vadd.f32 %v2250_v5, %v2122_v63  ;;  %v3159_v63 = vld [vmem:[%s4771_s3 + $0x174] sm:$0xf0] }
 0x2ea   : > { %v1868_v22 = vpop.f32.mrf.mxu0  ;;  %v1995_v38 = vpop.f32.mrf.mxu1  ;;  %v2125_v57 = vadd.f32 %v2124_v41, %v4379_v39  ;;  %v3156_v39 = vld [vmem:[%s4771_s3 + $0x164] sm:$0xf] }
 0x2eb   : > { %v2359_v30 = vmax.f32 %v2251_v50, 0.0  ;;  %v2668_v53 = vpop.xlane.xlu2 %2667  ;;  %v1996_v45 = vadd.f32 %v1995_v38, %v1867_v11  ;;  %v1869_v52 = vadd.f32 %v1868_v22, %v4376_v17  ;;  %v3052_v14 = vor.u32 %v3156_v39, %v3049_v48 }
 0x2ec   : > { %2754 = vst.msk [vmem:[%s4493_s16 + $0x50] sm:$0xff] %vm2743_vm1, %v2668_v53 }
 0x2ed   : > { %v2525_v24 = vmax.f32 %v2358_v43, %v2359_v30  ;;  %3082 = vmatmul.msk.bf16.gmra.mxu1 %vm1719_vm0, %v3044_v8  ;;  %3106 = vmatmul.msk.bf16.gmra.mxu3 %vm1719_vm0, %v3044_v8  ;;  %v2360_v19 = vmax.f32 %v1996_v45, 0.0 }
 0x2ef   : > { %2697 = vmax.xlane.f32.xlu2 %v2525_v24 }
 0x2f0   : > { %v2253_v13 = vpop.f32.mrf.mxu3 }
 0x2f1   : > { %v2126_v59 = vpop.f32.mrf.mxu2  ;;  %v2254_v4 = vadd.f32 %v2253_v13, %v2125_v57 }
 0x2f2   : > { %v1871_v20 = vpop.f32.mrf.mxu0  ;;  %v1997_v37 = vpop.f32.mrf.mxu1  ;;  %v2127_v58 = vadd.f32 %v2126_v59, %v4376_v17  ;;  %v3055_v17 = vld [vmem:[%s4771_s3 + $0x170] sm:$0xf] }
 0x2f3   : > { %v2361_v23 = vmax.f32 %v2254_v4, 0.0  ;;  %v2670_v55 = vpop.xlane.xlu0 %2669  ;;  %v1998_v40 = vadd.f32 %v1997_v37, %v1869_v52  ;;  %v1872_v7 = vadd.f32 %v1871_v20, %v4390_v2  ;;  %v3056_v22 = vor.u32 %v3159_v63, %v3055_v17 }
 0x2f4   : > { %2755 = vst.msk [vmem:[%s4493_s16 + $0x58] sm:$0xff] %vm2743_vm1, %v2670_v55 }
 0x2f5   : > { %v2526_v35 = vmax.f32 %v2360_v19, %v2361_v23  ;;  %1910 = vmatmul.bf16.gmra.mxu0 %v3048_v44  ;;  %v2362_v47 = vmax.f32 %v1998_v40, 0.0 }
 0x2f6   : > { %2168 = vmatmul.bf16.gmra.mxu2 %v3048_v44 }
 0x2f7   : > { %2699 = vmax.xlane.f32.xlu0 %v2526_v35 }
 0x2f8   : > { %v2255_v3 = vpop.f32.mrf.mxu3 }
 0x2f9   : > { %v2129_v10 = vpop.f32.mrf.mxu2  ;;  %v2256_v26 = vadd.f32 %v2255_v3, %v2127_v58 }
 0x2fa   : > { %v1873_v32 = vpop.f32.mrf.mxu0  ;;  %v2000_v16 = vpop.f32.mrf.mxu1  ;;  %v2130_v6 = vadd.f32 %v2129_v10, %v4390_v2  ;;  %v3158_v2 = vld [vmem:[%s4771_s3 + $0x174] sm:$0xf] }
 0x2fb   : > { %v2363_v36 = vmax.f32 %v2256_v26, 0.0  ;;  %v2672_v49 = vpop.xlane.xlu1 %2671  ;;  %v2001_v5 = vadd.f32 %v2000_v16, %v1872_v7  ;;  %v1874_v24 = vadd.f32 %v1873_v32, %v4402_v1  ;;  %v3060_v44 = vor.u32 %v3158_v2, %v3057_v33 }
 0x2fc   : > { %2756 = vst.msk [vmem:[%s4493_s16 + $0x60] sm:$0xff] %vm2743_vm1, %v2672_v49 }
 0x2fd   : > { %v2527_v54 = vmax.f32 %v2362_v47, %v2363_v36  ;;  %3083 = vmatmul.msk.bf16.gmra.mxu1 %vm1719_vm0, %v3052_v14  ;;  %3107 = vmatmul.msk.bf16.gmra.mxu3 %vm1719_vm0, %v3052_v14  ;;  %v2364_v30 = vmax.f32 %v2001_v5, 0.0 }
 0x2ff   : > { %2701 = vmax.xlane.f32.xlu1 %v2527_v54 }
 0x300   : > { %v2258_v41 = vpop.f32.mrf.mxu3 }
 0x301   : > { %v2131_v50 = vpop.f32.mrf.mxu2  ;;  %v2259_v8 = vadd.f32 %v2258_v41, %v2130_v6 }
 0x302   : > { %v1876_v38 = vpop.f32.mrf.mxu0  ;;  %v2002_v43 = vpop.f32.mrf.mxu1  ;;  %v2132_v57 = vadd.f32 %v2131_v50, %v4402_v1 }
 0x303   : > { %v2365_v53 = vmax.f32 %v2259_v8, 0.0  ;;  %v2674_v11 = vpop.xlane.xlu2 %2673  ;;  %v2003_v45 = vadd.f32 %v2002_v43, %v1874_v24  ;;  %v1877_v52 = vadd.f32 %v1876_v38, %v4393_v9 }
 0x304   : > { %2757 = vst.msk [vmem:[%s4493_s16 + $0x68] sm:$0xff] %vm2743_vm1, %v2674_v11 }
 0x305   : > { %v2528_v0 = vmax.f32 %v2364_v30, %v2365_v53  ;;  %1915 = vmatmul.bf16.gmra.mxu0 %v3056_v22  ;;  %v2366_v19 = vmax.f32 %v2003_v45, 0.0 }
 0x306   : > { %2173 = vmatmul.bf16.gmra.mxu2 %v3056_v22 }
 0x307   : > { %2703 = vmax.xlane.f32.xlu2 %v2528_v0 }
 0x308   : > { %v2260_v13 = vpop.f32.mrf.mxu3 }
 0x309   : > { %v2134_v59 = vpop.f32.mrf.mxu2  ;;  %v2261_v4 = vadd.f32 %v2260_v13, %v2132_v57 }
 0x30a   : > { %v1878_v20 = vpop.f32.mrf.mxu0  ;;  %v2005_v37 = vpop.f32.mrf.mxu1  ;;  %v2135_v1 = vadd.f32 %v2134_v59, %v4393_v9 }
 0x30b   : > { %v2367_v23 = vmax.f32 %v2261_v4, 0.0  ;;  %v2676_v55 = vpop.xlane.xlu0 %2675  ;;  %v2006_v39 = vadd.f32 %v2005_v37, %v1877_v52  ;;  %v1879_v16 = vadd.f32 %v1878_v20, %v4405_v56 }
 0x30c   : > { %2758 = vst.msk [vmem:[%s4493_s16 + $0x70] sm:$0xff] %vm2743_vm1, %v2676_v55 }
 0x30d   : > { %v2529_v35 = vmax.f32 %v2366_v19, %v2367_v23  ;;  %3084 = vmatmul.msk.bf16.gmra.mxu1 %vm1719_vm0, %v3060_v44  ;;  %3108 = vmatmul.msk.bf16.gmra.mxu3 %vm1719_vm0, %v3060_v44  ;;  %v2368_v26 = vmax.f32 %v2006_v39, 0.0 }
 0x30f   : > { %2705 = vmax.xlane.f32.xlu0 %v2529_v35 }
 0x310   : > { %v2263_v48 = vpop.f32.mrf.mxu3 }
 0x311   : > { %v2136_v58 = vpop.f32.mrf.mxu2  ;;  %v2264_v40 = vadd.f32 %v2263_v48, %v2135_v1 }
 0x312   : > { %v1881_v3 = vpop.f32.mrf.mxu0  ;;  %v2007_v10 = vpop.f32.mrf.mxu1  ;;  %v2137_v36 = vadd.f32 %v2136_v58, %v4405_v56 }
 0x313   : > { %v2369_v14 = vmax.f32 %v2264_v40, 0.0  ;;  %v2678_v32 = vpop.xlane.xlu1 %2677  ;;  %v2008_v49 = vadd.f32 %v2007_v10, %v1879_v16  ;;  %v1882_v50 = vadd.f32 %v1881_v3, %v4419_v29 }
 0x314   : > { %2759 = vst.msk [vmem:[%s4493_s16 + $0x78] sm:$0xff] %vm2743_vm1, %v2678_v32 }
 0x315   : > { %v2530_v47 = vmax.f32 %v2368_v26, %v2369_v14  ;;  %v2370_v6 = vmax.f32 %v2008_v49, 0.0 }
 0x317   : > { %2707 = vmax.xlane.f32.xlu1 %v2530_v47 }
 0x318   : > { %v2265_v9 = vpop.f32.mrf.mxu3 }
 0x319   : > { %v2139_v7 = vpop.f32.mrf.mxu2  ;;  %v2266_v54 = vadd.f32 %v2265_v9, %v2137_v36 }
 0x31a   : > { %v1883_v17 = vpop.f32.mrf.mxu0  ;;  %v2010_v63 = vpop.f32.mrf.mxu1  ;;  %v2140_v22 = vadd.f32 %v2139_v7, %v4419_v29 }
 0x31b   : > { %v2371_v5 = vmax.f32 %v2266_v54, 0.0  ;;  %v2680_v41 = vpop.xlane.xlu2 %2679  ;;  %v2011_v38 = vadd.f32 %v2010_v63, %v1882_v50  ;;  %v1884_v33 = vadd.f32 %v1883_v17, %v4407_v28 }
 0x31c   : > { %2760 = vst.msk [vmem:[%s4493_s16 + $0x80] sm:$0xff] %vm2743_vm1, %v2680_v41 }
 0x31d   : > { %v2531_v8 = vmax.f32 %v2370_v6, %v2371_v5  ;;  %v2372_v24 = vmax.f32 %v2011_v38, 0.0 }
 0x31f   : > { %2709 = vmax.xlane.f32.xlu2 %v2531_v8 }
 0x320   : > { %v2268_v56 = vpop.f32.mrf.mxu3 }
 0x321   : > { %v2141_v43 = vpop.f32.mrf.mxu2  ;;  %v2269_v30 = vadd.f32 %v2268_v56, %v2140_v22 }
 0x322   : > { %v1886_v53 = vpop.f32.mrf.mxu0  ;;  %v2012_v11 = vpop.f32.mrf.mxu1  ;;  %v2142_v45 = vadd.f32 %v2141_v43, %v4407_v28 }
 0x323   : > { %v2373_v0 = vmax.f32 %v2269_v30, 0.0  ;;  %v2682_v2 = vpop.xlane.xlu0 %2681  ;;  %v2013_v13 = vadd.f32 %v2012_v11, %v1884_v33  ;;  %v1887_v55 = vadd.f32 %v1886_v53, %v4421_v61 }
 0x324   : > { %2761 = vst.msk [vmem:[%s4493_s16 + $0x88] sm:$0xff] %vm2743_vm1, %v2682_v2 }
 0x325   : > { %v2532_v57 = vmax.f32 %v2372_v24, %v2373_v0  ;;  %v2374_v37 = vmax.f32 %v2013_v13, 0.0 }
 0x327   : > { %2711 = vmax.xlane.f32.xlu0 %v2532_v57 }
 0x328   : > { %v2270_v29 = vpop.f32.mrf.mxu3 }
 0x329   : > { %v2144_v59 = vpop.f32.mrf.mxu2  ;;  %v2271_v4 = vadd.f32 %v2270_v29, %v2142_v45 }
 0x32a   : > { %v1888_v44 = vpop.f32.mrf.mxu0  ;;  %v2015_v20 = vpop.f32.mrf.mxu1  ;;  %v2145_v35 = vadd.f32 %v2144_v59, %v4421_v61 }
 0x32b   : > { %v2375_v19 = vmax.f32 %v2271_v4, 0.0  ;;  %v2684_v23 = vpop.xlane.xlu1 %2683  ;;  %v2016_v1 = vadd.f32 %v2015_v20, %v1887_v55  ;;  %v1889_v14 = vadd.f32 %v1888_v44, %v4433_v51 }
 0x32c   : > { %2762 = vst.msk [vmem:[%s4493_s16 + $0x90] sm:$0xff] %vm2743_vm1, %v2684_v23 }
 0x32d   : > { %v2533_v52 = vmax.f32 %v2374_v37, %v2375_v19  ;;  %v2376_v3 = vmax.f32 %v2016_v1, 0.0 }
 0x32f   : > { %2713 = vmax.xlane.f32.xlu1 %v2533_v52 }
 0x330   : > { %v2273_v28 = vpop.f32.mrf.mxu3 }
 0x331   : > { %v2146_v39 = vpop.f32.mrf.mxu2  ;;  %v2274_v48 = vadd.f32 %v2273_v28, %v2145_v35 }
 0x332   : > { %v1891_v58 = vpop.f32.mrf.mxu0  ;;  %v2017_v40 = vpop.f32.mrf.mxu1  ;;  %v2147_v16 = vadd.f32 %v2146_v39, %v4433_v51 }
 0x333   : > { %v2377_v10 = vmax.f32 %v2274_v48, 0.0  ;;  %v2686_v26 = vpop.xlane.xlu2 %2685  ;;  %v2018_v47 = vadd.f32 %v2017_v40, %v1889_v14  ;;  %v1892_v6 = vadd.f32 %v1891_v58, %v4423_v42 }
 0x334   : > { %2763 = vst.msk [vmem:[%s4493_s16 + $0x98] sm:$0xff] %vm2743_vm1, %v2686_v26 }
 0x335   : > { %v2534_v32 = vmax.f32 %v2376_v3, %v2377_v10  ;;  %v2378_v54 = vmax.f32 %v2018_v47, 0.0 }
 0x337   : > { %2715 = vmax.xlane.f32.xlu2 %v2534_v32 }
 0x338   : > { %v2275_v61 = vpop.f32.mrf.mxu3 }
 0x339   : > { %v2149_v36 = vpop.f32.mrf.mxu2  ;;  %v2276_v49 = vadd.f32 %v2275_v61, %v2147_v16 }
 0x33a   : > { %v1893_v9 = vpop.f32.mrf.mxu0  ;;  %v2020_v7 = vpop.f32.mrf.mxu1  ;;  %v2150_v41 = vadd.f32 %v2149_v36, %v4423_v42 }
 0x33b   : > { %v2379_v17 = vmax.f32 %v2276_v49, 0.0  ;;  %v2688_v63 = vpop.xlane.xlu0 %2687  ;;  %v2021_v50 = vadd.f32 %v2020_v7, %v1892_v6  ;;  %v1894_v11 = vadd.f32 %v1893_v9, %v4435_v31 }
 0x33c   : > { %2764 = vst.msk [vmem:[%s4493_s16 + $0xa0] sm:$0xff] %vm2743_vm1, %v2688_v63 }
 0x33d   : > { %v2535_v5 = vmax.f32 %v2378_v54, %v2379_v17  ;;  %v2380_v43 = vmax.f32 %v2021_v50, 0.0 }
 0x33f   : > { %2717 = vmax.xlane.f32.xlu0 %v2535_v5 }
 0x340   : > { %v2278_v51 = vpop.f32.mrf.mxu3 }
 0x341   : > { %v2151_v8 = vpop.f32.mrf.mxu2  ;;  %v2279_v22 = vadd.f32 %v2278_v51, %v2150_v41 }
 0x342   : > { %v1896_v38 = vpop.f32.mrf.mxu0  ;;  %v2022_v56 = vpop.f32.mrf.mxu1  ;;  %v2152_v0 = vadd.f32 %v2151_v8, %v4435_v31 }
 0x343   : > { %v2381_v30 = vmax.f32 %v2279_v22, 0.0  ;;  %v2690_v53 = vpop.xlane.xlu1 %2689  ;;  %v2023_v2 = vadd.f32 %v2022_v56, %v1894_v11  ;;  %v1897_v44 = vadd.f32 %v1896_v38, %v4449_v60 }
 0x344   : > { %2765 = vst.msk [vmem:[%s4493_s16 + $0xa8] sm:$0xff] %vm2743_vm1, %v2690_v53 }
 0x345   : > { %v2536_v24 = vmax.f32 %v2380_v43, %v2381_v30  ;;  %v2382_v29 = vmax.f32 %v2023_v2, 0.0 }
 0x347   : > { %2719 = vmax.xlane.f32.xlu1 %v2536_v24 }
 0x348   : > { %v2280_v42 = vpop.f32.mrf.mxu3 }
 0x349   : > { %v2154_v33 = vpop.f32.mrf.mxu2  ;;  %v2281_v57 = vadd.f32 %v2280_v42, %v2152_v0 }
 0x34a   : > { %v1898_v45 = vpop.f32.mrf.mxu0  ;;  %v2025_v13 = vpop.f32.mrf.mxu1  ;;  %v2155_v37 = vadd.f32 %v2154_v33, %v4449_v60 }
 0x34b   : > { %v2383_v59 = vmax.f32 %v2281_v57, 0.0  ;;  %v2692_v4 = vpop.xlane.xlu2 %2691  ;;  %v2026_v19 = vadd.f32 %v2025_v13, %v1897_v44  ;;  %v1899_v48 = vadd.f32 %v1898_v45, %v4446_v25 }
 0x34c   : > { %2766 = vst.msk [vmem:[%s4493_s16 + $0xb0] sm:$0xff] %vm2743_vm1, %v2692_v4 }
 0x34d   : > { %v2537_v20 = vmax.f32 %v2382_v29, %v2383_v59  ;;  %v2384_v1 = vmax.f32 %v2026_v19, 0.0 }
 0x34f   : > { %2721 = vmax.xlane.f32.xlu2 %v2537_v20 }
 0x350   : > { %v2283_v31 = vpop.f32.mrf.mxu3 }
 0x351   : > { %v2156_v23 = vpop.f32.mrf.mxu2  ;;  %v2284_v55 = vadd.f32 %v2283_v31, %v2155_v37 }
 0x352   : > { %v1901_v52 = vpop.f32.mrf.mxu0  ;;  %v2027_v35 = vpop.f32.mrf.mxu1  ;;  %v2157_v40 = vadd.f32 %v2156_v23, %v4446_v25 }
 0x353   : > { %v2385_v28 = vmax.f32 %v2284_v55, 0.0  ;;  %v2694_v39 = vpop.xlane.xlu0 %2693  ;;  %v2028_v3 = vadd.f32 %v2027_v35, %v1899_v48  ;;  %v1902_v36 = vadd.f32 %v1901_v52, %v4458_v15 }
 0x354   : > { %2767 = vst.msk [vmem:[%s4493_s16 + $0xb8] sm:$0xff] %vm2743_vm1, %v2694_v39 }
 0x355   : > { %v2538_v58 = vmax.f32 %v2384_v1, %v2385_v28  ;;  %v2386_v16 = vmax.f32 %v2028_v3, 0.0 }
 0x357   : > { %2723 = vmax.xlane.f32.xlu0 %v2538_v58 }
 0x358   : > { %v2285_v60 = vpop.f32.mrf.mxu3 }
 0x359   : > { %v2159_v10 = vpop.f32.mrf.mxu2  ;;  %v2286_v26 = vadd.f32 %v2285_v60, %v2157_v40 }
 0x35a   : > { %v1903_v14 = vpop.f32.mrf.mxu0  ;;  %v2030_v32 = vpop.f32.mrf.mxu1  ;;  %v2160_v9 = vadd.f32 %v2159_v10, %v4458_v15 }
 0x35b   : > { %v2387_v47 = vmax.f32 %v2286_v26, 0.0  ;;  %v2696_v61 = vpop.xlane.xlu1 %2695  ;;  %v2031_v7 = vadd.f32 %v2030_v32, %v1902_v36  ;;  %v1904_v51 = vadd.f32 %v1903_v14, %v4472_v62 }
 0x35c   : > { %2768 = vst.msk [vmem:[%s4493_s16 + $0xc0] sm:$0xff] %vm2743_vm1, %v2696_v61 }
 0x35d   : > { %v2539_v49 = vmax.f32 %v2386_v16, %v2387_v47  ;;  %v2388_v5 = vmax.f32 %v2031_v7, 0.0 }
 0x35f   : > { %2725 = vmax.xlane.f32.xlu1 %v2539_v49 }
 0x360   : > { %v2288_v25 = vpop.f32.mrf.mxu3 }
 0x361   : > { %v2161_v54 = vpop.f32.mrf.mxu2  ;;  %v2289_v17 = vadd.f32 %v2288_v25, %v2160_v9 }
 0x362   : > { %v1906_v63 = vpop.f32.mrf.mxu0  ;;  %v2032_v6 = vpop.f32.mrf.mxu1  ;;  %v2162_v22 = vadd.f32 %v2161_v54, %v4472_v62 }
 0x363   : > { %v2389_v41 = vmax.f32 %v2289_v17, 0.0  ;;  %v2698_v50 = vpop.xlane.xlu2 %2697  ;;  %v2033_v38 = vadd.f32 %v2032_v6, %v1904_v51  ;;  %v1907_v2 = vadd.f32 %v1906_v63, %v4461_v18 }
 0x364   : > { %2769 = vst.msk [vmem:[%s4493_s16 + $0xc8] sm:$0xff] %vm2743_vm1, %v2698_v50 }
 0x365   : > { %v2540_v8 = vmax.f32 %v2388_v5, %v2389_v41  ;;  %v2390_v11 = vmax.f32 %v2033_v38, 0.0 }
 0x367   : > { %2727 = vmax.xlane.f32.xlu2 %v2540_v8 }
 0x368   : > { %v2290_v15 = vpop.f32.mrf.mxu3 }
 0x369   : > { %v2164_v56 = vpop.f32.mrf.mxu2  ;;  %v2291_v43 = vadd.f32 %v2290_v15, %v2162_v22 }
 0x36a   : > { %v1908_v30 = vpop.f32.mrf.mxu0  ;;  %v2035_v53 = vpop.f32.mrf.mxu1  ;;  %v2165_v33 = vadd.f32 %v2164_v56, %v4461_v18 }
 0x36b   : > { %v2391_v24 = vmax.f32 %v2291_v43, 0.0  ;;  %v2700_v0 = vpop.xlane.xlu0 %2699  ;;  %v2036_v57 = vadd.f32 %v2035_v53, %v1907_v2  ;;  %v1909_v37 = vadd.f32 %v1908_v30, %v4475_v21 }
 0x36c   : > { %2770 = vst.msk [vmem:[%s4493_s16 + $0xd0] sm:$0xff] %vm2743_vm1, %v2700_v0 }
 0x36d   : > { %v2541_v42 = vmax.f32 %v2390_v11, %v2391_v24  ;;  %v2392_v59 = vmax.f32 %v2036_v57, 0.0 }
 0x36f   : > { %2729 = vmax.xlane.f32.xlu0 %v2541_v42 }
 0x370   : > { %v2293_v62 = vpop.f32.mrf.mxu3 }
 0x371   : > { %v2166_v45 = vpop.f32.mrf.mxu2  ;;  %v2294_v13 = vadd.f32 %v2293_v62, %v2165_v33 }
 0x372   : > { %v2037_v29 = vpop.f32.mrf.mxu1  ;;  %v2702_v44 = vpop.xlane.xlu1 %2701  ;;  %v2167_v31 = vadd.f32 %v2166_v45, %v4475_v21 }
 0x373   : > { %v2393_v4 = vmax.f32 %v2294_v13, 0.0  ;;  %v1911_v20 = vpop.f32.mrf.mxu0  ;;  %2771 = vst.msk [vmem:[%s4493_s16 + $0xd8] sm:$0xff] %vm2743_vm1, %v2702_v44  ;;  %v2038_v23 = vadd.f32 %v2037_v29, %v1909_v37 }
 0x374   : > { %v1912_v48 = vadd.f32 %v1911_v20, %v4488_v34 }
 0x375   : > { %v2542_v19 = vmax.f32 %v2392_v59, %v2393_v4  ;;  %v2394_v1 = vmax.f32 %v2038_v23, 0.0 }
 0x377   : > { %2731 = vmax.xlane.f32.xlu1 %v2542_v19 }
 0x378   : > { %v2295_v18 = vpop.f32.mrf.mxu3 }
 0x379   : > { %v2169_v55 = vpop.f32.mrf.mxu2  ;;  %v2296_v52 = vadd.f32 %v2295_v18, %v2167_v31 }
 0x37a   : > { %v2040_v35 = vpop.f32.mrf.mxu1  ;;  %v2704_v39 = vpop.xlane.xlu2 %2703  ;;  %v2170_v3 = vadd.f32 %v2169_v55, %v4488_v34 }
 0x37b   : > { %v2395_v28 = vmax.f32 %v2296_v52, 0.0  ;;  %2772 = vst.msk [vmem:[%s4493_s16 + $0xe0] sm:$0xff] %vm2743_vm1, %v2704_v39  ;;  %v1913_v40 = vpop.f32.mrf.mxu0  ;;  %v2041_v60 = vadd.f32 %v2040_v35, %v1912_v48 }
 0x37c   : > { %v1914_v61 = vadd.f32 %v1913_v40, %v4477_v46 }
 0x37d   : > { %v2543_v58 = vmax.f32 %v2394_v1, %v2395_v28  ;;  %v2396_v32 = vmax.f32 %v2041_v60, 0.0 }
 0x37f   : > { %2733 = vmax.xlane.f32.xlu2 %v2543_v58 }
 0x380   : > { %v2298_v21 = vpop.f32.mrf.mxu3 }
 0x381   : > { %v2171_v10 = vpop.f32.mrf.mxu2  ;;  %v2299_v26 = vadd.f32 %v2298_v21, %v2170_v3 }
 0x382   : > { %v2042_v14 = vpop.f32.mrf.mxu1  ;;  %v2706_v47 = vpop.xlane.xlu0 %2705  ;;  %v2172_v49 = vadd.f32 %v2171_v10, %v4477_v46 }
 0x383   : > { %v2397_v16 = vmax.f32 %v2299_v26, 0.0  ;;  %2773 = vst.msk [vmem:[%s4493_s16 + $0xe8] sm:$0xff] %vm2743_vm1, %v2706_v47  ;;  %v2043_v9 = vadd.f32 %v2042_v14, %v1914_v61  ;;  %v1916_v34 = vpop.f32.mrf.mxu0 }
 0x384   : > { %v1917_v41 = vadd.f32 %v1916_v34, %v4495_v27 }
 0x385   : > { %v2544_v36 = vmax.f32 %v2396_v32, %v2397_v16  ;;  %v2398_v63 = vmax.f32 %v2043_v9, 0.0 }
 0x387   : > { %2735 = vmax.xlane.f32.xlu0 %v2544_v36 }
 0x388   : > { %v2300_v7 = vpop.f32.mrf.mxu3 }
 0x389   : > { %v2301_v25 = vadd.f32 %v2300_v7, %v2172_v49  ;;  %v2174_v54 = vpop.f32.mrf.mxu2 }
 0x38a   : > { %v2045_v17 = vpop.f32.mrf.mxu1  ;;  %v2708_v5 = vpop.xlane.xlu1 %2707  ;;  %v2175_v51 = vadd.f32 %v2174_v54, %v4495_v27 }
 0x38b   : > { %v2399_v6 = vmax.f32 %v2301_v25, 0.0  ;;  %2774 = vst.msk [vmem:[%s4493_s16 + $0xf0] sm:$0xff] %vm2743_vm1, %v2708_v5  ;;  %v2046_v8 = vadd.f32 %v2045_v17, %v1917_v41  ;;  %v1918_v38 = vpop.f32.mrf.mxu0 }
 0x38c   : > { %v1919_v11 = vadd.f32 %v1918_v38, %v4509_v12 }
 0x38d   : > { %v2545_v50 = vmax.f32 %v2398_v63, %v2399_v6  ;;  %v2400_v56 = vmax.f32 %v2046_v8, 0.0 }
 0x38f   : > { %2737 = vmax.xlane.f32.xlu1 %v2545_v50 }
 0x390   : > { %v2303_v46 = vpop.f32.mrf.mxu3 }
 0x391   : > { %v2304_v22 = vadd.f32 %v2303_v46, %v2175_v51  ;;  %v2176_v30 = vpop.f32.mrf.mxu2 }
 0x392   : > { %v2710_v15 = vpop.xlane.xlu2 %2709  ;;  %v2047_v53 = vpop.f32.mrf.mxu1  ;;  %v2177_v27 = vadd.f32 %v2176_v30, %v4509_v12 }
 0x393   : > { %v2401_v43 = vmax.f32 %v2304_v22, 0.0  ;;  %2775 = vst.msk [vmem:[%s4493_s16 + $0xf8] sm:$0xff] %vm2743_vm1, %v2710_v15  ;;  %v2048_v0 = vadd.f32 %v2047_v53, %v1919_v11 }
 0x395   : > { %v2546_v24 = vmax.f32 %v2400_v56, %v2401_v43  ;;  %v2402_v57 = vmax.f32 %v2048_v0, 0.0 }
 0x397   : > { %2739 = vmax.xlane.f32.xlu2 %v2546_v24 }
 0x398   : > { %v2305_v2 = vpop.f32.mrf.mxu3 }
 0x399   : > { %v2306_v42 = vadd.f32 %v2305_v2, %v2177_v27 }
 0x39a   : > { %v2712_v33 = vpop.xlane.xlu0 %2711 }
 0x39b   : > { %v2403_v62 = vmax.f32 %v2306_v42, 0.0  ;;  %2776 = vst.msk [vmem:[%s4493_s16 + $0x100] sm:$0xff] %vm2743_vm1, %v2712_v33 }
 0x39d   : > { %v2547_v45 = vmax.f32 %v2402_v57, %v2403_v62 }
 0x39f   : > { %2741 = vmax.xlane.f32.xlu0 %v2547_v45 }
 0x3a2   : > { %v2714_v13 = vpop.xlane.xlu1 %2713 }
 0x3a3   : > { %2777 = vst.msk [vmem:[%s4493_s16 + $0x108] sm:$0xff] %vm2743_vm1, %v2714_v13 }
 0x3aa   : > { %v2716_v12 = vpop.xlane.xlu2 %2715 }
 0x3ab   : > { %2778 = vst.msk [vmem:[%s4493_s16 + $0x110] sm:$0xff] %vm2743_vm1, %v2716_v12 }
 0x3b2   : > { %v2718_v29 = vpop.xlane.xlu0 %2717 }
 0x3b3   : > { %2779 = vst.msk [vmem:[%s4493_s16 + $0x118] sm:$0xff] %vm2743_vm1, %v2718_v29 }
 0x3ba   : > { %v2720_v59 = vpop.xlane.xlu1 %2719 }
 0x3bb   : > { %2780 = vst.msk [vmem:[%s4493_s16 + $0x120] sm:$0xff] %vm2743_vm1, %v2720_v59 }
 0x3c2   : > { %v2722_v4 = vpop.xlane.xlu2 %2721 }
 0x3c3   : > { %2781 = vst.msk [vmem:[%s4493_s16 + $0x128] sm:$0xff] %vm2743_vm1, %v2722_v4 }
 0x3ca   : > { %v2724_v44 = vpop.xlane.xlu0 %2723 }
 0x3cb   : > { %2782 = vst.msk [vmem:[%s4493_s16 + $0x130] sm:$0xff] %vm2743_vm1, %v2724_v44 }
 0x3d2   : > { %v2726_v20 = vpop.xlane.xlu1 %2725 }
 0x3d3   : > { %2783 = vst.msk [vmem:[%s4493_s16 + $0x138] sm:$0xff] %vm2743_vm1, %v2726_v20 }
 0x3da   : > { %v2728_v37 = vpop.xlane.xlu2 %2727 }
 0x3db   : > { %2784 = vst.msk [vmem:[%s4493_s16 + $0x140] sm:$0xff] %vm2743_vm1, %v2728_v37 }
 0x3e2   : > { %v2730_v19 = vpop.xlane.xlu0 %2729 }
 0x3e3   : > { %2785 = vst.msk [vmem:[%s4493_s16 + $0x148] sm:$0xff] %vm2743_vm1, %v2730_v19 }
 0x3ea   : > { %v2732_v31 = vpop.xlane.xlu1 %2731 }
 0x3eb   : > { %2786 = vst.msk [vmem:[%s4493_s16 + $0x150] sm:$0xff] %vm2743_vm1, %v2732_v31 }
 0x3f2   : > { %v2734_v23 = vpop.xlane.xlu2 %2733 }
 0x3f3   : > { %2787 = vst.msk [vmem:[%s4493_s16 + $0x158] sm:$0xff] %vm2743_vm1, %v2734_v23 }
 0x3fa   : > { %v2736_v18 = vpop.xlane.xlu0 %2735 }
 0x3fb   : > { %2788 = vst.msk [vmem:[%s4493_s16 + $0x160] sm:$0xff] %vm2743_vm1, %v2736_v18 }
 0x402   : > { %v2738_v55 = vpop.xlane.xlu1 %2737 }
 0x403   : > { %2789 = vst.msk [vmem:[%s4493_s16 + $0x168] sm:$0xff] %vm2743_vm1, %v2738_v55 }
 0x40a   : > { %v2740_v52 = vpop.xlane.xlu2 %2739 }
 0x40b   : > { %2790 = vst.msk [vmem:[%s4493_s16 + $0x170] sm:$0xff] %vm2743_vm1, %v2740_v52 }
 0x412   : > { %v2742_v35 = vpop.xlane.xlu0 %2741 }
 0x413   : > { %2791 = vst.msk [vmem:[%s4493_s16 + $0x178] sm:$0xff] %vm2743_vm1, %v2742_v35 }
 0x414 PF: > { %s15_s20 = sadd.s32 1, %s3229_s20   ;;  %s4862_s18 = smov %s3225_s19 }
 0x415   : > { %p12_p5 = scmp.ge.s32.totalorder %s15_s20, 4   ;;  %s4863_s19 = smov %s4865_s21 }
 0x417   :  { %14 = sbr.rel (!%p12_p5) target bundleno = 2 (0x2), region = 78 }

</bundles_post_ra>
